<compile_context>
chip_gen: v7x
topology: tpu7x:2x2x1
jax: 0.10.0
libtpu: 0.0.40
codegen_flags: <defaults>
</compile_context>

<pallas_src>
import math
import jax
import jax.numpy as jnp
from jax.experimental import pallas as pl
from jax.experimental.pallas import tpu as pltpu

# ---------------- small, module-consistent config ----------------
D_MODEL = 32          # td_model
D_INNER = 64          # td_inner
D_STATE = 16          # td_state
D_XB = 32             # td_xb
DT_RANK = 8           # tdt_rank
D_CONV = 4            # td_conv_kernel
BATCH = 2
SEQLEN = 8

NUM_XB_HEAD = D_XB // D_STATE             # 2
NUM_C_HEAD = D_INNER // D_STATE           # 4
REPEAT_GROUP = NUM_C_HEAD // NUM_XB_HEAD  # 2
D_INNER_PROJ = 2 * D_INNER + 2 * D_XB + DT_RANK  # 200  (z, x, B, C, dt)

TOKENS = BATCH * SEQLEN          # 16 rows, l-major: row = l*BATCH + b
FLAT = D_INNER * D_STATE         # 1024 flattened (channel, state) lane axis
OUT_PAD = 128                    # lane-dense output width for the final store

# fused front-end output layout (all 128-lane aligned segment offsets)
SEG_PAD = 128
OFF_CONV = 0
OFF_Z = SEG_PAD                  # 128
OFF_DT = 2 * SEG_PAD             # 256
OFF_B = OFF_DT + FLAT            # 1280
OFF_C = OFF_B + FLAT             # 2304
N_FUSED = OFF_C + FLAT           # 3328

DT_MIN, DT_MAX, DT_INIT_FLOOR = 1e-3, 1e-1, 1e-4


def _softplus(x):
    # matches F.softplus with threshold=20
    return jnp.where(x > 20.0, x, jnp.log(1.0 + jnp.exp(x)))


def _silu(x):
    return x * jax.nn.sigmoid(x)


# ---------------- the Pallas kernel (single invocation, batch folded) ----------------
def mamba2_kernel(h_ref, wbig_ref, wrep_ref, esum_ref, wout_ref, const_ref,
                  out_ref, sc_ref):
    # ONE fused front-end matmul: conv taps + z + dt_exp + B_exp + C_exp.
    fused = jnp.dot(h_ref[...], wbig_ref[...], preferred_element_type=jnp.float32)

    conv_pre = fused[:, OFF_CONV:OFF_CONV + SEG_PAD]      # (T,128) cols 32: are zero
    z        = fused[:, OFF_Z:OFF_Z + SEG_PAD]            # (T,128) cols 64: are zero
    dt_exp   = fused[:, OFF_DT:OFF_DT + FLAT]             # (T,1024)
    b_exp    = fused[:, OFF_B:OFF_B + FLAT]               # (T,1024)
    c_exp    = fused[:, OFF_C:OFF_C + FLAT]               # (T,1024)

    conv_b  = const_ref[0:1, :SEG_PAD]                    # (1,128)
    d_pad   = const_ref[1:2, :SEG_PAD]                    # (1,128)
    bias_dt = const_ref[2:3, :]                           # (1,1024)  2*dt_proj_bias (dup)
    a_flat  = const_ref[3:4, :]                           # (1,1024)  -exp(A_log)

    # depthwise causal conv (tap-summed already by the fused matmul) + silu
    xc = _silu(conv_pre + conv_b)                         # (T,128) cols 32: stay zero

    # repeat_kv at 64 lanes (skip term) and 1024 lanes (scan) in one matmul
    xrep_all  = jnp.dot(xc, wrep_ref[...], preferred_element_type=jnp.float32)
    x_rep     = xrep_all[:, :SEG_PAD]                     # (T,128) cols 64: are zero
    x_rep_exp = xrep_all[:, SEG_PAD:]                     # (T,1024)

    # lane-dense scan operands, purely elementwise (EUP softplus/exp, VPU muls)
    delta  = _softplus(dt_exp + bias_dt)                  # (T,1024)
    deltaA = jnp.exp(delta * a_flat)                      # (T,1024)
    dBu    = delta * x_rep_exp * b_exp                    # (T,1024)

    # sequential SSM recurrence over time (both batch rows per step); store the
    # state*C rows and segment-sum once after the loop.
    state = jnp.zeros((BATCH, FLAT), jnp.float32)
    for l in range(SEQLEN):
        r = l * BATCH
        state = deltaA[r:r + BATCH, :] * state + dBu[r:r + BATCH, :]
        sc_ref[r:r + BATCH, :] = state * c_exp[r:r + BATCH, :]

    # one post-loop segment sum (1024 -> 64, padded to 128), skip, gate, out_proj
    y = jnp.dot(sc_ref[...], esum_ref[...], preferred_element_type=jnp.float32)
    y = (y + x_rep * d_pad) * _silu(z)                    # (T,128) cols 64: stay zero
    out_ref[...] = jnp.dot(y, wout_ref[...], preferred_element_type=jnp.float32)


# ---------------- wrapper: host-side weight folding + pallas_call ----------------
def _prep_kernel_operands(params):
    # In a real model these folds are done once at load time; they never run inside
    # the kernel and are all evaluated in HIGHEST precision.
    w_in, conv_w, conv_b, w_dt, b_dt, a_log, d_param, w_out = params
    hp = jax.lax.Precision.HIGHEST

    w_z     = w_in[:, :D_INNER]
    w_xp    = w_in[:, D_INNER:D_INNER + D_XB]
    w_bp    = w_in[:, D_INNER + D_XB:D_INNER + 2 * D_XB]
    w_cp    = w_in[:, D_INNER + 2 * D_XB:2 * D_INNER + 2 * D_XB]
    w_dt_in = w_in[:, 2 * D_INNER + 2 * D_XB:]

    d_idx = jnp.arange(D_INNER)
    col_d = jnp.repeat(d_idx, D_STATE)                  # (1024,) channel per column
    col_s = jnp.tile(jnp.arange(D_STATE), D_INNER)      # (1024,) state per column

    # 0/1 expansion matrices (host-side only; everything is folded into weights)
    e_dup = (d_idx[:, None] == col_d[None, :]).astype(jnp.float32)            # (64,1024)
    e_sum = jnp.transpose(e_dup)                                              # (1024,64)
    eb_src = (col_d // (REPEAT_GROUP * D_STATE)) * D_STATE + col_s
    e_b = (jnp.arange(D_XB)[:, None] == eb_src[None, :]).astype(jnp.float32)  # (32,1024)
    ec_src = (col_d // D_STATE) * D_STATE + col_s
    e_c = (d_idx[:, None] == ec_src[None, :]).astype(jnp.float32)             # (64,1024)
    rep_src = (d_idx // (REPEAT_GROUP * D_STATE)) * D_STATE + (d_idx % D_STATE)
    r_rep = (jnp.arange(D_XB)[:, None] == rep_src[None, :]).astype(jnp.float32)  # (32,64)

    def padc(w, width):
        return jnp.pad(w, ((0, 0), (0, width - w.shape[1])))

    # dt_proj fused into in_proj and duplicated straight to the 1024-lane layout
    w_dt_exp = jnp.dot(jnp.dot(w_dt_in, w_dt, precision=hp), e_dup, precision=hp)
    w_bexp = jnp.dot(w_bp, e_b, precision=hp)           # B expansion folded in
    w_cexp = jnp.dot(w_cp, e_c, precision=hp)           # C expansion folded in

    # Fused front-end weight: row segments = [h | h<<1 | h<<2 | h<<3]; columns =
    # [conv(pad 128) | z(pad 128) | dt_exp(1024) | b_exp(1024) | c_exp(1024)].
    # Conv segment for shift s uses tap k = D_CONV-1-s; all non-conv segments have
    # zero rows for the shifted input copies.
    conv_blk = jnp.concatenate(
        [w_xp * conv_w[D_CONV - 1 - s][None, :] for s in range(D_CONV)], axis=0)   # (128,32)
    top = jnp.concatenate([padc(w_z, SEG_PAD), w_dt_exp, w_bexp, w_cexp], axis=1)  # (32,3200)
    w_big = jnp.concatenate(
        [padc(conv_blk, SEG_PAD),
         jnp.concatenate(
             [top, jnp.zeros((D_MODEL * (D_CONV - 1), top.shape[1]), jnp.float32)],
             axis=0)],
        axis=1)                                                                    # (128,3328)

    # repeat_kv weight: 64-lane (skip) and 1024-lane (scan) outputs in one matmul,
    # driven by the 128-lane xc (rows 32:128 are zero).
    w_rep = jnp.concatenate(
        [jnp.concatenate([padc(r_rep, SEG_PAD),
                          jnp.dot(r_rep, e_dup, precision=hp)], axis=1),
         jnp.zeros((SEG_PAD - D_XB, SEG_PAD + FLAT), jnp.float32)], axis=0)        # (128,1152)

    e_sum_pad = padc(e_sum, SEG_PAD)                                               # (1024,128)
    w_out_pad = jnp.concatenate(
        [padc(w_out, OUT_PAD),
         jnp.zeros((SEG_PAD - D_INNER, OUT_PAD), jnp.float32)], axis=0)            # (128,128)

    # packed small constants: row0 conv bias, row1 D, row2 2*dt_bias (dup), row3 A
    consts = jnp.stack([
        padc(conv_b, FLAT)[0],
        padc(d_param, FLAT)[0],
        jnp.dot(2.0 * b_dt, e_dup, precision=hp)[0],    # module adds dt_proj_bias twice
        (-jnp.exp(a_log)).reshape(FLAT),                # A = -exp(A_log), precomputed
    ], axis=0)                                                                     # (4,1024)

    return w_big, w_rep, e_sum_pad, w_out_pad, consts


def mamba2_forward(hs, params):
    w_big, w_rep, e_sum_pad, w_out_pad, consts = _prep_kernel_operands(params)

    # token-major rows (row = l*BATCH + b) plus D_CONV-1 causally time-shifted
    # copies along lanes -> K=128 LHS for the fused front-end matmul.  Shifting by
    # s timesteps = s*BATCH rows with zero fill (never crosses a batch row).
    hs_tok = jnp.transpose(hs, (1, 0, 2)).reshape(TOKENS, D_MODEL)
    shifted = [hs_tok]
    for s in range(1, D_CONV):
        shifted.append(jnp.concatenate(
            [jnp.zeros((s * BATCH, D_MODEL), hs_tok.dtype),
             hs_tok[:TOKENS - s * BATCH]], axis=0))
    h_all = jnp.concatenate(shifted, axis=1)                     # (16, 128)

    # Single invocation (no grid): all operands are whole-array VMEM blocks
    # (~2.9 MB total).  On v7x this runs on one TensorCore; at this size a 2-TC
    # split would not pay for its launch/sync overhead.
    vmem = pl.BlockSpec(memory_space=pltpu.MemorySpace.VMEM)
    out_pad = pl.pallas_call(
        mamba2_kernel,
        out_shape=jax.ShapeDtypeStruct((TOKENS, OUT_PAD), jnp.float32),
        in_specs=[vmem] * 6,
        out_specs=vmem,
        scratch_shapes=[pltpu.VMEM((TOKENS, FLAT), jnp.float32)],
    )(h_all, w_big, w_rep, e_sum_pad, w_out_pad, consts)

    out = out_pad[:, :D_MODEL].reshape(SEQLEN, BATCH, D_MODEL)
    return jnp.transpose(out, (1, 0, 2))


# ---------------- pure-JAX reference (mirrors the PyTorch forward) ----------------
def mamba2_ref(hs, params):
    w_in, conv_w, conv_b, w_dt, b_dt, a_log, d_param, w_out = params
    hp = jax.lax.Precision.HIGHEST
    ds = D_STATE
    zxbcdt = jnp.einsum('bld,dp->blp', hs, w_in, precision=hp)
    z = zxbcdt[..., :D_INNER]
    x = zxbcdt[..., D_INNER:D_INNER + D_XB]
    b_in = zxbcdt[..., D_INNER + D_XB:D_INNER + 2 * D_XB]
    c_in = zxbcdt[..., D_INNER + 2 * D_XB:2 * D_INNER + 2 * D_XB]
    dt_low = zxbcdt[..., 2 * D_INNER + 2 * D_XB:]
    dt = jnp.einsum('blr,rd->bld', dt_low, w_dt, precision=hp) + b_dt

    x_pad = jnp.pad(x, ((0, 0), (D_CONV - 1, 0), (0, 0)))
    acc = jnp.zeros_like(x)
    for k in range(D_CONV):
        acc = acc + x_pad[:, k:k + SEQLEN, :] * conv_w[k][None, None, :]
    xc = _silu(acc + conv_b)

    x_rep = jnp.concatenate(
        [xc[..., (i // REPEAT_GROUP) * ds:(i // REPEAT_GROUP + 1) * ds]
         for i in range(NUM_C_HEAD)], axis=-1)
    b_full = jnp.concatenate(
        [jnp.broadcast_to(
            b_in[:, :, None, (i // REPEAT_GROUP) * ds:(i // REPEAT_GROUP + 1) * ds],
            (BATCH, SEQLEN, ds, ds)) for i in range(NUM_C_HEAD)], axis=2)
    c_full = jnp.concatenate(
        [jnp.broadcast_to(c_in[:, :, None, i * ds:(i + 1) * ds],
                          (BATCH, SEQLEN, ds, ds)) for i in range(NUM_C_HEAD)], axis=2)

    delta = _softplus(dt + b_dt)
    A = -jnp.exp(a_log)
    deltaA = jnp.exp(delta[..., None] * A[None, None])
    dBu = delta[..., None] * b_full * x_rep[..., None]

    state = jnp.zeros((BATCH, D_INNER, D_STATE), jnp.float32)
    ys = []
    for l in range(SEQLEN):
        state = deltaA[:, l] * state + dBu[:, l]
        ys.append(jnp.sum(state * c_full[:, l], axis=-1))
    y = jnp.stack(ys, axis=1)
    y = y + x_rep * d_param
    y = y * _silu(z)
    return jnp.einsum('bld,dm->blm', y, w_out, precision=hp)


# ---------------- deterministic parameter construction ----------------
def make_params(key):
    ks = jax.random.split(key, 8)
    w_in = (jax.random.normal(ks[0], (D_MODEL, D_INNER_PROJ), jnp.float32)
            * (1.0 / math.sqrt(D_MODEL)))                                   # kaiming-ish
    a = 1.0 / math.sqrt(D_XB * D_CONV)
    conv_w = jax.random.uniform(ks[1], (D_CONV, D_XB), jnp.float32, -a, a)  # (K, d_xb) layout
    bnd = 1.0 / math.sqrt(D_CONV)                                           # fan_in of (d_xb,1,K)
    conv_b = jax.random.uniform(ks[2], (1, D_XB), jnp.float32, -bnd, bnd)
    dt_std = DT_RANK ** -0.5
    w_dt = jax.random.uniform(ks[3], (DT_RANK, D_INNER), jnp.float32, -dt_std, dt_std)
    dt = jnp.exp(jax.random.uniform(ks[4], (D_INNER,), jnp.float32)
                 * (math.log(DT_MAX) - math.log(DT_MIN)) + math.log(DT_MIN))
    dt = jnp.clip(dt, DT_INIT_FLOOR)
    b_dt = (dt + jnp.log(-jnp.expm1(-dt))).reshape(1, D_INNER)              # inv softplus
    a_log = jnp.broadcast_to(jnp.log(jnp.arange(1, D_STATE + 1, dtype=jnp.float32)),
                             (D_INNER, D_STATE))
    d_param = jnp.ones((1, D_INNER), jnp.float32)
    w_out = (jax.random.normal(ks[5], (D_INNER, D_MODEL), jnp.float32)
             * (1.0 / math.sqrt(D_INNER)))
    return (w_in, conv_w, conv_b, w_dt, b_dt, a_log, d_param, w_out)


if __name__ == "__main__":
    key = jax.random.PRNGKey(0)
    pkey, xkey = jax.random.split(key)
    params = make_params(pkey)
    hidden_states = jax.random.normal(xkey, (BATCH, SEQLEN, D_MODEL), jnp.float32)

    out = jax.jit(mamba2_forward)(hidden_states, params)
    out = jax.block_until_ready(out)

    ref = mamba2_ref(hidden_states, params)
    assert out.shape == (BATCH, SEQLEN, D_MODEL)
    # Tolerance vs the HIGHEST-precision reference: the in-kernel dots run at the
    # MXU's default (bf16-pass) precision; all pure-duplication matmuls were folded
    # host-side in HIGHEST precision, so error is at or below the previous version.
    assert jnp.allclose(out, ref, rtol=1e-2, atol=3e-3), "mismatch vs JAX reference"

    print("KERNEL_OK")
</pallas_src>

<mosaic_0001>
module attributes {stable_mosaic.version = 11 : i64} {
  func.func @mamba2_kernel(%arg0: memref<16x128xf32, #tpu.memory_space<vmem>>, %arg1: memref<128x3328xf32, #tpu.memory_space<vmem>>, %arg2: memref<128x1152xf32, #tpu.memory_space<vmem>>, %arg3: memref<1024x128xf32, #tpu.memory_space<vmem>>, %arg4: memref<128x128xf32, #tpu.memory_space<vmem>>, %arg5: memref<4x1024xf32, #tpu.memory_space<vmem>>, %arg6: memref<16x128xf32, #tpu.memory_space<vmem>>, %arg7: memref<16x1024xf32, #tpu.memory_space<vmem>>) attributes {dimension_semantics = [], scalar_prefetch = 0 : i64, scratch_operands = 1 : i64, tpu.core_type = #tpu.core_type<tc>} {
    %c0 = arith.constant 0 : index
    %c0_0 = arith.constant 0 : index
    %0 = vector.load %arg0[%c0, %c0_0] : memref<16x128xf32, #tpu.memory_space<vmem>>, vector<16x128xf32>
    %c0_1 = arith.constant 0 : index
    %c0_2 = arith.constant 0 : index
    %1 = vector.load %arg1[%c0_1, %c0_2] : memref<128x3328xf32, #tpu.memory_space<vmem>>, vector<128x3328xf32>
    %cst = arith.constant dense<0.000000e+00> : vector<16x3328xf32>
    %2 = tpu.matmul %0, %1, %cst {dimension_numbers = #tpu.dot_dimension_numbers<[1], [0], [0], [1], [0, 0, 1, 1], [], []>} : vector<16x128xf32>, vector<128x3328xf32>, vector<16x3328xf32> -> vector<16x3328xf32>
    %3 = vector.extract_strided_slice %2 {offsets = [0, 0], sizes = [16, 128], strides = [1, 1]} : vector<16x3328xf32> to vector<16x128xf32>
    %4 = vector.extract_strided_slice %2 {offsets = [0, 128], sizes = [16, 128], strides = [1, 1]} : vector<16x3328xf32> to vector<16x128xf32>
    %5 = vector.extract_strided_slice %2 {offsets = [0, 256], sizes = [16, 1024], strides = [1, 1]} : vector<16x3328xf32> to vector<16x1024xf32>
    %6 = vector.extract_strided_slice %2 {offsets = [0, 1280], sizes = [16, 1024], strides = [1, 1]} : vector<16x3328xf32> to vector<16x1024xf32>
    %7 = vector.extract_strided_slice %2 {offsets = [0, 2304], sizes = [16, 1024], strides = [1, 1]} : vector<16x3328xf32> to vector<16x1024xf32>
    %c0_3 = arith.constant 0 : index
    %c0_4 = arith.constant 0 : index
    %8 = vector.load %arg5[%c0_3, %c0_4] : memref<4x1024xf32, #tpu.memory_space<vmem>>, vector<1x128xf32>
    %c1 = arith.constant 1 : index
    %c0_5 = arith.constant 0 : index
    %9 = vector.load %arg5[%c1, %c0_5] : memref<4x1024xf32, #tpu.memory_space<vmem>>, vector<1x128xf32>
    %c2 = arith.constant 2 : index
    %c0_6 = arith.constant 0 : index
    %10 = vector.load %arg5[%c2, %c0_6] : memref<4x1024xf32, #tpu.memory_space<vmem>>, vector<1x1024xf32>
    %c3 = arith.constant 3 : index
    %c0_7 = arith.constant 0 : index
    %11 = vector.load %arg5[%c3, %c0_7] : memref<4x1024xf32, #tpu.memory_space<vmem>>, vector<1x1024xf32>
    %12 = vector.broadcast %8 : vector<1x128xf32> to vector<16x128xf32>
    %13 = arith.addf %3, %12 : vector<16x128xf32>
    %14 = arith.negf %13 : vector<16x128xf32>
    %15 = math.exp %14 : vector<16x128xf32>
    %cst_8 = arith.constant 1.000000e+00 : f32
    %16 = vector.broadcast %cst_8 : f32 to vector<16x128xf32>
    %17 = arith.addf %16, %15 : vector<16x128xf32>
    %18 = arith.divf %16, %17 : vector<16x128xf32>
    %19 = arith.mulf %13, %18 : vector<16x128xf32>
    %c0_9 = arith.constant 0 : index
    %c0_10 = arith.constant 0 : index
    %20 = vector.load %arg2[%c0_9, %c0_10] : memref<128x1152xf32, #tpu.memory_space<vmem>>, vector<128x1152xf32>
    %cst_11 = arith.constant dense<0.000000e+00> : vector<16x1152xf32>
    %21 = tpu.matmul %19, %20, %cst_11 {dimension_numbers = #tpu.dot_dimension_numbers<[1], [0], [0], [1], [0, 0, 1, 1], [], []>} : vector<16x128xf32>, vector<128x1152xf32>, vector<16x1152xf32> -> vector<16x1152xf32>
    %22 = vector.extract_strided_slice %21 {offsets = [0, 0], sizes = [16, 128], strides = [1, 1]} : vector<16x1152xf32> to vector<16x128xf32>
    %23 = vector.extract_strided_slice %21 {offsets = [0, 128], sizes = [16, 1024], strides = [1, 1]} : vector<16x1152xf32> to vector<16x1024xf32>
    %24 = vector.broadcast %10 : vector<1x1024xf32> to vector<16x1024xf32>
    %25 = arith.addf %5, %24 : vector<16x1024xf32>
    %cst_12 = arith.constant 2.000000e+01 : f32
    %26 = vector.broadcast %cst_12 : f32 to vector<16x1024xf32>
    %27 = arith.cmpf ogt, %25, %26 : vector<16x1024xf32>
    %28 = math.exp %25 : vector<16x1024xf32>
    %cst_13 = arith.constant 1.000000e+00 : f32
    %29 = vector.broadcast %cst_13 : f32 to vector<16x1024xf32>
    %30 = arith.addf %29, %28 : vector<16x1024xf32>
    %31 = math.log %30 : vector<16x1024xf32>
    %32 = arith.select %27, %25, %31 : vector<16x1024xi1>, vector<16x1024xf32>
    %33 = vector.broadcast %11 : vector<1x1024xf32> to vector<16x1024xf32>
    %34 = arith.mulf %32, %33 : vector<16x1024xf32>
    %35 = math.exp %34 : vector<16x1024xf32>
    %36 = arith.mulf %32, %23 : vector<16x1024xf32>
    %37 = arith.mulf %36, %6 : vector<16x1024xf32>
    %cst_14 = arith.constant 0.000000e+00 : f32
    %38 = vector.broadcast %cst_14 : f32 to vector<2x1024xf32>
    %39 = vector.extract_strided_slice %35 {offsets = [0, 0], sizes = [2, 1024], strides = [1, 1]} : vector<16x1024xf32> to vector<2x1024xf32>
    %40 = arith.mulf %39, %38 : vector<2x1024xf32>
    %41 = vector.extract_strided_slice %37 {offsets = [0, 0], sizes = [2, 1024], strides = [1, 1]} : vector<16x1024xf32> to vector<2x1024xf32>
    %42 = arith.addf %40, %41 : vector<2x1024xf32>
    %43 = vector.extract_strided_slice %7 {offsets = [0, 0], sizes = [2, 1024], strides = [1, 1]} : vector<16x1024xf32> to vector<2x1024xf32>
    %44 = arith.mulf %42, %43 : vector<2x1024xf32>
    %c0_15 = arith.constant 0 : index
    %c0_16 = arith.constant 0 : index
    %45 = vector.load %arg7[%c0_15, %c0_16] : memref<16x1024xf32, #tpu.memory_space<vmem>>, vector<2x1024xf32>
    tpu.vector_store %arg7[%c0_15, %c0_16], %44 {strides = array<i32>} : memref<16x1024xf32, #tpu.memory_space<vmem>>, vector<2x1024xf32>,
    %46 = vector.extract_strided_slice %35 {offsets = [2, 0], sizes = [2, 1024], strides = [1, 1]} : vector<16x1024xf32> to vector<2x1024xf32>
    %47 = arith.mulf %46, %42 : vector<2x1024xf32>
    %48 = vector.extract_strided_slice %37 {offsets = [2, 0], sizes = [2, 1024], strides = [1, 1]} : vector<16x1024xf32> to vector<2x1024xf32>
    %49 = arith.addf %47, %48 : vector<2x1024xf32>
    %50 = vector.extract_strided_slice %7 {offsets = [2, 0], sizes = [2, 1024], strides = [1, 1]} : vector<16x1024xf32> to vector<2x1024xf32>
    %51 = arith.mulf %49, %50 : vector<2x1024xf32>
    %c2_17 = arith.constant 2 : index
    %c0_18 = arith.constant 0 : index
    %52 = vector.load %arg7[%c2_17, %c0_18] : memref<16x1024xf32, #tpu.memory_space<vmem>>, vector<2x1024xf32>
    tpu.vector_store %arg7[%c2_17, %c0_18], %51 {strides = array<i32>} : memref<16x1024xf32, #tpu.memory_space<vmem>>, vector<2x1024xf32>,
    %53 = vector.extract_strided_slice %35 {offsets = [4, 0], sizes = [2, 1024], strides = [1, 1]} : vector<16x1024xf32> to vector<2x1024xf32>
    %54 = arith.mulf %53, %49 : vector<2x1024xf32>
    %55 = vector.extract_strided_slice %37 {offsets = [4, 0], sizes = [2, 1024], strides = [1, 1]} : vector<16x1024xf32> to vector<2x1024xf32>
    %56 = arith.addf %54, %55 : vector<2x1024xf32>
    %57 = vector.extract_strided_slice %7 {offsets = [4, 0], sizes = [2, 1024], strides = [1, 1]} : vector<16x1024xf32> to vector<2x1024xf32>
    %58 = arith.mulf %56, %57 : vector<2x1024xf32>
    %c4 = arith.constant 4 : index
    %c0_19 = arith.constant 0 : index
    %59 = vector.load %arg7[%c4, %c0_19] : memref<16x1024xf32, #tpu.memory_space<vmem>>, vector<2x1024xf32>
    tpu.vector_store %arg7[%c4, %c0_19], %58 {strides = array<i32>} : memref<16x1024xf32, #tpu.memory_space<vmem>>, vector<2x1024xf32>,
    %60 = vector.extract_strided_slice %35 {offsets = [6, 0], sizes = [2, 1024], strides = [1, 1]} : vector<16x1024xf32> to vector<2x1024xf32>
    %61 = arith.mulf %60, %56 : vector<2x1024xf32>
    %62 = vector.extract_strided_slice %37 {offsets = [6, 0], sizes = [2, 1024], strides = [1, 1]} : vector<16x1024xf32> to vector<2x1024xf32>
    %63 = arith.addf %61, %62 : vector<2x1024xf32>
    %64 = vector.extract_strided_slice %7 {offsets = [6, 0], sizes = [2, 1024], strides = [1, 1]} : vector<16x1024xf32> to vector<2x1024xf32>
    %65 = arith.mulf %63, %64 : vector<2x1024xf32>
    %c6 = arith.constant 6 : index
    %c0_20 = arith.constant 0 : index
    %66 = vector.load %arg7[%c6, %c0_20] : memref<16x1024xf32, #tpu.memory_space<vmem>>, vector<2x1024xf32>
    tpu.vector_store %arg7[%c6, %c0_20], %65 {strides = array<i32>} : memref<16x1024xf32, #tpu.memory_space<vmem>>, vector<2x1024xf32>,
    %67 = vector.extract_strided_slice %35 {offsets = [8, 0], sizes = [2, 1024], strides = [1, 1]} : vector<16x1024xf32> to vector<2x1024xf32>
    %68 = arith.mulf %67, %63 : vector<2x1024xf32>
    %69 = vector.extract_strided_slice %37 {offsets = [8, 0], sizes = [2, 1024], strides = [1, 1]} : vector<16x1024xf32> to vector<2x1024xf32>
    %70 = arith.addf %68, %69 : vector<2x1024xf32>
    %71 = vector.extract_strided_slice %7 {offsets = [8, 0], sizes = [2, 1024], strides = [1, 1]} : vector<16x1024xf32> to vector<2x1024xf32>
    %72 = arith.mulf %70, %71 : vector<2x1024xf32>
    %c8 = arith.constant 8 : index
    %c0_21 = arith.constant 0 : index
    %73 = vector.load %arg7[%c8, %c0_21] : memref<16x1024xf32, #tpu.memory_space<vmem>>, vector<2x1024xf32>
    tpu.vector_store %arg7[%c8, %c0_21], %72 {strides = array<i32>} : memref<16x1024xf32, #tpu.memory_space<vmem>>, vector<2x1024xf32>,
    %74 = vector.extract_strided_slice %35 {offsets = [10, 0], sizes = [2, 1024], strides = [1, 1]} : vector<16x1024xf32> to vector<2x1024xf32>
    %75 = arith.mulf %74, %70 : vector<2x1024xf32>
    %76 = vector.extract_strided_slice %37 {offsets = [10, 0], sizes = [2, 1024], strides = [1, 1]} : vector<16x1024xf32> to vector<2x1024xf32>
    %77 = arith.addf %75, %76 : vector<2x1024xf32>
    %78 = vector.extract_strided_slice %7 {offsets = [10, 0], sizes = [2, 1024], strides = [1, 1]} : vector<16x1024xf32> to vector<2x1024xf32>
    %79 = arith.mulf %77, %78 : vector<2x1024xf32>
    %c10 = arith.constant 10 : index
    %c0_22 = arith.constant 0 : index
    %80 = vector.load %arg7[%c10, %c0_22] : memref<16x1024xf32, #tpu.memory_space<vmem>>, vector<2x1024xf32>
    tpu.vector_store %arg7[%c10, %c0_22], %79 {strides = array<i32>} : memref<16x1024xf32, #tpu.memory_space<vmem>>, vector<2x1024xf32>,
    %81 = vector.extract_strided_slice %35 {offsets = [12, 0], sizes = [2, 1024], strides = [1, 1]} : vector<16x1024xf32> to vector<2x1024xf32>
    %82 = arith.mulf %81, %77 : vector<2x1024xf32>
    %83 = vector.extract_strided_slice %37 {offsets = [12, 0], sizes = [2, 1024], strides = [1, 1]} : vector<16x1024xf32> to vector<2x1024xf32>
    %84 = arith.addf %82, %83 : vector<2x1024xf32>
    %85 = vector.extract_strided_slice %7 {offsets = [12, 0], sizes = [2, 1024], strides = [1, 1]} : vector<16x1024xf32> to vector<2x1024xf32>
    %86 = arith.mulf %84, %85 : vector<2x1024xf32>
    %c12 = arith.constant 12 : index
    %c0_23 = arith.constant 0 : index
    %87 = vector.load %arg7[%c12, %c0_23] : memref<16x1024xf32, #tpu.memory_space<vmem>>, vector<2x1024xf32>
    tpu.vector_store %arg7[%c12, %c0_23], %86 {strides = array<i32>} : memref<16x1024xf32, #tpu.memory_space<vmem>>, vector<2x1024xf32>,
    %88 = vector.extract_strided_slice %35 {offsets = [14, 0], sizes = [2, 1024], strides = [1, 1]} : vector<16x1024xf32> to vector<2x1024xf32>
    %89 = arith.mulf %88, %84 : vector<2x1024xf32>
    %90 = vector.extract_strided_slice %37 {offsets = [14, 0], sizes = [2, 1024], strides = [1, 1]} : vector<16x1024xf32> to vector<2x1024xf32>
    %91 = arith.addf %89, %90 : vector<2x1024xf32>
    %92 = vector.extract_strided_slice %7 {offsets = [14, 0], sizes = [2, 1024], strides = [1, 1]} : vector<16x1024xf32> to vector<2x1024xf32>
    %93 = arith.mulf %91, %92 : vector<2x1024xf32>
    %c14 = arith.constant 14 : index
    %c0_24 = arith.constant 0 : index
    %94 = vector.load %arg7[%c14, %c0_24] : memref<16x1024xf32, #tpu.memory_space<vmem>>, vector<2x1024xf32>
    tpu.vector_store %arg7[%c14, %c0_24], %93 {strides = array<i32>} : memref<16x1024xf32, #tpu.memory_space<vmem>>, vector<2x1024xf32>,
    %c0_25 = arith.constant 0 : index
    %c0_26 = arith.constant 0 : index
    %95 = vector.load %arg7[%c0_25, %c0_26] : memref<16x1024xf32, #tpu.memory_space<vmem>>, vector<16x1024xf32>
    %c0_27 = arith.constant 0 : index
    %c0_28 = arith.constant 0 : index
    %96 = vector.load %arg3[%c0_27, %c0_28] : memref<1024x128xf32, #tpu.memory_space<vmem>>, vector<1024x128xf32>
    %cst_29 = arith.constant dense<0.000000e+00> : vector<16x128xf32>
    %97 = tpu.matmul %95, %96, %cst_29 {dimension_numbers = #tpu.dot_dimension_numbers<[1], [0], [0], [1], [0, 0, 1, 1], [], []>} : vector<16x1024xf32>, vector<1024x128xf32>, vector<16x128xf32> -> vector<16x128xf32>
    %98 = vector.broadcast %9 : vector<1x128xf32> to vector<16x128xf32>
    %99 = arith.mulf %22, %98 : vector<16x128xf32>
    %100 = arith.addf %97, %99 : vector<16x128xf32>
    %101 = arith.negf %4 : vector<16x128xf32>
    %102 = math.exp %101 : vector<16x128xf32>
    %cst_30 = arith.constant 1.000000e+00 : f32
    %103 = vector.broadcast %cst_30 : f32 to vector<16x128xf32>
    %104 = arith.addf %103, %102 : vector<16x128xf32>
    %105 = arith.divf %103, %104 : vector<16x128xf32>
    %106 = arith.mulf %4, %105 : vector<16x128xf32>
    %107 = arith.mulf %100, %106 : vector<16x128xf32>
    %c0_31 = arith.constant 0 : index
    %c0_32 = arith.constant 0 : index
    %108 = vector.load %arg4[%c0_31, %c0_32] : memref<128x128xf32, #tpu.memory_space<vmem>>, vector<128x128xf32>
    %cst_33 = arith.constant dense<0.000000e+00> : vector<16x128xf32>
    %109 = tpu.matmul %107, %108, %cst_33 {dimension_numbers = #tpu.dot_dimension_numbers<[1], [0], [0], [1], [0, 0, 1, 1], [], []>} : vector<16x128xf32>, vector<128x128xf32>, vector<16x128xf32> -> vector<16x128xf32>
    %c0_34 = arith.constant 0 : index
    %c0_35 = arith.constant 0 : index
    %110 = vector.load %arg6[%c0_34, %c0_35] : memref<16x128xf32, #tpu.memory_space<vmem>>, vector<16x128xf32>
    tpu.vector_store %arg6[%c0_34, %c0_35], %109 {strides = array<i32>} : memref<16x128xf32, #tpu.memory_space<vmem>>, vector<16x128xf32>,
    return
  }
}

</mosaic_0001>

<bundles_post_ra>
// kernel: eq.34
= control target key start
LH: loop header
LB: loop body
LE: loop exit
PB: predicated region body
PF: predicated region fallthrough
CT: control target
= control target key end

     0   :  { %vm4_vm0 = vcmask 1047556   ;;  %s99_s14 = smov 112   ;;  %s100_s19 = smov 80   ;;  %vm6_vm1 = vcmask 130048   ;;  %vm16_vm2 = vcmask 1048448   ;;  %vm26_vm3 = vcmask 917248   ;;  %s196_s0 = inlined_call_operand.vmem [shape: s32[64,16], index: 0, kind: input, shape index: {}]   ;;  %s197_s1 = inlined_call_operand.vmem [shape: s32[1024], index: 1, kind: output, shape index: {}]  }
   0x1   :  { %v78_v0 = vld [vmem:[%s196_s0 + $0x7] ss:$8 sm:$0xf]   ;;  %v82_v3 = vld [vmem:[%s196_s0 + $0x5] ss:$8 sm:$0xf]  }
   0x2   :  { %v79_v1 = vld [vmem:[%s196_s0 + $0x7] ss:$8 sm:$0xf0]   ;;  %v83_v4 = vld [vmem:[%s196_s0 + $0x5] ss:$8 sm:$0xf0]  }
   0x3   :  { %v13_v2 = vsel %vm4_vm0, %v79_v1, %v78_v0  ;;  %v33_v5 = vsel %vm4_vm0, %v83_v4, %v82_v3  ;;  %v80_v6 = vld [vmem:[%s196_s0 + $0x6] ss:$8 sm:$0xf]   ;;  %v84_v9 = vld [vmem:[%s196_s0 + $0x4] ss:$8 sm:$0xf]  }
   0x4   :  { %14 = vrot.lane.b32.xlu0 %v13_v2, %s99_s14  ;;  %v81_v7 = vld [vmem:[%s196_s0 + $0x6] ss:$8 sm:$0xf0]   ;;  %34 = vrot.lane.b32.xlu1 %v33_v5, %s100_s19  ;;  %v85_v10 = vld [vmem:[%s196_s0 + $0x4] ss:$8 sm:$0xf0]  }
   0x5   :  { %v23_v8 = vsel %vm4_vm0, %v81_v7, %v80_v6  ;;  %v86_v11 = vld [vmem:[%s196_s0 + $0x3] ss:$8 sm:$0xf]   ;;  %v43_v12 = vsel %vm4_vm0, %v85_v10, %v84_v9  ;;  %s101_s28 = smov 96   ;;  %s102_s4 = smov 64   ;;  %vm36_vm4 = vcmask 786048  }
   0x6   :  { %v87_v13 = vld [vmem:[%s196_s0 + $0x3] ss:$8 sm:$0xf0]   ;;  %v88_v14 = vld [vmem:[%s196_s0 + $0x2] ss:$8 sm:$0xf]  }
   0x7   :  { %v89_v15 = vld [vmem:[%s196_s0 + $0x2] ss:$8 sm:$0xf0]   ;;  %v53_v16 = vsel %vm4_vm0, %v87_v13, %v86_v11  ;;  %v90_v17 = vld [vmem:[%s196_s0 + $0x1] ss:$8 sm:$0xf]  }
   0x8   :  { %24 = vrot.lane.b32.xlu0 %v23_v8, %s101_s28  ;;  %44 = vrot.lane.b32.xlu1 %v43_v12, %s102_s4  ;;  %v63_v18 = vsel %vm4_vm0, %v89_v15, %v88_v14  ;;  %v91_v19 = vld [vmem:[%s196_s0 + $0x1] ss:$8 sm:$0xf0]   ;;  %v2_v20 = vld [vmem:[%s196_s0] ss:$8 sm:$0xf]  }
   0x9   :  { %v3_v21 = vld [vmem:[%s196_s0] ss:$8 sm:$0xf0]   ;;  %s103_s0 = smov 48   ;;  %s104_s13 = smov 32   ;;  %v73_v23 = vsel %vm4_vm0, %v91_v19, %v90_v17  ;;  %vm46_vm5 = vcmask 654848  }
   0xa   :  { %v5_v22 = vsel %vm4_vm0, %v3_v21, %v2_v20  ;;  %s105_s16 = smov 16   ;;  %vm56_vm6 = vcmask 523648   ;;  %vm66_vm7 = vcmask 392448   ;;  %vm76_vm8 = vcmask 261248  }
   0xb   :  { %7 = vst.msk [vmem:[%s197_s1] sm:$0xff] %vm6_vm1, %v5_v22  }
   0xc   :  { %54 = vrot.lane.b32.xlu0 %v53_v16, %s103_s0  ;;  %64 = vrot.lane.b32.xlu1 %v63_v18, %s104_s13 }
  0x10   :  { %74 = vrot.lane.b32.xlu0 %v73_v23, %s105_s16 }
  0x76   :  { %v15_v24 = vpop.permute.xlu0 %14   ;;  %v35_v25 = vpop.permute.xlu1 %34  }
  0x77   :  { %17 = vst.msk [vmem:[%s197_s1] sm:$0xff] %vm16_vm2, %v15_v24  }
  0x7a   :  { %v25_v26 = vpop.permute.xlu0 %24   ;;  %v45_v27 = vpop.permute.xlu1 %44  }
  0x7b   :  { %27 = vst.msk [vmem:[%s197_s1] sm:$0xff] %vm26_vm3, %v25_v26  }
  0x7c   :  { %37 = vst.msk [vmem:[%s197_s1] sm:$0xff] %vm36_vm4, %v35_v25  }
  0x7d   :  { %47 = vst.msk [vmem:[%s197_s1] sm:$0xff] %vm46_vm5, %v45_v27  }
  0x7e   :  { %v55_v28 = vpop.permute.xlu0 %54   ;;  %v65_v29 = vpop.permute.xlu1 %64  }
  0x7f   :  { %57 = vst.msk [vmem:[%s197_s1] sm:$0xff] %vm56_vm6, %v55_v28  }
  0x80   :  { %67 = vst.msk [vmem:[%s197_s1] sm:$0xff] %vm66_vm7, %v65_v29  }
  0x82   :  { %v75_v30 = vpop.permute.xlu0 %74  }
  0x83   :  { %77 = vst.msk [vmem:[%s197_s1] sm:$0xff] %vm76_vm8, %v75_v30  }

// kernel: mamba2_forward.1
= control target key start
LH: loop header
LB: loop body
LE: loop exit
PB: predicated region body
PF: predicated region fallthrough
CT: control target
= control target key end

     0   :  { %v4390_v3 = vmov 0.0   ;;  %s7418_s1 = inlined_call_operand.vmem [shape: f32[128,3328], index: 1, kind: input, shape index: {}]   ;;  %s7419_s0 = inlined_call_operand.vmem [shape: f32[16,128], index: 0, kind: input, shape index: {}]   ;;  %s7420_s2 = inlined_call_operand.vmem [shape: f32[128,1152], index: 2, kind: input, shape index: {}]   ;;  %s7421_s5 = inlined_call_operand.vmem [shape: f32[4,1024], index: 5, kind: input, shape index: {}]   ;;  %s7422_s3 = inlined_call_operand.vmem [shape: f32[1024,128], index: 3, kind: input, shape index: {}]   ;;  %s7423_s4 = inlined_call_operand.vmem [shape: f32[128,128], index: 4, kind: input, shape index: {}]   ;;  %s7424_s6 = inlined_call_operand.vmem [shape: f32[16,128], index: 6, kind: output, shape index: {}]  }
   0x1   :  { %v26_v0 = vld [vmem:[%s7418_s1 + $0x8] sm:$0xff]  ;;  %v52_v1 = vld [vmem:[%s7418_s1 + $0xd8] sm:$0xff]  ;;  %v25_v2 = vld [vmem:[%s7418_s1] sm:$0xff]  ;;  %505 = vmatprep.mubr.f32.mxu0 %v4390_v3  ;;  %582 = vmatprep.mubr.f32.mxu1 %v4390_v3 }
   0x2   :  { %v3538_v4 = vpack.c.bf16 %v52_v1, %v26_v0  ;;  %v51_v5 = vld [vmem:[%s7418_s1 + $0xd0] sm:$0xff]  ;;  %v78_v6 = vld [vmem:[%s7418_s1 + $0x1a8] sm:$0xff]  ;;  %v104_v7 = vld [vmem:[%s7418_s1 + $0x278] sm:$0xff] }
   0x3   :  { %v3540_v8 = vpack.c.bf16 %v51_v5, %v25_v2  ;;  %v3542_v9 = vpack.c.bf16 %v104_v7, %v78_v6  ;;  %v77_v10 = vld [vmem:[%s7418_s1 + $0x1a0] sm:$0xff]  ;;  %v103_v11 = vld [vmem:[%s7418_s1 + $0x270] sm:$0xff]  ;;  %v130_v12 = vld [vmem:[%s7418_s1 + $0x348] sm:$0xff] }
   0x4   :  { %3539 = vmatprep.subr.bf16.mxu0 %v3538_v4  ;;  %v156_v13 = vld [vmem:[%s7418_s1 + $0x418] sm:$0xff]  ;;  %v3544_v14 = vpack.c.bf16 %v103_v11, %v77_v10  ;;  %v129_v16 = vld [vmem:[%s7418_s1 + $0x340] sm:$0xff]  ;;  %v155_v17 = vld [vmem:[%s7418_s1 + $0x410] sm:$0xff] }
   0x5   :  { %3541 = vmatpush1.bf16.msra.mxu0 %v3540_v8  ;;  %v3546_v15 = vpack.c.bf16 %v156_v13, %v130_v12  ;;  %v182_v18 = vld [vmem:[%s7418_s1 + $0x4e8] sm:$0xff]  ;;  %v208_v19 = vld [vmem:[%s7418_s1 + $0x5b8] sm:$0xff]  ;;  %v3548_v20 = vpack.c.bf16 %v155_v17, %v129_v16  ;;  %v27_v23 = vld [vmem:[%s7418_s1 + $0x10] sm:$0xff] }
   0x6   :  { %3543 = vmatprep.subr.bf16.mxu0 %v3542_v9  ;;  %v28_v21 = vld [vmem:[%s7418_s1 + $0x18] sm:$0xff]  ;;  %v54_v22 = vld [vmem:[%s7418_s1 + $0xe8] sm:$0xff]  ;;  %v3550_v24 = vpack.c.bf16 %v208_v19, %v182_v18  ;;  %v181_v25 = vld [vmem:[%s7418_s1 + $0x4e0] sm:$0xff] }
   0x7   :  { %v207_v26 = vld [vmem:[%s7418_s1 + $0x5b0] sm:$0xff]  ;;  %v3570_v27 = vpack.c.bf16 %v54_v22, %v28_v21  ;;  %v53_v28 = vld [vmem:[%s7418_s1 + $0xe0] sm:$0xff]  ;;  %v234_v29 = vld [vmem:[%s7418_s1 + $0x688] sm:$0xff] }
   0x8   :  { %v260_v30 = vld [vmem:[%s7418_s1 + $0x758] sm:$0xff]  ;;  %v3572_v31 = vpack.c.bf16 %v53_v28, %v27_v23  ;;  %v106_v33 = vld [vmem:[%s7418_s1 + $0x288] sm:$0xff]  ;;  %v79_v34 = vld [vmem:[%s7418_s1 + $0x1b0] sm:$0xff]  ;;  %v3552_v36 = vpack.c.bf16 %v207_v26, %v181_v25 }
   0x9   :  { %3545 = vmatpush1.bf16.msra.mxu0 %v3544_v14  ;;  %v80_v32 = vld [vmem:[%s7418_s1 + $0x1b8] sm:$0xff]  ;;  %3571 = vmatprep.subr.bf16.mxu1 %v3570_v27  ;;  %v105_v35 = vld [vmem:[%s7418_s1 + $0x280] sm:$0xff]  ;;  %v259_v38 = vld [vmem:[%s7418_s1 + $0x750] sm:$0xff]  ;;  %v3554_v41 = vpack.c.bf16 %v260_v30, %v234_v29 }
   0xa   :  { %3547 = vmatprep.subr.bf16.mxu0 %v3546_v15  ;;  %v233_v37 = vld [vmem:[%s7418_s1 + $0x680] sm:$0xff]  ;;  %3573 = vmatpush1.bf16.msra.mxu1 %v3572_v31  ;;  %v3574_v39 = vpack.c.bf16 %v106_v33, %v80_v32  ;;  %v3576_v40 = vpack.c.bf16 %v105_v35, %v79_v34  ;;  %v286_v42 = vld [vmem:[%s7418_s1 + $0x828] sm:$0xff]  ;;  %v132_v43 = vld [vmem:[%s7418_s1 + $0x358] sm:$0xff] }
   0xb   :  { %v158_v44 = vld [vmem:[%s7418_s1 + $0x428] sm:$0xff]  ;;  %v312_v45 = vld [vmem:[%s7418_s1 + $0x8f8] sm:$0xff]  ;;  %v131_v47 = vld [vmem:[%s7418_s1 + $0x350] sm:$0xff]  ;;  %v3556_v51 = vpack.c.bf16 %v259_v38, %v233_v37 }
   0xc   :  { %3575 = vmatprep.subr.bf16.mxu1 %v3574_v39  ;;  %v3578_v46 = vpack.c.bf16 %v158_v44, %v132_v43  ;;  %v157_v48 = vld [vmem:[%s7418_s1 + $0x420] sm:$0xff]  ;;  %v184_v49 = vld [vmem:[%s7418_s1 + $0x4f8] sm:$0xff]  ;;  %v210_v50 = vld [vmem:[%s7418_s1 + $0x5c8] sm:$0xff]  ;;  %v3558_v55 = vpack.c.bf16 %v312_v45, %v286_v42 }
   0xd   :  { %3549 = vmatpush1.bf16.msra.mxu0 %v3548_v20  ;;  %v285_v52 = vld [vmem:[%s7418_s1 + $0x820] sm:$0xff]  ;;  %v311_v53 = vld [vmem:[%s7418_s1 + $0x8f0] sm:$0xff]  ;;  %v3580_v54 = vpack.c.bf16 %v157_v48, %v131_v47  ;;  %v338_v56 = vld [vmem:[%s7418_s1 + $0x9c8] sm:$0xff]  ;;  %v3582_v57 = vpack.c.bf16 %v210_v50, %v184_v49 }
   0xe   :  { %3551 = vmatprep.subr.bf16.mxu0 %v3550_v24  ;;  %3577 = vmatpush1.bf16.msra.mxu1 %v3576_v40  ;;  %v183_v58 = vld [vmem:[%s7418_s1 + $0x4f0] sm:$0xff]  ;;  %v209_v59 = vld [vmem:[%s7418_s1 + $0x5c0] sm:$0xff]  ;;  %v364_v60 = vld [vmem:[%s7418_s1 + $0xa98] sm:$0xff]  ;;  %v3560_v63 = vpack.c.bf16 %v311_v53, %v285_v52 }
   0xf   :  { %3579 = vmatprep.subr.bf16.mxu1 %v3578_v46  ;;  %v236_v61 = vld [vmem:[%s7418_s1 + $0x698] sm:$0xff]  ;;  %v262_v62 = vld [vmem:[%s7418_s1 + $0x768] sm:$0xff]  ;;  %v337_v0 = vld [vmem:[%s7418_s1 + $0x9c0] sm:$0xff]  ;;  %v3584_v2 = vpack.c.bf16 %v209_v59, %v183_v58  ;;  %v3562_v4 = vpack.c.bf16 %v364_v60, %v338_v56 }
  0x10   :  { %v363_v1 = vld [vmem:[%s7418_s1 + $0xa90] sm:$0xff]  ;;  %v390_v5 = vld [vmem:[%s7418_s1 + $0xb68] sm:$0xff]  ;;  %v3586_v6 = vpack.c.bf16 %v262_v62, %v236_v61  ;;  %v261_v8 = vld [vmem:[%s7418_s1 + $0x760] sm:$0xff] }
  0x11   :  { %3553 = vmatpush1.bf16.msra.mxu0 %v3552_v36  ;;  %v235_v7 = vld [vmem:[%s7418_s1 + $0x690] sm:$0xff]  ;;  %v416_v9 = vld [vmem:[%s7418_s1 + $0xc38] sm:$0xff]  ;;  %v314_v11 = vld [vmem:[%s7418_s1 + $0x908] sm:$0xff]  ;;  %v3564_v12 = vpack.c.bf16 %v363_v1, %v337_v0 }
  0x12   :  { %3555 = vmatprep.subr.bf16.mxu0 %v3554_v41  ;;  %3581 = vmatpush1.bf16.msra.mxu1 %v3580_v54  ;;  %v288_v10 = vld [vmem:[%s7418_s1 + $0x838] sm:$0xff]  ;;  %v389_v13 = vld [vmem:[%s7418_s1 + $0xb60] sm:$0xff]  ;;  %v415_v14 = vld [vmem:[%s7418_s1 + $0xc30] sm:$0xff]  ;;  %v3588_v15 = vpack.c.bf16 %v261_v8, %v235_v7  ;;  %v3566_v16 = vpack.c.bf16 %v416_v9, %v390_v5 }
  0x13   :  { %3583 = vmatprep.subr.bf16.mxu1 %v3582_v57  ;;  %v3590_v17 = vpack.c.bf16 %v314_v11, %v288_v10  ;;  %v287_v18 = vld [vmem:[%s7418_s1 + $0x830] sm:$0xff]  ;;  %v313_v19 = vld [vmem:[%s7418_s1 + $0x900] sm:$0xff]  ;;  %v340_v20 = vld [vmem:[%s7418_s1 + $0x9d8] sm:$0xff]  ;;  %v3568_v24 = vpack.c.bf16 %v415_v14, %v389_v13 }
  0x14   :  { %v366_v21 = vld [vmem:[%s7418_s1 + $0xaa8] sm:$0xff]  ;;  %v56_v23 = vld [vmem:[%s7418_s1 + $0xf8] sm:$0xff]  ;;  %v3592_v25 = vpack.c.bf16 %v313_v19, %v287_v18  ;;  %v339_v27 = vld [vmem:[%s7418_s1 + $0x9d0] sm:$0xff] }
  0x15   :  { %3557 = vmatpush1.bf16.msra.mxu0 %v3556_v51  ;;  %v30_v22 = vld [vmem:[%s7418_s1 + $0x28] sm:$0xff]  ;;  %v3594_v26 = vpack.c.bf16 %v366_v21, %v340_v20  ;;  %v365_v28 = vld [vmem:[%s7418_s1 + $0xaa0] sm:$0xff]  ;;  %v392_v29 = vld [vmem:[%s7418_s1 + $0xb78] sm:$0xff] }
  0x16   :  { %3559 = vmatprep.subr.bf16.mxu0 %v3558_v55  ;;  %3585 = vmatpush1.bf16.msra.mxu1 %v3584_v2  ;;  %v3602_v30 = vpack.c.bf16 %v56_v23, %v30_v22  ;;  %v418_v31 = vld [vmem:[%s7418_s1 + $0xc48] sm:$0xff]  ;;  %v29_v32 = vld [vmem:[%s7418_s1 + $0x20] sm:$0xff]  ;;  %v55_v33 = vld [vmem:[%s7418_s1 + $0xf0] sm:$0xff]  ;;  %v3596_v37 = vpack.c.bf16 %v365_v28, %v339_v27 }
  0x17   :  { %3587 = vmatprep.subr.bf16.mxu1 %v3586_v6  ;;  %v82_v34 = vld [vmem:[%s7418_s1 + $0x1c8] sm:$0xff]  ;;  %v108_v35 = vld [vmem:[%s7418_s1 + $0x298] sm:$0xff]  ;;  %v4635_v36 = vld [vmem:[%s7419_s0] sm:$0xff]  ;;  %v3598_v38 = vpack.c.bf16 %v418_v31, %v392_v29  ;;  %v3604_v41 = vpack.c.bf16 %v55_v33, %v29_v32 }
  0x18   :  { %v391_v39 = vld [vmem:[%s7418_s1 + $0xb70] sm:$0xff]  ;;  %v417_v40 = vld [vmem:[%s7418_s1 + $0xc40] sm:$0xff]  ;;  %v32_v42 = vld [vmem:[%s7418_s1 + $0x38] sm:$0xff]  ;;  %v3606_v43 = vpack.c.bf16 %v108_v35, %v82_v34 }
  0x19   :  { %3561 = vmatpush1.bf16.msra.mxu0 %v3560_v63  ;;  %v58_v44 = vld [vmem:[%s7418_s1 + $0x108] sm:$0xff]  ;;  %v81_v45 = vld [vmem:[%s7418_s1 + $0x1c0] sm:$0xff]  ;;  %v107_v46 = vld [vmem:[%s7418_s1 + $0x290] sm:$0xff]  ;;  %v3600_v50 = vpack.c.bf16 %v417_v40, %v391_v39 }
  0x1a   :  { %3563 = vmatprep.subr.bf16.mxu0 %v3562_v4  ;;  %3589 = vmatpush1.bf16.msra.mxu1 %v3588_v15  ;;  %v134_v47 = vld [vmem:[%s7418_s1 + $0x368] sm:$0xff]  ;;  %v160_v48 = vld [vmem:[%s7418_s1 + $0x438] sm:$0xff]  ;;  %v3634_v51 = vpack.c.bf16 %v58_v44, %v32_v42  ;;  %v3608_v52 = vpack.c.bf16 %v107_v46, %v81_v45  ;;  %v31_v53 = vld [vmem:[%s7418_s1 + $0x30] sm:$0xff] }
  0x1b   :  { %3591 = vmatprep.subr.bf16.mxu1 %v3590_v17  ;;  %v4666_v49 = vld [vmem:[%s7419_s0 + $0x8] sm:$0xff]  ;;  %v57_v54 = vld [vmem:[%s7418_s1 + $0x100] sm:$0xff]  ;;  %v84_v55 = vld [vmem:[%s7418_s1 + $0x1d8] sm:$0xff]  ;;  %v3610_v56 = vpack.c.bf16 %v160_v48, %v134_v47 }
  0x1c   :  { %v110_v57 = vld [vmem:[%s7418_s1 + $0x2a8] sm:$0xff]  ;;  %v133_v58 = vld [vmem:[%s7418_s1 + $0x360] sm:$0xff]  ;;  %v159_v59 = vld [vmem:[%s7418_s1 + $0x430] sm:$0xff]  ;;  %v3636_v62 = vpack.c.bf16 %v57_v54, %v31_v53 }
  0x1d   :  { %3565 = vmatpush1.bf16.msra.mxu0 %v3564_v12  ;;  %v186_v60 = vld [vmem:[%s7418_s1 + $0x508] sm:$0xff]  ;;  %v212_v61 = vld [vmem:[%s7418_s1 + $0x5d8] sm:$0xff]  ;;  %v3638_v63 = vpack.c.bf16 %v110_v57, %v84_v55  ;;  %v3612_v0 = vpack.c.bf16 %v159_v59, %v133_v58  ;;  %v83_v1 = vld [vmem:[%s7418_s1 + $0x1d0] sm:$0xff] }
  0x1e   :  { %3567 = vmatprep.subr.bf16.mxu0 %v3566_v16  ;;  %3593 = vmatpush1.bf16.msra.mxu1 %v3592_v25  ;;  %v109_v2 = vld [vmem:[%s7418_s1 + $0x2a0] sm:$0xff]  ;;  %v136_v4 = vld [vmem:[%s7418_s1 + $0x378] sm:$0xff]  ;;  %v3614_v5 = vpack.c.bf16 %v212_v61, %v186_v60  ;;  %v162_v6 = vld [vmem:[%s7418_s1 + $0x448] sm:$0xff] }
  0x1f   :  { %3595 = vmatprep.subr.bf16.mxu1 %v3594_v26  ;;  %v185_v7 = vld [vmem:[%s7418_s1 + $0x500] sm:$0xff]  ;;  %v211_v8 = vld [vmem:[%s7418_s1 + $0x5d0] sm:$0xff]  ;;  %v238_v9 = vld [vmem:[%s7418_s1 + $0x6a8] sm:$0xff]  ;;  %v3640_v11 = vpack.c.bf16 %v109_v2, %v83_v1  ;;  %v3642_v12 = vpack.c.bf16 %v162_v6, %v136_v4 }
  0x20   :  { %v264_v10 = vld [vmem:[%s7418_s1 + $0x778] sm:$0xff]  ;;  %v3616_v13 = vpack.c.bf16 %v211_v8, %v185_v7  ;;  %v135_v14 = vld [vmem:[%s7418_s1 + $0x370] sm:$0xff]  ;;  %v161_v15 = vld [vmem:[%s7418_s1 + $0x440] sm:$0xff] }
  0x21   :  { %3569 = vmatpush1.bf16.msra.mxu0 %v3568_v24  ;;  %v188_v16 = vld [vmem:[%s7418_s1 + $0x518] sm:$0xff]  ;;  %v3618_v17 = vpack.c.bf16 %v264_v10, %v238_v9  ;;  %v214_v18 = vld [vmem:[%s7418_s1 + $0x5e8] sm:$0xff]  ;;  %v237_v19 = vld [vmem:[%s7418_s1 + $0x6a0] sm:$0xff]  ;;  %v3644_v23 = vpack.c.bf16 %v161_v15, %v135_v14 }
  0x22   :  { %3603 = vmatprep.subr.bf16.mxu0 %v3602_v30  ;;  %3597 = vmatpush1.bf16.msra.mxu1 %v3596_v37  ;;  %v263_v20 = vld [vmem:[%s7418_s1 + $0x770] sm:$0xff]  ;;  %v290_v21 = vld [vmem:[%s7418_s1 + $0x848] sm:$0xff]  ;;  %v316_v22 = vld [vmem:[%s7418_s1 + $0x918] sm:$0xff]  ;;  %v3646_v24 = vpack.c.bf16 %v214_v18, %v188_v16 }
  0x23   :  { %3599 = vmatprep.subr.bf16.mxu1 %v3598_v38  ;;  %v3620_v25 = vpack.c.bf16 %v263_v20, %v237_v19  ;;  %v187_v26 = vld [vmem:[%s7418_s1 + $0x510] sm:$0xff]  ;;  %v213_v27 = vld [vmem:[%s7418_s1 + $0x5e0] sm:$0xff]  ;;  %v240_v28 = vld [vmem:[%s7418_s1 + $0x6b8] sm:$0xff]  ;;  %v3622_v29 = vpack.c.bf16 %v316_v22, %v290_v21 }
  0x24   :  { %506 = vmatmul.mubr.f32.vlgmr.msra.gmra.mrb[0].mxu0 %v4635_v36  ;;  %v266_v30 = vld [vmem:[%s7418_s1 + $0x788] sm:$0xff]  ;;  %v289_v31 = vld [vmem:[%s7418_s1 + $0x840] sm:$0xff]  ;;  %v315_v32 = vld [vmem:[%s7418_s1 + $0x910] sm:$0xff]  ;;  %v3648_v35 = vpack.c.bf16 %v213_v27, %v187_v26 }
  0x25   :  { %511 = vmatprep.mubr.f32.mxu0 %v4390_v3  ;;  %3605 = vmatpush1.bf16.msra.mxu0 %v3604_v41  ;;  %v342_v33 = vld [vmem:[%s7418_s1 + $0x9e8] sm:$0xff]  ;;  %v368_v34 = vld [vmem:[%s7418_s1 + $0xab8] sm:$0xff]  ;;  %v3650_v37 = vpack.c.bf16 %v266_v30, %v240_v28  ;;  %v3624_v38 = vpack.c.bf16 %v315_v32, %v289_v31  ;;  %v239_v39 = vld [vmem:[%s7418_s1 + $0x6b0] sm:$0xff] }
  0x26   :  { %3607 = vmatprep.subr.bf16.mxu0 %v3606_v43  ;;  %3601 = vmatpush1.bf16.msra.mxu1 %v3600_v50  ;;  %v265_v40 = vld [vmem:[%s7418_s1 + $0x780] sm:$0xff]  ;;  %v292_v41 = vld [vmem:[%s7418_s1 + $0x858] sm:$0xff]  ;;  %v3626_v42 = vpack.c.bf16 %v368_v34, %v342_v33  ;;  %v318_v43 = vld [vmem:[%s7418_s1 + $0x928] sm:$0xff] }
  0x27   :  { %3635 = vmatprep.subr.bf16.mxu1 %v3634_v51  ;;  %v341_v44 = vld [vmem:[%s7418_s1 + $0x9e0] sm:$0xff]  ;;  %v367_v45 = vld [vmem:[%s7418_s1 + $0xab0] sm:$0xff]  ;;  %v394_v46 = vld [vmem:[%s7418_s1 + $0xb88] sm:$0xff]  ;;  %v3652_v48 = vpack.c.bf16 %v265_v40, %v239_v39  ;;  %v3654_v50 = vpack.c.bf16 %v318_v43, %v292_v41 }
  0x28   :  { %512 = vmatmul.mubr.f32.gmra.mrb[2].mxu0 %v4666_v49  ;;  %v420_v47 = vld [vmem:[%s7418_s1 + $0xc58] sm:$0xff]  ;;  %v3628_v51 = vpack.c.bf16 %v367_v45, %v341_v44  ;;  %v317_v53 = vld [vmem:[%s7418_s1 + $0x920] sm:$0xff]  ;;  %v419_v58 = vld [vmem:[%s7418_s1 + $0xc50] sm:$0xff] }
  0x29   :  { %659 = vmatprep.mubr.f32.mxu0 %v4390_v3  ;;  %3609 = vmatpush1.bf16.msra.mxu0 %v3608_v52  ;;  %v291_v52 = vld [vmem:[%s7418_s1 + $0x850] sm:$0xff]  ;;  %v344_v54 = vld [vmem:[%s7418_s1 + $0x9f8] sm:$0xff]  ;;  %v3630_v55 = vpack.c.bf16 %v420_v47, %v394_v46  ;;  %v393_v57 = vld [vmem:[%s7418_s1 + $0xb80] sm:$0xff] }
  0x2a   :  { %3611 = vmatprep.subr.bf16.mxu0 %v3610_v56  ;;  %583 = vmatmul.mubr.f32.vlgmr.msra.gmra.mrb[0].mxu1 %v4635_v36  ;;  %v370_v56 = vld [vmem:[%s7418_s1 + $0xac8] sm:$0xff]  ;;  %v60_v60 = vld [vmem:[%s7418_s1 + $0x118] sm:$0xff]  ;;  %v3656_v61 = vpack.c.bf16 %v317_v53, %v291_v52  ;;  %v369_v1 = vld [vmem:[%s7418_s1 + $0xac0] sm:$0xff] }
  0x2b   :  { %3637 = vmatpush1.bf16.msra.mxu1 %v3636_v62  ;;  %588 = vmatprep.mubr.f32.mxu1 %v4390_v3  ;;  %v34_v59 = vld [vmem:[%s7418_s1 + $0x48] sm:$0xff]  ;;  %v3658_v62 = vpack.c.bf16 %v370_v56, %v344_v54  ;;  %v396_v2 = vld [vmem:[%s7418_s1 + $0xb98] sm:$0xff]  ;;  %v33_v6 = vld [vmem:[%s7418_s1 + $0x40] sm:$0xff] }
  0x2c   :  { %3639 = vmatprep.subr.bf16.mxu1 %v3638_v63  ;;  %v3632_v63 = vpack.c.bf16 %v419_v58, %v393_v57  ;;  %v422_v4 = vld [vmem:[%s7418_s1 + $0xc68] sm:$0xff]  ;;  %v59_v7 = vld [vmem:[%s7418_s1 + $0x110] sm:$0xff]  ;;  %v112_v9 = vld [vmem:[%s7418_s1 + $0x2b8] sm:$0xff] }
  0x2d   :  { %3613 = vmatpush1.bf16.msra.mxu0 %v3612_v0  ;;  %v343_v0 = vld [vmem:[%s7418_s1 + $0x9f0] sm:$0xff]  ;;  %v86_v8 = vld [vmem:[%s7418_s1 + $0x1e8] sm:$0xff]  ;;  %v3668_v14 = vpack.c.bf16 %v59_v7, %v33_v6  ;;  %v85_v16 = vld [vmem:[%s7418_s1 + $0x1e0] sm:$0xff] }
  0x2e   :  { %3615 = vmatprep.subr.bf16.mxu0 %v3614_v5  ;;  %589 = vmatmul.mubr.f32.gmra.mrb[2].mxu1 %v4666_v49  ;;  %v3666_v5 = vpack.c.bf16 %v60_v60, %v34_v59  ;;  %v3660_v10 = vpack.c.bf16 %v369_v1, %v343_v0  ;;  %v3670_v15 = vpack.c.bf16 %v112_v9, %v86_v8  ;;  %v138_v18 = vld [vmem:[%s7418_s1 + $0x388] sm:$0xff]  ;;  %v164_v19 = vld [vmem:[%s7418_s1 + $0x458] sm:$0xff]  ;;  %v61_v26 = vld [vmem:[%s7418_s1 + $0x120] sm:$0xff] }
  0x2f   :  { %3641 = vmatpush1.bf16.msra.mxu1 %v3640_v11  ;;  %736 = vmatprep.mubr.f32.mxu1 %v4390_v3  ;;  %v3662_v11 = vpack.c.bf16 %v422_v4, %v396_v2  ;;  %v36_v20 = vld [vmem:[%s7418_s1 + $0x58] sm:$0xff]  ;;  %v62_v21 = vld [vmem:[%s7418_s1 + $0x128] sm:$0xff]  ;;  %v3674_v27 = vpack.c.bf16 %v164_v19, %v138_v18  ;;  %v163_v28 = vld [vmem:[%s7418_s1 + $0x450] sm:$0xff] }
  0x30   :  { %3643 = vmatprep.subr.bf16.mxu1 %v3642_v12  ;;  %v395_v12 = vld [vmem:[%s7418_s1 + $0xb90] sm:$0xff]  ;;  %v88_v30 = vld [vmem:[%s7418_s1 + $0x1f8] sm:$0xff]  ;;  %v114_v31 = vld [vmem:[%s7418_s1 + $0x2c8] sm:$0xff] }
  0x31   :  { %3617 = vmatpush1.bf16.msra.mxu0 %v3616_v13  ;;  %v421_v13 = vld [vmem:[%s7418_s1 + $0xc60] sm:$0xff]  ;;  %v190_v32 = vld [vmem:[%s7418_s1 + $0x528] sm:$0xff]  ;;  %v216_v33 = vld [vmem:[%s7418_s1 + $0x5f8] sm:$0xff] }
  0x32   :  { %3619 = vmatprep.subr.bf16.mxu0 %v3618_v17  ;;  %v111_v17 = vld [vmem:[%s7418_s1 + $0x2b0] sm:$0xff]  ;;  %v3664_v22 = vpack.c.bf16 %v421_v13, %v395_v12  ;;  %v113_v40 = vld [vmem:[%s7418_s1 + $0x2c0] sm:$0xff]  ;;  %v3678_v41 = vpack.c.bf16 %v216_v33, %v190_v32  ;;  %v140_v43 = vld [vmem:[%s7418_s1 + $0x398] sm:$0xff] }
  0x33   :  { %3645 = vmatpush1.bf16.msra.mxu1 %v3644_v23  ;;  %v3672_v23 = vpack.c.bf16 %v111_v17, %v85_v16  ;;  %v87_v39 = vld [vmem:[%s7418_s1 + $0x1f0] sm:$0xff]  ;;  %v166_v44 = vld [vmem:[%s7418_s1 + $0x468] sm:$0xff]  ;;  %v268_v46 = vld [vmem:[%s7418_s1 + $0x798] sm:$0xff] }
  0x34   :  { %3647 = vmatprep.subr.bf16.mxu1 %v3646_v24  ;;  %v137_v24 = vld [vmem:[%s7418_s1 + $0x380] sm:$0xff]  ;;  %v242_v45 = vld [vmem:[%s7418_s1 + $0x6c8] sm:$0xff]  ;;  %v3704_v47 = vpack.c.bf16 %v113_v40, %v87_v39  ;;  %v139_v52 = vld [vmem:[%s7418_s1 + $0x390] sm:$0xff] }
  0x35   :  { %3621 = vmatpush1.bf16.msra.mxu0 %v3620_v25  ;;  %v35_v25 = vld [vmem:[%s7418_s1 + $0x50] sm:$0xff]  ;;  %v165_v53 = vld [vmem:[%s7418_s1 + $0x460] sm:$0xff]  ;;  %v3682_v54 = vpack.c.bf16 %v268_v46, %v242_v45  ;;  %v192_v56 = vld [vmem:[%s7418_s1 + $0x538] sm:$0xff] }
  0x36   :  { %3623 = vmatprep.subr.bf16.mxu0 %v3622_v29  ;;  %v3698_v29 = vpack.c.bf16 %v62_v21, %v36_v20  ;;  %v3700_v34 = vpack.c.bf16 %v61_v26, %v35_v25  ;;  %v218_v57 = vld [vmem:[%s7418_s1 + $0x608] sm:$0xff]  ;;  %v320_v59 = vld [vmem:[%s7418_s1 + $0x938] sm:$0xff]  ;;  %v3708_v60 = vpack.c.bf16 %v165_v53, %v139_v52  ;;  %v191_v0 = vld [vmem:[%s7418_s1 + $0x530] sm:$0xff] }
  0x37   :  { %3649 = vmatpush1.bf16.msra.mxu1 %v3648_v35  ;;  %v3676_v35 = vpack.c.bf16 %v163_v28, %v137_v24  ;;  %v294_v58 = vld [vmem:[%s7418_s1 + $0x868] sm:$0xff]  ;;  %v217_v1 = vld [vmem:[%s7418_s1 + $0x600] sm:$0xff]  ;;  %v319_v4 = vld [vmem:[%s7418_s1 + $0x930] sm:$0xff] }
  0x38   :  { %3651 = vmatprep.subr.bf16.mxu1 %v3650_v37  ;;  %v189_v37 = vld [vmem:[%s7418_s1 + $0x520] sm:$0xff]  ;;  %v3686_v2 = vpack.c.bf16 %v320_v59, %v294_v58  ;;  %v270_v6 = vld [vmem:[%s7418_s1 + $0x7a8] sm:$0xff]  ;;  %v372_v8 = vld [vmem:[%s7418_s1 + $0xad8] sm:$0xff]  ;;  %v3712_v9 = vpack.c.bf16 %v217_v1, %v191_v0 }
  0x39   :  { %3625 = vmatpush1.bf16.msra.mxu0 %v3624_v38  ;;  %v3702_v38 = vpack.c.bf16 %v114_v31, %v88_v30  ;;  %v346_v7 = vld [vmem:[%s7418_s1 + $0xa08] sm:$0xff]  ;;  %v243_v13 = vld [vmem:[%s7418_s1 + $0x6d0] sm:$0xff]  ;;  %v296_v17 = vld [vmem:[%s7418_s1 + $0x878] sm:$0xff] }
  0x3a   :  { %3627 = vmatprep.subr.bf16.mxu0 %v3626_v42  ;;  %v215_v42 = vld [vmem:[%s7418_s1 + $0x5f0] sm:$0xff]  ;;  %v322_v18 = vld [vmem:[%s7418_s1 + $0x948] sm:$0xff]  ;;  %v424_v20 = vld [vmem:[%s7418_s1 + $0xc78] sm:$0xff] }
  0x3b   :  { %3653 = vmatpush1.bf16.msra.mxu1 %v3652_v48  ;;  %v3680_v48 = vpack.c.bf16 %v215_v42, %v189_v37  ;;  %v371_v16 = vld [vmem:[%s7418_s1 + $0xad0] sm:$0xff]  ;;  %v398_v19 = vld [vmem:[%s7418_s1 + $0xba8] sm:$0xff]  ;;  %v3718_v24 = vpack.c.bf16 %v322_v18, %v296_v17  ;;  %v321_v26 = vld [vmem:[%s7418_s1 + $0x940] sm:$0xff] }
  0x3c   :  { %3655 = vmatprep.subr.bf16.mxu1 %v3654_v50  ;;  %v241_v50 = vld [vmem:[%s7418_s1 + $0x6c0] sm:$0xff]  ;;  %v295_v25 = vld [vmem:[%s7418_s1 + $0x870] sm:$0xff]  ;;  %v374_v30 = vld [vmem:[%s7418_s1 + $0xae8] sm:$0xff] }
  0x3d   :  { %3629 = vmatpush1.bf16.msra.mxu0 %v3628_v51  ;;  %v3706_v51 = vpack.c.bf16 %v166_v44, %v140_v43  ;;  %v423_v28 = vld [vmem:[%s7418_s1 + $0xc70] sm:$0xff]  ;;  %v38_v31 = vld [vmem:[%s7418_s1 + $0x68] sm:$0xff]  ;;  %v64_v32 = vld [vmem:[%s7418_s1 + $0x138] sm:$0xff]  ;;  %v3720_v33 = vpack.c.bf16 %v321_v26, %v295_v25 }
  0x3e   :  { %3631 = vmatprep.subr.bf16.mxu0 %v3630_v55  ;;  %v267_v55 = vld [vmem:[%s7418_s1 + $0x790] sm:$0xff]  ;;  %v3730_v39 = vpack.c.bf16 %v64_v32, %v38_v31  ;;  %v37_v40 = vld [vmem:[%s7418_s1 + $0x60] sm:$0xff]  ;;  %v90_v42 = vld [vmem:[%s7418_s1 + $0x208] sm:$0xff] }
  0x3f   :  { %3657 = vmatpush1.bf16.msra.mxu1 %v3656_v61  ;;  %v3684_v61 = vpack.c.bf16 %v267_v55, %v241_v50  ;;  %v347_v37 = vld [vmem:[%s7418_s1 + $0xa10] sm:$0xff]  ;;  %v116_v43 = vld [vmem:[%s7418_s1 + $0x2d8] sm:$0xff]  ;;  %v426_v45 = vld [vmem:[%s7418_s1 + $0xc88] sm:$0xff] }
  0x40   :  { %3659 = vmatprep.subr.bf16.mxu1 %v3658_v62  ;;  %v293_v62 = vld [vmem:[%s7418_s1 + $0x860] sm:$0xff]  ;;  %v400_v44 = vld [vmem:[%s7418_s1 + $0xbb8] sm:$0xff]  ;;  %v115_v53 = vld [vmem:[%s7418_s1 + $0x2d0] sm:$0xff] }
  0x41   :  { %3633 = vmatpush1.bf16.msra.mxu0 %v3632_v63  ;;  %v3710_v63 = vpack.c.bf16 %v218_v57, %v192_v56  ;;  %v425_v50 = vld [vmem:[%s7418_s1 + $0xc80] sm:$0xff]  ;;  %v3726_v55 = vpack.c.bf16 %v426_v45, %v400_v44  ;;  %v168_v56 = vld [vmem:[%s7418_s1 + $0x478] sm:$0xff]  ;;  %v66_v58 = vld [vmem:[%s7418_s1 + $0x148] sm:$0xff] }
  0x42   :  { %3667 = vmatprep.subr.bf16.mxu0 %v3666_v5  ;;  %v244_v5 = vld [vmem:[%s7418_s1 + $0x6d8] sm:$0xff]  ;;  %v89_v52 = vld [vmem:[%s7418_s1 + $0x200] sm:$0xff]  ;;  %v167_v1 = vld [vmem:[%s7418_s1 + $0x470] sm:$0xff] }
  0x43   :  { %3661 = vmatpush1.bf16.msra.mxu1 %v3660_v10  ;;  %v3688_v10 = vpack.c.bf16 %v319_v4, %v293_v62  ;;  %v3714_v12 = vpack.c.bf16 %v270_v6, %v244_v5  ;;  %v40_v57 = vld [vmem:[%s7418_s1 + $0x78] sm:$0xff]  ;;  %v39_v62 = vld [vmem:[%s7418_s1 + $0x70] sm:$0xff]  ;;  %v118_v5 = vld [vmem:[%s7418_s1 + $0x2e8] sm:$0xff] }
  0x44   :  { %660 = vmatmul.mubr.f32.vlgmr.msra.gmra.mrb[4].mxu0 %v4635_v36  ;;  %3663 = vmatprep.subr.bf16.mxu1 %v3662_v11  ;;  %v345_v11 = vld [vmem:[%s7418_s1 + $0xa00] sm:$0xff]  ;;  %v92_v4 = vld [vmem:[%s7418_s1 + $0x218] sm:$0xff]  ;;  %v194_v6 = vld [vmem:[%s7418_s1 + $0x548] sm:$0xff] }
  0x45   :  { %3669 = vmatpush1.bf16.msra.mxu0 %v3668_v14  ;;  %665 = vmatprep.mubr.f32.mxu0 %v4390_v3  ;;  %v269_v14 = vld [vmem:[%s7418_s1 + $0x7a0] sm:$0xff]  ;;  %v170_v17 = vld [vmem:[%s7418_s1 + $0x488] sm:$0xff]  ;;  %v324_v31 = vld [vmem:[%s7418_s1 + $0x958] sm:$0xff] }
  0x46   :  { %3671 = vmatprep.subr.bf16.mxu0 %v3670_v15  ;;  %v3690_v15 = vpack.c.bf16 %v372_v8, %v346_v7  ;;  %v3716_v21 = vpack.c.bf16 %v269_v14, %v243_v13  ;;  %v220_v7 = vld [vmem:[%s7418_s1 + $0x618] sm:$0xff]  ;;  %v117_v13 = vld [vmem:[%s7418_s1 + $0x2e0] sm:$0xff]  ;;  %v246_v18 = vld [vmem:[%s7418_s1 + $0x6e8] sm:$0xff] }
  0x47   :  { %3665 = vmatpush1.bf16.msra.mxu1 %v3664_v22  ;;  %v3692_v22 = vpack.c.bf16 %v371_v16, %v345_v11  ;;  %v3766_v11 = vpack.c.bf16 %v118_v5, %v92_v4  ;;  %v3742_v14 = vpack.c.bf16 %v220_v7, %v194_v6  ;;  %v144_v16 = vld [vmem:[%s7418_s1 + $0x3b8] sm:$0xff]  ;;  %v169_v25 = vld [vmem:[%s7418_s1 + $0x480] sm:$0xff]  ;;  %v378_v4 = vld [vmem:[%s7418_s1 + $0xb08] sm:$0xff] }
  0x48   :  { %666 = vmatmul.mubr.f32.gmra.mrb[6].mxu0 %v4666_v49  ;;  %3699 = vmatprep.subr.bf16.mxu1 %v3698_v29  ;;  %v348_v29 = vld [vmem:[%s7418_s1 + $0xa18] sm:$0xff]  ;;  %v42_v5 = vld [vmem:[%s7418_s1 + $0x88] sm:$0xff] }
  0x49   :  { %3673 = vmatpush1.bf16.msra.mxu0 %v3672_v23  ;;  %813 = vmatprep.mubr.f32.mxu0 %v4390_v3  ;;  %v397_v23 = vld [vmem:[%s7418_s1 + $0xba0] sm:$0xff]  ;;  %v376_v44 = vld [vmem:[%s7418_s1 + $0xaf8] sm:$0xff] }
  0x4a   :  { %3675 = vmatprep.subr.bf16.mxu0 %v3674_v27  ;;  %737 = vmatmul.mubr.f32.vlgmr.msra.gmra.mrb[4].mxu1 %v4635_v36  ;;  %v3694_v27 = vpack.c.bf16 %v424_v20, %v398_v19  ;;  %v272_v19 = vld [vmem:[%s7418_s1 + $0x7b8] sm:$0xff] }
  0x4b   :  { %742 = vmatprep.mubr.f32.mxu1 %v4390_v3  ;;  %3701 = vmatpush1.bf16.msra.mxu1 %v3700_v34  ;;  %v3696_v34 = vpack.c.bf16 %v423_v28, %v397_v23  ;;  %v3770_v23 = vpack.c.bf16 %v170_v17, %v144_v16  ;;  %v3746_v26 = vpack.c.bf16 %v272_v19, %v246_v18  ;;  %v196_v28 = vld [vmem:[%s7418_s1 + $0x558] sm:$0xff]  ;;  %v430_v18 = vld [vmem:[%s7418_s1 + $0xca8] sm:$0xff] }
  0x4c   :  { %3703 = vmatprep.subr.bf16.mxu1 %v3702_v38  ;;  %v373_v38 = vld [vmem:[%s7418_s1 + $0xae0] sm:$0xff]  ;;  %v68_v6 = vld [vmem:[%s7418_s1 + $0x158] sm:$0xff] }
  0x4d   :  { %3677 = vmatpush1.bf16.msra.mxu0 %v3676_v35  ;;  %v3722_v35 = vpack.c.bf16 %v374_v30, %v348_v29  ;;  %v3724_v46 = vpack.c.bf16 %v373_v38, %v347_v37  ;;  %v222_v29 = vld [vmem:[%s7418_s1 + $0x628] sm:$0xff]  ;;  %v195_v37 = vld [vmem:[%s7418_s1 + $0x550] sm:$0xff]  ;;  %v221_v38 = vld [vmem:[%s7418_s1 + $0x620] sm:$0xff] }
  0x4e   :  { %3679 = vmatprep.subr.bf16.mxu0 %v3678_v41  ;;  %743 = vmatmul.mubr.f32.gmra.mrb[6].mxu1 %v4666_v49  ;;  %v63_v41 = vld [vmem:[%s7418_s1 + $0x130] sm:$0xff]  ;;  %v298_v30 = vld [vmem:[%s7418_s1 + $0x888] sm:$0xff]  ;;  %v3776_v45 = vpack.c.bf16 %v221_v38, %v195_v37  ;;  %v120_v16 = vld [vmem:[%s7418_s1 + $0x2f8] sm:$0xff] }
  0x4f   :  { %3705 = vmatpush1.bf16.msra.mxu1 %v3704_v47  ;;  %890 = vmatprep.mubr.f32.mxu1 %v4390_v3  ;;  %v3732_v47 = vpack.c.bf16 %v63_v41, %v37_v40  ;;  %v323_v40 = vld [vmem:[%s7418_s1 + $0x950] sm:$0xff]  ;;  %v248_v41 = vld [vmem:[%s7418_s1 + $0x6f8] sm:$0xff] }
  0x50   :  { %3707 = vmatprep.subr.bf16.mxu1 %v3706_v51  ;;  %v3734_v51 = vpack.c.bf16 %v116_v43, %v90_v42  ;;  %v274_v42 = vld [vmem:[%s7418_s1 + $0x7c8] sm:$0xff]  ;;  %v404_v17 = vld [vmem:[%s7418_s1 + $0xbd8] sm:$0xff]  ;;  %v171_v38 = vld [vmem:[%s7418_s1 + $0x490] sm:$0xff] }
  0x51   :  { %3681 = vmatpush1.bf16.msra.mxu0 %v3680_v48  ;;  %v399_v48 = vld [vmem:[%s7418_s1 + $0xbb0] sm:$0xff]  ;;  %v350_v43 = vld [vmem:[%s7418_s1 + $0xa28] sm:$0xff] }
  0x52   :  { %3683 = vmatprep.subr.bf16.mxu0 %v3682_v54  ;;  %v142_v54 = vld [vmem:[%s7418_s1 + $0x3a8] sm:$0xff]  ;;  %v3728_v59 = vpack.c.bf16 %v425_v50, %v399_v48  ;;  %v3778_v48 = vpack.c.bf16 %v274_v42, %v248_v41  ;;  %v247_v50 = vld [vmem:[%s7418_s1 + $0x6f0] sm:$0xff] }
  0x53   :  { %3709 = vmatpush1.bf16.msra.mxu1 %v3708_v60  ;;  %v3736_v60 = vpack.c.bf16 %v115_v53, %v89_v52  ;;  %v3738_v0 = vpack.c.bf16 %v168_v56, %v142_v54  ;;  %v3754_v52 = vpack.c.bf16 %v376_v44, %v350_v43  ;;  %v375_v53 = vld [vmem:[%s7418_s1 + $0xaf0] sm:$0xff]  ;;  %v300_v54 = vld [vmem:[%s7418_s1 + $0x898] sm:$0xff]  ;;  %v402_v56 = vld [vmem:[%s7418_s1 + $0xbc8] sm:$0xff] }
  0x54   :  { %3711 = vmatprep.subr.bf16.mxu1 %v3710_v63  ;;  %v65_v63 = vld [vmem:[%s7418_s1 + $0x140] sm:$0xff]  ;;  %v122_v41 = vld [vmem:[%s7418_s1 + $0x308] sm:$0xff]  ;;  %v224_v43 = vld [vmem:[%s7418_s1 + $0x638] sm:$0xff] }
  0x55   :  { %3685 = vmatpush1.bf16.msra.mxu0 %v3684_v61  ;;  %v141_v61 = vld [vmem:[%s7418_s1 + $0x3a0] sm:$0xff]  ;;  %v3764_v8 = vpack.c.bf16 %v65_v63, %v39_v62  ;;  %v299_v62 = vld [vmem:[%s7418_s1 + $0x890] sm:$0xff]  ;;  %v198_v42 = vld [vmem:[%s7418_s1 + $0x568] sm:$0xff] }
  0x56   :  { %3687 = vmatprep.subr.bf16.mxu0 %v3686_v2  ;;  %v3762_v2 = vpack.c.bf16 %v66_v58, %v40_v57  ;;  %v428_v57 = vld [vmem:[%s7418_s1 + $0xc98] sm:$0xff]  ;;  %v325_v63 = vld [vmem:[%s7418_s1 + $0x960] sm:$0xff] }
  0x57   :  { %3713 = vmatpush1.bf16.msra.mxu1 %v3712_v9  ;;  %v3740_v9 = vpack.c.bf16 %v167_v1, %v141_v61  ;;  %v427_v1 = vld [vmem:[%s7418_s1 + $0xc90] sm:$0xff]  ;;  %v3784_v7 = vpack.c.bf16 %v325_v63, %v299_v62 }
  0x58   :  { %3715 = vmatprep.subr.bf16.mxu1 %v3714_v12  ;;  %v91_v12 = vld [vmem:[%s7418_s1 + $0x210] sm:$0xff] }
  0x59   :  { %3689 = vmatpush1.bf16.msra.mxu0 %v3688_v10  ;;  %v193_v10 = vld [vmem:[%s7418_s1 + $0x540] sm:$0xff]  ;;  %v3768_v20 = vpack.c.bf16 %v117_v13, %v91_v12  ;;  %v3794_v12 = vpack.c.bf16 %v68_v6, %v42_v5  ;;  %v275_v63 = vld [vmem:[%s7418_s1 + $0x7d0] sm:$0xff] }
  0x5a   :  { %3691 = vmatprep.subr.bf16.mxu0 %v3690_v15  ;;  %v219_v15 = vld [vmem:[%s7418_s1 + $0x610] sm:$0xff]  ;;  %v41_v13 = vld [vmem:[%s7418_s1 + $0x80] sm:$0xff] }
  0x5b   :  { %3717 = vmatpush1.bf16.msra.mxu1 %v3716_v21  ;;  %v3744_v21 = vpack.c.bf16 %v219_v15, %v193_v10  ;;  %v351_v10 = vld [vmem:[%s7418_s1 + $0xa30] sm:$0xff]  ;;  %v94_v15 = vld [vmem:[%s7418_s1 + $0x228] sm:$0xff] }
  0x5c   :  { %3719 = vmatprep.subr.bf16.mxu1 %v3718_v24  ;;  %v143_v24 = vld [vmem:[%s7418_s1 + $0x3b0] sm:$0xff] }
  0x5d   :  { %3693 = vmatpush1.bf16.msra.mxu0 %v3692_v22  ;;  %v245_v22 = vld [vmem:[%s7418_s1 + $0x6e0] sm:$0xff]  ;;  %v3772_v32 = vpack.c.bf16 %v169_v25, %v143_v24  ;;  %v119_v25 = vld [vmem:[%s7418_s1 + $0x2f0] sm:$0xff] }
  0x5e   :  { %3695 = vmatprep.subr.bf16.mxu0 %v3694_v27  ;;  %v271_v27 = vld [vmem:[%s7418_s1 + $0x7b0] sm:$0xff]  ;;  %v93_v24 = vld [vmem:[%s7418_s1 + $0x220] sm:$0xff] }
  0x5f   :  { %3721 = vmatpush1.bf16.msra.mxu1 %v3720_v33  ;;  %v3748_v33 = vpack.c.bf16 %v271_v27, %v245_v22  ;;  %v429_v22 = vld [vmem:[%s7418_s1 + $0xca0] sm:$0xff]  ;;  %v3790_v27 = vpack.c.bf16 %v430_v18, %v404_v17 }
  0x60   :  { %3723 = vmatprep.subr.bf16.mxu1 %v3722_v35  ;;  %v3774_v35 = vpack.c.bf16 %v222_v29, %v196_v28  ;;  %v172_v28 = vld [vmem:[%s7418_s1 + $0x498] sm:$0xff]  ;;  %v353_v18 = vld [vmem:[%s7418_s1 + $0xa40] sm:$0xff] }
  0x61   :  { %3697 = vmatpush1.bf16.msra.mxu0 %v3696_v34  ;;  %v297_v34 = vld [vmem:[%s7418_s1 + $0x880] sm:$0xff]  ;;  %v44_v29 = vld [vmem:[%s7418_s1 + $0x98] sm:$0xff] }
  0x62   :  { %3731 = vmatprep.subr.bf16.mxu0 %v3730_v39  ;;  %v3750_v39 = vpack.c.bf16 %v324_v31, %v298_v30  ;;  %v70_v30 = vld [vmem:[%s7418_s1 + $0x168] sm:$0xff] }
  0x63   :  { %3725 = vmatpush1.bf16.msra.mxu1 %v3724_v46  ;;  %v3752_v46 = vpack.c.bf16 %v323_v40, %v297_v34  ;;  %v43_v34 = vld [vmem:[%s7418_s1 + $0x90] sm:$0xff]  ;;  %v96_v40 = vld [vmem:[%s7418_s1 + $0x238] sm:$0xff] }
  0x64   :  { %814 = vmatmul.mubr.f32.vlgmr.msra.gmra.mrb[8].mxu0 %v4635_v36  ;;  %3727 = vmatprep.subr.bf16.mxu1 %v3726_v55  ;;  %v326_v55 = vld [vmem:[%s7418_s1 + $0x968] sm:$0xff] }
  0x65   :  { %3733 = vmatpush1.bf16.msra.mxu0 %v3732_v47  ;;  %819 = vmatprep.mubr.f32.mxu0 %v4390_v3  ;;  %v349_v47 = vld [vmem:[%s7418_s1 + $0xa20] sm:$0xff]  ;;  %v3782_v61 = vpack.c.bf16 %v326_v55, %v300_v54  ;;  %v174_v54 = vld [vmem:[%s7418_s1 + $0x4a8] sm:$0xff] }
  0x66   :  { %3735 = vmatprep.subr.bf16.mxu0 %v3734_v51  ;;  %v273_v51 = vld [vmem:[%s7418_s1 + $0x7c0] sm:$0xff]  ;;  %v250_v55 = vld [vmem:[%s7418_s1 + $0x708] sm:$0xff] }
  0x67   :  { %3729 = vmatpush1.bf16.msra.mxu1 %v3728_v59  ;;  %v3780_v58 = vpack.c.bf16 %v273_v51, %v247_v50  ;;  %v3756_v59 = vpack.c.bf16 %v375_v53, %v349_v47  ;;  %v3830_v47 = vpack.c.bf16 %v122_v41, %v96_v40  ;;  %v121_v50 = vld [vmem:[%s7418_s1 + $0x300] sm:$0xff]  ;;  %v3806_v51 = vpack.c.bf16 %v224_v43, %v198_v42  ;;  %v148_v53 = vld [vmem:[%s7418_s1 + $0x3d8] sm:$0xff] }
  0x68   :  { %820 = vmatmul.mubr.f32.gmra.mrb[10].mxu0 %v4666_v49  ;;  %3763 = vmatprep.subr.bf16.mxu1 %v3762_v2  ;;  %v352_v2 = vld [vmem:[%s7418_s1 + $0xa38] sm:$0xff] }
  0x69   :  { %3737 = vmatpush1.bf16.msra.mxu0 %v3736_v60  ;;  %967 = vmatprep.mubr.f32.mxu0 %v4390_v3  ;;  %v401_v60 = vld [vmem:[%s7418_s1 + $0xbc0] sm:$0xff]  ;;  %v72_v40 = vld [vmem:[%s7418_s1 + $0x178] sm:$0xff] }
  0x6a   :  { %3739 = vmatprep.subr.bf16.mxu0 %v3738_v0  ;;  %891 = vmatmul.mubr.f32.vlgmr.msra.gmra.mrb[8].mxu1 %v4635_v36  ;;  %v3758_v0 = vpack.c.bf16 %v428_v57, %v402_v56  ;;  %v276_v56 = vld [vmem:[%s7418_s1 + $0x7d8] sm:$0xff] }
  0x6b   :  { %3765 = vmatpush1.bf16.msra.mxu1 %v3764_v8  ;;  %896 = vmatprep.mubr.f32.mxu1 %v4390_v3  ;;  %v3760_v8 = vpack.c.bf16 %v427_v1, %v401_v60  ;;  %v3834_v60 = vpack.c.bf16 %v174_v54, %v148_v53  ;;  %v3810_v62 = vpack.c.bf16 %v276_v56, %v250_v55  ;;  %v226_v1 = vld [vmem:[%s7418_s1 + $0x648] sm:$0xff]  ;;  %v407_v56 = vld [vmem:[%s7418_s1 + $0xbf0] sm:$0xff] }
  0x6c   :  { %3767 = vmatprep.subr.bf16.mxu1 %v3766_v11  ;;  %v377_v11 = vld [vmem:[%s7418_s1 + $0xb00] sm:$0xff]  ;;  %v434_v53 = vld [vmem:[%s7418_s1 + $0xcc8] sm:$0xff] }
  0x6d   :  { %3741 = vmatpush1.bf16.msra.mxu0 %v3740_v9  ;;  %v3786_v9 = vpack.c.bf16 %v378_v4, %v352_v2  ;;  %v3788_v19 = vpack.c.bf16 %v377_v11, %v351_v10  ;;  %v302_v2 = vld [vmem:[%s7418_s1 + $0x8a8] sm:$0xff]  ;;  %v328_v4 = vld [vmem:[%s7418_s1 + $0x978] sm:$0xff]  ;;  %v327_v11 = vld [vmem:[%s7418_s1 + $0x970] sm:$0xff] }
  0x6e   :  { %3743 = vmatprep.subr.bf16.mxu0 %v3742_v14  ;;  %897 = vmatmul.mubr.f32.gmra.mrb[10].mxu1 %v4666_v49  ;;  %v67_v14 = vld [vmem:[%s7418_s1 + $0x150] sm:$0xff]  ;;  %v3814_v10 = vpack.c.bf16 %v328_v4, %v302_v2 }
  0x6f   :  { %3769 = vmatpush1.bf16.msra.mxu1 %v3768_v20  ;;  %1044 = vmatprep.mubr.f32.mxu1 %v4390_v3  ;;  %v3796_v20 = vpack.c.bf16 %v67_v14, %v41_v13  ;;  %v278_v13 = vld [vmem:[%s7418_s1 + $0x7e8] sm:$0xff] }
  0x70   :  { %3771 = vmatprep.subr.bf16.mxu1 %v3770_v23  ;;  %v3798_v23 = vpack.c.bf16 %v120_v16, %v94_v15  ;;  %v354_v14 = vld [vmem:[%s7418_s1 + $0xa48] sm:$0xff]  ;;  %v380_v15 = vld [vmem:[%s7418_s1 + $0xb18] sm:$0xff] }
  0x71   :  { %3745 = vmatpush1.bf16.msra.mxu0 %v3744_v21  ;;  %v403_v21 = vld [vmem:[%s7418_s1 + $0xbd0] sm:$0xff] }
  0x72   :  { %3747 = vmatprep.subr.bf16.mxu0 %v3746_v26  ;;  %v146_v26 = vld [vmem:[%s7418_s1 + $0x3c8] sm:$0xff]  ;;  %v3792_v31 = vpack.c.bf16 %v429_v22, %v403_v21  ;;  %v277_v21 = vld [vmem:[%s7418_s1 + $0x7e0] sm:$0xff]  ;;  %v3818_v22 = vpack.c.bf16 %v380_v15, %v354_v14 }
  0x73   :  { %3773 = vmatpush1.bf16.msra.mxu1 %v3772_v32  ;;  %v3800_v32 = vpack.c.bf16 %v119_v25, %v93_v24  ;;  %v3802_v37 = vpack.c.bf16 %v172_v28, %v146_v26  ;;  %v304_v24 = vld [vmem:[%s7418_s1 + $0x8b8] sm:$0xff]  ;;  %v330_v25 = vld [vmem:[%s7418_s1 + $0x988] sm:$0xff] }
  0x74   :  { %3775 = vmatprep.subr.bf16.mxu1 %v3774_v35  ;;  %v69_v35 = vld [vmem:[%s7418_s1 + $0x160] sm:$0xff]  ;;  %v406_v26 = vld [vmem:[%s7418_s1 + $0xbe8] sm:$0xff] }
  0x75   :  { %3749 = vmatpush1.bf16.msra.mxu0 %v3748_v33  ;;  %v145_v33 = vld [vmem:[%s7418_s1 + $0x3c0] sm:$0xff]  ;;  %v3828_v44 = vpack.c.bf16 %v69_v35, %v43_v34  ;;  %v431_v35 = vld [vmem:[%s7418_s1 + $0xcb0] sm:$0xff]  ;;  %v5500_v14 = vld [vmem:[%s7419_s0 + $0x8] sm:$0xff] }
  0x76   :  { %3751 = vmatprep.subr.bf16.mxu0 %v3750_v39  ;;  %v3826_v39 = vpack.c.bf16 %v70_v30, %v44_v29  ;;  %v405_v30 = vld [vmem:[%s7418_s1 + $0xbe0] sm:$0xff] }
  0x77   :  { %3777 = vmatpush1.bf16.msra.mxu1 %v3776_v45  ;;  %v3804_v45 = vpack.c.bf16 %v171_v38, %v145_v33  ;;  %v329_v33 = vld [vmem:[%s7418_s1 + $0x980] sm:$0xff]  ;;  %v382_v38 = vld [vmem:[%s7418_s1 + $0xb28] sm:$0xff]  ;;  %v3824_v42 = vpack.c.bf16 %v431_v35, %v405_v30  ;;  %v204_v35 = vld [vmem:[%s7418_s1 + $0x598] sm:$0xff] }
  0x78   :  { %3779 = vmatprep.subr.bf16.mxu1 %v3778_v48  ;;  %v95_v48 = vld [vmem:[%s7418_s1 + $0x230] sm:$0xff] }
  0x79   :  { %3753 = vmatpush1.bf16.msra.mxu0 %v3752_v46  ;;  %v197_v46 = vld [vmem:[%s7418_s1 + $0x560] sm:$0xff]  ;;  %v3832_v57 = vpack.c.bf16 %v121_v50, %v95_v48  ;;  %v71_v48 = vld [vmem:[%s7418_s1 + $0x170] sm:$0xff]  ;;  %v98_v50 = vld [vmem:[%s7418_s1 + $0x248] sm:$0xff] }
  0x7a   :  { %3755 = vmatprep.subr.bf16.mxu0 %v3754_v52  ;;  %v223_v52 = vld [vmem:[%s7418_s1 + $0x630] sm:$0xff] }
  0x7b   :  { %3781 = vmatpush1.bf16.msra.mxu1 %v3780_v58  ;;  %v3808_v58 = vpack.c.bf16 %v223_v52, %v197_v46  ;;  %v408_v52 = vld [vmem:[%s7418_s1 + $0xbf8] sm:$0xff] }
  0x7c   :  { %3783 = vmatprep.subr.bf16.mxu1 %v3782_v61  ;;  %v147_v61 = vld [vmem:[%s7418_s1 + $0x3d0] sm:$0xff] }
  0x7d   :  { %3757 = vmatpush1.bf16.msra.mxu0 %v3756_v59  ;;  %v249_v59 = vld [vmem:[%s7418_s1 + $0x700] sm:$0xff] }
  0x7e   :  { %3759 = vmatprep.subr.bf16.mxu0 %v3758_v0  ;;  %v200_v0 = vld [vmem:[%s7418_s1 + $0x578] sm:$0xff]  ;;  %v3812_v6 = vpack.c.bf16 %v275_v63, %v249_v59  ;;  %v97_v59 = vld [vmem:[%s7418_s1 + $0x240] sm:$0xff] }
  0x7f   :  { %3785 = vmatpush1.bf16.msra.mxu1 %v3784_v7  ;;  %v301_v7 = vld [vmem:[%s7418_s1 + $0x8a0] sm:$0xff]  ;;  %v48_v63 = vld [vmem:[%s7418_s1 + $0xb8] sm:$0xff] }
  0x80   :  { %3787 = vmatprep.subr.bf16.mxu1 %v3786_v9  ;;  %v199_v9 = vld [vmem:[%s7418_s1 + $0x570] sm:$0xff]  ;;  %v3816_v17 = vpack.c.bf16 %v327_v11, %v301_v7  ;;  %v73_v7 = vld [vmem:[%s7418_s1 + $0x180] sm:$0xff]  ;;  %v126_v11 = vld [vmem:[%s7418_s1 + $0x328] sm:$0xff] }
  0x81   :  { %3761 = vmatpush1.bf16.msra.mxu0 %v3760_v8  ;;  %v3838_v8 = vpack.c.bf16 %v226_v1, %v200_v0  ;;  %v74_v0 = vld [vmem:[%s7418_s1 + $0x188] sm:$0xff]  ;;  %v5469_v1 = vld [vmem:[%s7419_s0] sm:$0xff] }
  0x82   :  { %3795 = vmatprep.subr.bf16.mxu0 %v3794_v12  ;;  %v252_v12 = vld [vmem:[%s7418_s1 + $0x718] sm:$0xff] }
  0x83   :  { %3789 = vmatpush1.bf16.msra.mxu1 %v3788_v19  ;;  %v3842_v19 = vpack.c.bf16 %v278_v13, %v252_v12  ;;  %v202_v12 = vld [vmem:[%s7418_s1 + $0x588] sm:$0xff]  ;;  %v228_v13 = vld [vmem:[%s7418_s1 + $0x658] sm:$0xff] }
  0x84   :  { %968 = vmatmul.mubr.f32.vlgmr.msra.gmra.mrb[12].mxu0 %v4635_v36  ;;  %3791 = vmatprep.subr.bf16.mxu1 %v3790_v27  ;;  %v432_v27 = vld [vmem:[%s7418_s1 + $0xcb8] sm:$0xff] }
  0x85   :  { %3797 = vmatpush1.bf16.msra.mxu0 %v3796_v20  ;;  %973 = vmatprep.mubr.f32.mxu0 %v4390_v3  ;;  %v251_v20 = vld [vmem:[%s7418_s1 + $0x710] sm:$0xff]  ;;  %v3822_v34 = vpack.c.bf16 %v432_v27, %v406_v26  ;;  %v280_v26 = vld [vmem:[%s7418_s1 + $0x7f8] sm:$0xff] }
  0x86   :  { %3799 = vmatprep.subr.bf16.mxu0 %v3798_v23  ;;  %v379_v23 = vld [vmem:[%s7418_s1 + $0xb10] sm:$0xff]  ;;  %v3844_v28 = vpack.c.bf16 %v277_v21, %v251_v20  ;;  %v125_v20 = vld [vmem:[%s7418_s1 + $0x320] sm:$0xff]  ;;  %v3870_v21 = vpack.c.bf16 %v228_v13, %v202_v12  ;;  %v76_v12 = vld [vmem:[%s7418_s1 + $0x198] sm:$0xff] }
  0x87   :  { %3793 = vmatpush1.bf16.msra.mxu1 %v3792_v31  ;;  %v3820_v29 = vpack.c.bf16 %v379_v23, %v353_v18  ;;  %v3846_v31 = vpack.c.bf16 %v330_v25, %v304_v24  ;;  %v152_v23 = vld [vmem:[%s7418_s1 + $0x3f8] sm:$0xff]  ;;  %v178_v24 = vld [vmem:[%s7418_s1 + $0x4c8] sm:$0xff] }
  0x88   :  { %974 = vmatmul.mubr.f32.gmra.mrb[14].mxu0 %v4666_v49  ;;  %3827 = vmatprep.subr.bf16.mxu1 %v3826_v39  ;;  %v46_v39 = vld [vmem:[%s7418_s1 + $0xa8] sm:$0xff]  ;;  %v3898_v30 = vpack.c.bf16 %v178_v24, %v152_v23  ;;  %v128_v23 = vld [vmem:[%s7418_s1 + $0x338] sm:$0xff] }
  0x89   :  { %3801 = vmatpush1.bf16.msra.mxu0 %v3800_v32  ;;  %1121 = vmatprep.mubr.f32.mxu0 %v4390_v3  ;;  %v303_v32 = vld [vmem:[%s7418_s1 + $0x8b0] sm:$0xff]  ;;  %v3858_v46 = vpack.c.bf16 %v72_v40, %v46_v39  ;;  %v254_v25 = vld [vmem:[%s7418_s1 + $0x728] sm:$0xff]  ;;  %v332_v39 = vld [vmem:[%s7418_s1 + $0x998] sm:$0xff] }
  0x8a   :  { %3803 = vmatprep.subr.bf16.mxu0 %v3802_v37  ;;  %1045 = vmatmul.mubr.f32.vlgmr.msra.gmra.mrb[12].mxu1 %v4635_v36  ;;  %v173_v36 = vld [vmem:[%s7418_s1 + $0x4a0] sm:$0xff]  ;;  %v356_v37 = vld [vmem:[%s7418_s1 + $0xa58] sm:$0xff]  ;;  %v3848_v41 = vpack.c.bf16 %v329_v33, %v303_v32  ;;  %v3874_v33 = vpack.c.bf16 %v280_v26, %v254_v25  ;;  %v438_v25 = vld [vmem:[%s7418_s1 + $0xce8] sm:$0xff] }
  0x8b   :  { %3829 = vmatpush1.bf16.msra.mxu1 %v3828_v44  ;;  %1050 = vmatprep.mubr.f32.mxu1 %v4390_v3  ;;  %v3836_v5 = vpack.c.bf16 %v173_v36, %v147_v61  ;;  %v3850_v43 = vpack.c.bf16 %v382_v38, %v356_v37  ;;  %v355_v44 = vld [vmem:[%s7418_s1 + $0xa50] sm:$0xff]  ;;  %v150_v61 = vld [vmem:[%s7418_s1 + $0x3e8] sm:$0xff]  ;;  %v3854_v36 = vpack.c.bf16 %v434_v53, %v408_v52  ;;  %v177_v32 = vld [vmem:[%s7418_s1 + $0x4c0] sm:$0xff] }
  0x8c   :  { %3831 = vmatprep.subr.bf16.mxu1 %v3830_v47  ;;  %v45_v47 = vld [vmem:[%s7418_s1 + $0xa0] sm:$0xff]  ;;  %v230_v37 = vld [vmem:[%s7418_s1 + $0x668] sm:$0xff]  ;;  %v384_v52 = vld [vmem:[%s7418_s1 + $0xb38] sm:$0xff] }
  0x8d   :  { %3805 = vmatpush1.bf16.msra.mxu0 %v3804_v45  ;;  %v381_v45 = vld [vmem:[%s7418_s1 + $0xb20] sm:$0xff]  ;;  %v3860_v55 = vpack.c.bf16 %v71_v48, %v45_v47  ;;  %v306_v38 = vld [vmem:[%s7418_s1 + $0x8c8] sm:$0xff]  ;;  %v331_v47 = vld [vmem:[%s7418_s1 + $0x990] sm:$0xff] }
  0x8e   :  { %3807 = vmatprep.subr.bf16.mxu0 %v3806_v51  ;;  %1051 = vmatmul.mubr.f32.gmra.mrb[14].mxu1 %v4666_v49  ;;  %v225_v49 = vld [vmem:[%s7418_s1 + $0x640] sm:$0xff]  ;;  %v124_v51 = vld [vmem:[%s7418_s1 + $0x318] sm:$0xff]  ;;  %v3852_v54 = vpack.c.bf16 %v381_v45, %v355_v44  ;;  %v203_v44 = vld [vmem:[%s7418_s1 + $0x590] sm:$0xff] }
  0x8f   :  { %3833 = vmatpush1.bf16.msra.mxu1 %v3832_v57  ;;  %1198 = vmatprep.mubr.f32.mxu1 %v4390_v3  ;;  %v3840_v16 = vpack.c.bf16 %v225_v49, %v199_v9  ;;  %v433_v57 = vld [vmem:[%s7418_s1 + $0xcc0] sm:$0xff]  ;;  %v175_v9 = vld [vmem:[%s7418_s1 + $0x4b0] sm:$0xff]  ;;  %v3890_v49 = vpack.c.bf16 %v74_v0, %v48_v63  ;;  %v256_v48 = vld [vmem:[%s7418_s1 + $0x738] sm:$0xff] }
  0x90   :  { %3835 = vmatprep.subr.bf16.mxu1 %v3834_v60  ;;  %v123_v60 = vld [vmem:[%s7418_s1 + $0x310] sm:$0xff]  ;;  %v3856_v2 = vpack.c.bf16 %v433_v57, %v407_v56  ;;  %v229_v45 = vld [vmem:[%s7418_s1 + $0x660] sm:$0xff]  ;;  %v436_v63 = vld [vmem:[%s7418_s1 + $0xcd8] sm:$0xff] }
  0x91   :  { %3809 = vmatpush1.bf16.msra.mxu0 %v3808_v58  ;;  %v3862_v58 = vpack.c.bf16 %v124_v51, %v98_v50  ;;  %v3864_v4 = vpack.c.bf16 %v123_v60, %v97_v59  ;;  %v282_v50 = vld [vmem:[%s7418_s1 + $0x808] sm:$0xff]  ;;  %v3904_v53 = vpack.c.bf16 %v229_v45, %v203_v44  ;;  %v255_v57 = vld [vmem:[%s7418_s1 + $0x730] sm:$0xff]  ;;  %v412_v24 = vld [vmem:[%s7418_s1 + $0xc18] sm:$0xff] }
  0x92   :  { %3811 = vmatprep.subr.bf16.mxu0 %v3810_v62  ;;  %v176_v62 = vld [vmem:[%s7418_s1 + $0x4b8] sm:$0xff]  ;;  %v358_v51 = vld [vmem:[%s7418_s1 + $0xa68] sm:$0xff]  ;;  %v3906_v56 = vpack.c.bf16 %v282_v50, %v256_v48  ;;  %v383_v60 = vld [vmem:[%s7418_s1 + $0xb30] sm:$0xff] }
  0x93   :  { %3837 = vmatpush1.bf16.msra.mxu1 %v3836_v5  ;;  %v149_v5 = vld [vmem:[%s7418_s1 + $0x3e0] sm:$0xff]  ;;  %v3882_v59 = vpack.c.bf16 %v384_v52, %v358_v51  ;;  %v1477_v44 = vld [vmem:[%s7420_s2 + $0x48] sm:$0xff]  ;;  %v1487_v48 = vld [vmem:[%s7420_s2 + $0x98] sm:$0xff] }
  0x94   :  { %3839 = vmatprep.subr.bf16.mxu1 %v3838_v8  ;;  %v3866_v8 = vpack.c.bf16 %v176_v62, %v150_v61  ;;  %v308_v61 = vld [vmem:[%s7418_s1 + $0x8d8] sm:$0xff]  ;;  %v410_v62 = vld [vmem:[%s7418_s1 + $0xc08] sm:$0xff]  ;;  %v1496_v50 = vld [vmem:[%s7420_s2 + $0xe0] sm:$0xff] }
  0x95   :  { %3813 = vmatpush1.bf16.msra.mxu0 %v3812_v6  ;;  %v47_v6 = vld [vmem:[%s7418_s1 + $0xb0] sm:$0xff]  ;;  %v206_v51 = vld [vmem:[%s7418_s1 + $0x5a8] sm:$0xff]  ;;  %v232_v52 = vld [vmem:[%s7418_s1 + $0x678] sm:$0xff] }
  0x96   :  { %3815 = vmatprep.subr.bf16.mxu0 %v3814_v10  ;;  %v100_v10 = vld [vmem:[%s7418_s1 + $0x258] sm:$0xff]  ;;  %v3892_v15 = vpack.c.bf16 %v73_v7, %v47_v6  ;;  %v307_v6 = vld [vmem:[%s7418_s1 + $0x8d0] sm:$0xff]  ;;  %v333_v7 = vld [vmem:[%s7418_s1 + $0x9a0] sm:$0xff] }
  0x97   :  { %3841 = vmatpush1.bf16.msra.mxu1 %v3840_v16  ;;  %v3868_v16 = vpack.c.bf16 %v175_v9, %v149_v5  ;;  %v3894_v18 = vpack.c.bf16 %v126_v11, %v100_v10  ;;  %v435_v9 = vld [vmem:[%s7418_s1 + $0xcd0] sm:$0xff]  ;;  %v386_v10 = vld [vmem:[%s7418_s1 + $0xb48] sm:$0xff]  ;;  %v3912_v13 = vpack.c.bf16 %v333_v7, %v307_v6 }
  0x98   :  { %3843 = vmatprep.subr.bf16.mxu1 %v3842_v19  ;;  %v99_v19 = vld [vmem:[%s7418_s1 + $0x250] sm:$0xff]  ;;  %v50_v11 = vld [vmem:[%s7418_s1 + $0xc8] sm:$0xff] }
  0x99   :  { %3817 = vmatpush1.bf16.msra.mxu0 %v3816_v17  ;;  %v201_v17 = vld [vmem:[%s7418_s1 + $0x580] sm:$0xff]  ;;  %v3896_v27 = vpack.c.bf16 %v125_v20, %v99_v19  ;;  %v3922_v19 = vpack.c.bf16 %v76_v12, %v50_v11  ;;  %v283_v12 = vld [vmem:[%s7418_s1 + $0x810] sm:$0xff] }
  0x9a   :  { %3819 = vmatprep.subr.bf16.mxu0 %v3818_v22  ;;  %v227_v22 = vld [vmem:[%s7418_s1 + $0x650] sm:$0xff]  ;;  %v49_v20 = vld [vmem:[%s7418_s1 + $0xc0] sm:$0xff] }
  0x9b   :  { %3845 = vmatpush1.bf16.msra.mxu1 %v3844_v28  ;;  %v3872_v28 = vpack.c.bf16 %v227_v22, %v201_v17  ;;  %v359_v17 = vld [vmem:[%s7418_s1 + $0xa70] sm:$0xff]  ;;  %v102_v22 = vld [vmem:[%s7418_s1 + $0x268] sm:$0xff] }
  0x9c   :  { %3847 = vmatprep.subr.bf16.mxu1 %v3846_v31  ;;  %v151_v31 = vld [vmem:[%s7418_s1 + $0x3f0] sm:$0xff] }
  0x9d   :  { %3821 = vmatpush1.bf16.msra.mxu0 %v3820_v29  ;;  %v253_v29 = vld [vmem:[%s7418_s1 + $0x720] sm:$0xff]  ;;  %v3900_v40 = vpack.c.bf16 %v177_v32, %v151_v31  ;;  %v127_v32 = vld [vmem:[%s7418_s1 + $0x330] sm:$0xff] }
  0x9e   :  { %3823 = vmatprep.subr.bf16.mxu0 %v3822_v34  ;;  %v279_v34 = vld [vmem:[%s7418_s1 + $0x7f0] sm:$0xff]  ;;  %v101_v31 = vld [vmem:[%s7418_s1 + $0x260] sm:$0xff] }
  0x9f   :  { %3849 = vmatpush1.bf16.msra.mxu1 %v3848_v41  ;;  %v3876_v41 = vpack.c.bf16 %v279_v34, %v253_v29  ;;  %v437_v29 = vld [vmem:[%s7418_s1 + $0xce0] sm:$0xff]  ;;  %v3918_v34 = vpack.c.bf16 %v438_v25, %v412_v24  ;;  %v335_v25 = vld [vmem:[%s7418_s1 + $0x9b0] sm:$0xff] }
  0xa0   :  { %3851 = vmatprep.subr.bf16.mxu1 %v3850_v43  ;;  %v3902_v43 = vpack.c.bf16 %v230_v37, %v204_v35  ;;  %v180_v35 = vld [vmem:[%s7418_s1 + $0x4d8] sm:$0xff]  ;;  %v1469_v37 = vld [vmem:[%s7420_s2 + $0x8] sm:$0xff] }
  0xa1   :  { %3825 = vmatpush1.bf16.msra.mxu0 %v3824_v42  ;;  %v305_v42 = vld [vmem:[%s7418_s1 + $0x8c0] sm:$0xff] }
  0xa2   :  { %3859 = vmatprep.subr.bf16.mxu0 %v3858_v46  ;;  %v3878_v46 = vpack.c.bf16 %v332_v39, %v306_v38  ;;  %v1478_v38 = vld [vmem:[%s7420_s2 + $0x50] sm:$0xff]  ;;  %v1996_v39 = vlaneseq }
  0xa3   :  { %3853 = vmatpush1.bf16.msra.mxu1 %v3852_v54  ;;  %v3880_v54 = vpack.c.bf16 %v331_v47, %v305_v42  ;;  %v153_v42 = vld [vmem:[%s7418_s1 + $0x400] sm:$0xff]  ;;  %v3954_v47 = vpack.c.bf16 %v1478_v38, %v1469_v37  ;;  %v387_v38 = vld [vmem:[%s7418_s1 + $0xb50] sm:$0xff] }
  0xa4   :  { %1122 = vmatmul.mubr.f32.vlgmr.msra.gmra.mrb[16].mxu0 %v5469_v1  ;;  %3855 = vmatprep.subr.bf16.mxu1 %v3854_v36  ;;  %v334_v36 = vld [vmem:[%s7418_s1 + $0x9a8] sm:$0xff] }
  0xa5   :  { %3861 = vmatpush1.bf16.msra.mxu0 %v3860_v55  ;;  %1127 = vmatprep.mubr.f32.mxu0 %v4390_v3  ;;  %v357_v55 = vld [vmem:[%s7418_s1 + $0xa60] sm:$0xff]  ;;  %v3910_v5 = vpack.c.bf16 %v334_v36, %v308_v61  ;;  %v3934_v36 = vpack.c.bf16 %v232_v52, %v206_v51  ;;  %v439_v51 = vld [vmem:[%s7418_s1 + $0xcf0] sm:$0xff]  ;;  %v1577_v52 = vld [vmem:[%s7420_s2 + $0x368] sm:$0xff] }
  0xa6   :  { %3863 = vmatprep.subr.bf16.mxu0 %v3862_v58  ;;  %v281_v58 = vld [vmem:[%s7418_s1 + $0x800] sm:$0xff] }
  0xa7   :  { %3857 = vmatpush1.bf16.msra.mxu1 %v3856_v2  ;;  %v3908_v0 = vpack.c.bf16 %v281_v58, %v255_v57  ;;  %v3884_v2 = vpack.c.bf16 %v383_v60, %v357_v55  ;;  %v231_v57 = vld [vmem:[%s7418_s1 + $0x670] sm:$0xff]  ;;  %v3958_v58 = vpack.c.bf16 %v1496_v50, %v1487_v48  ;;  %v1495_v60 = vld [vmem:[%s7420_s2 + $0xd8] sm:$0xff] }
  0xa8   :  { %1128 = vmatmul.mubr.f32.gmra.mrb[18].mxu0 %v5500_v14  ;;  %3891 = vmatprep.subr.bf16.mxu1 %v3890_v49  ;;  %v360_v49 = vld [vmem:[%s7418_s1 + $0xa78] sm:$0xff] }
  0xa9   :  { %3865 = vmatpush1.bf16.msra.mxu0 %v3864_v4  ;;  %1275 = vmatprep.mubr.f32.mxu0 %v4390_v3  ;;  %v409_v4 = vld [vmem:[%s7418_s1 + $0xc00] sm:$0xff]  ;;  %v1567_v48 = vld [vmem:[%s7420_s2 + $0x318] sm:$0xff] }
  0xaa   :  { %3867 = vmatprep.subr.bf16.mxu0 %v3866_v8  ;;  %1199 = vmatmul.mubr.f32.vlgmr.msra.gmra.mrb[16].mxu1 %v5469_v1  ;;  %v3886_v8 = vpack.c.bf16 %v436_v63, %v410_v62  ;;  %v3272_v62 = vld [vmem:[%s7421_s5 + $0x2] ss:$4 sm:$0xff] }
  0xab   :  { %3893 = vmatpush1.bf16.msra.mxu1 %v3892_v15  ;;  %1204 = vmatprep.mubr.f32.mxu1 %v4390_v3  ;;  %v3888_v15 = vpack.c.bf16 %v435_v9, %v409_v4  ;;  %v1505_v63 = vld [vmem:[%s7420_s2 + $0x128] sm:$0xff]  ;;  %v284_v4 = vld [vmem:[%s7418_s1 + $0x818] sm:$0xff] }
  0xac   :  { %3895 = vmatprep.subr.bf16.mxu1 %v3894_v18  ;;  %v385_v18 = vld [vmem:[%s7418_s1 + $0xb40] sm:$0xff] }
  0xad   :  { %3869 = vmatpush1.bf16.msra.mxu0 %v3868_v16  ;;  %v3914_v16 = vpack.c.bf16 %v386_v10, %v360_v49  ;;  %v3916_v26 = vpack.c.bf16 %v385_v18, %v359_v17  ;;  %v1504_v49 = vld [vmem:[%s7420_s2 + $0x120] sm:$0xff]  ;;  %v1513_v10 = vld [vmem:[%s7420_s2 + $0x168] sm:$0xff]  ;;  %v336_v17 = vld [vmem:[%s7418_s1 + $0x9b8] sm:$0xff] }
  0xae   :  { %3871 = vmatprep.subr.bf16.mxu0 %v3870_v21  ;;  %1205 = vmatmul.mubr.f32.gmra.mrb[18].mxu1 %v5500_v14  ;;  %v75_v21 = vld [vmem:[%s7418_s1 + $0x190] sm:$0xff]  ;;  %v3964_v18 = vpack.c.bf16 %v1513_v10, %v1504_v49  ;;  %v1603_v10 = vld [vmem:[%s7420_s2 + $0x438] sm:$0xff] }
  0xaf   :  { %3897 = vmatpush1.bf16.msra.mxu1 %v3896_v27  ;;  %1352 = vmatprep.mubr.f32.mxu1 %v4390_v3  ;;  %v3924_v27 = vpack.c.bf16 %v75_v21, %v49_v20  ;;  %v309_v20 = vld [vmem:[%s7418_s1 + $0x8e0] sm:$0xff]  ;;  %v1594_v49 = vld [vmem:[%s7420_s2 + $0x3f0] sm:$0xff] }
  0xb0   :  { %3899 = vmatprep.subr.bf16.mxu1 %v3898_v30  ;;  %v3926_v30 = vpack.c.bf16 %v128_v23, %v102_v22  ;;  %v1522_v22 = vld [vmem:[%s7420_s2 + $0x1b0] sm:$0xff]  ;;  %v1531_v23 = vld [vmem:[%s7420_s2 + $0x1f8] sm:$0xff] }
  0xb1   :  { %3873 = vmatpush1.bf16.msra.mxu0 %v3872_v28  ;;  %v411_v28 = vld [vmem:[%s7418_s1 + $0xc10] sm:$0xff] }
  0xb2   :  { %3875 = vmatprep.subr.bf16.mxu0 %v3874_v33  ;;  %v154_v33 = vld [vmem:[%s7418_s1 + $0x408] sm:$0xff] }
  0xb3   :  { %3901 = vmatpush1.bf16.msra.mxu1 %v3900_v40  ;;  %v3920_v40 = vpack.c.bf16 %v437_v29, %v411_v28  ;;  %v3930_v45 = vpack.c.bf16 %v180_v35, %v154_v33  ;;  %v362_v28 = vld [vmem:[%s7418_s1 + $0xa88] sm:$0xff]  ;;  %v388_v29 = vld [vmem:[%s7418_s1 + $0xb58] sm:$0xff] }
  0xb4   :  { %3903 = vmatprep.subr.bf16.mxu1 %v3902_v43  ;;  %v1468_v43 = vld [vmem:[%s7420_s2] sm:$0xff]  ;;  %v1549_v35 = vld [vmem:[%s7420_s2 + $0x288] sm:$0xff]  ;;  %v3946_v37 = vpack.c.bf16 %v388_v29, %v362_v28 }
  0xb5   :  { %3877 = vmatpush1.bf16.msra.mxu0 %v3876_v41  ;;  %v3928_v41 = vpack.c.bf16 %v127_v32, %v101_v31  ;;  %v3956_v55 = vpack.c.bf16 %v1477_v44, %v1468_v43  ;;  %v3944_v31 = vpack.c.bf16 %v335_v25, %v309_v20  ;;  %v361_v32 = vld [vmem:[%s7418_s1 + $0xa80] sm:$0xff]  ;;  %v3984_v20 = vpack.c.bf16 %v1603_v10, %v1594_v49 }
  0xb6   :  { %3879 = vmatprep.subr.bf16.mxu0 %v3878_v46  ;;  %v179_v46 = vld [vmem:[%s7418_s1 + $0x4d0] sm:$0xff]  ;;  %v3948_v44 = vpack.c.bf16 %v387_v38, %v361_v32  ;;  %v1524_v29 = vld [vmem:[%s7420_s2 + $0x1c0] sm:$0xff] }
  0xb7   :  { %3905 = vmatpush1.bf16.msra.mxu1 %v3904_v53  ;;  %v5702_v53 = vshrl.u32 %v1996_v39, 7  ;;  %v1559_v39 = vld [vmem:[%s7420_s2 + $0x2d8] sm:$0xff]  ;;  %v1570_v38 = vld [vmem:[%s7420_s2 + $0x330] sm:$0xff] }
  0xb8   :  { %3907 = vmatprep.subr.bf16.mxu1 %v3906_v56  ;;  %v3932_v56 = vpack.c.bf16 %v179_v46, %v153_v42  ;;  %v440_v42 = vld [vmem:[%s7418_s1 + $0xcf8] sm:$0xff] }
  0xb9   :  { %3881 = vmatpush1.bf16.msra.mxu0 %v3880_v54  ;;  %v205_v54 = vld [vmem:[%s7418_s1 + $0x5a0] sm:$0xff]  ;;  %v2026_v61 = vsub.s32 7, %v5702_v53 }
  0xba   :  { %3883 = vmatprep.subr.bf16.mxu0 %v3882_v59  ;;  %v1486_v59 = vld [vmem:[%s7420_s2 + $0x90] sm:$0xff]  ;;  %v3936_v7 = vpack.c.bf16 %v231_v57, %v205_v54 }
  0xbb   :  { %3909 = vmatpush1.bf16.msra.mxu1 %v3908_v0  ;;  %v1514_v0 = vld [vmem:[%s7420_s2 + $0x170] sm:$0xff]  ;;  %v3960_v6 = vpack.c.bf16 %v1495_v60, %v1486_v59  ;;  %v1576_v60 = vld [vmem:[%s7420_s2 + $0x360] sm:$0xff] }
  0xbc   :  { %3911 = vmatprep.subr.bf16.mxu1 %v3910_v5  ;;  %v5737_v5 = vrot.slane %v3272_v62, %v2026_v61  ;;  %v3962_v9 = vpack.c.bf16 %v1514_v0, %v1505_v63  ;;  %v1586_v54 = vld [vmem:[%s7420_s2 + $0x3b0] sm:$0xff]  ;;  %v1479_v0 = vld [vmem:[%s7420_s2 + $0x58] sm:$0xff] }
  0xbd   :  { %3885 = vmatpush1.bf16.msra.mxu0 %v3884_v2  ;;  %v258_v2 = vld [vmem:[%s7418_s1 + $0x748] sm:$0xff]  ;;  %v3978_v59 = vpack.c.bf16 %v1586_v54, %v1577_v52  ;;  %v1470_v63 = vld [vmem:[%s7420_s2 + $0x10] sm:$0xff] }
  0xbe   :  { %3887 = vmatprep.subr.bf16.mxu0 %v3886_v8  ;;  %v257_v8 = vld [vmem:[%s7418_s1 + $0x740] sm:$0xff]  ;;  %v3938_v11 = vpack.c.bf16 %v284_v4, %v258_v2  ;;  %v1489_v2 = vld [vmem:[%s7420_s2 + $0xa8] sm:$0xff]  ;;  %v1498_v4 = vld [vmem:[%s7420_s2 + $0xf0] sm:$0xff] }
  0xbf   :  { %3913 = vmatpush1.bf16.msra.mxu1 %v3912_v13  ;;  %v1523_v13 = vld [vmem:[%s7420_s2 + $0x1b8] sm:$0xff] }
  0xc0   :  { %3915 = vmatprep.subr.bf16.mxu1 %v3914_v16  ;;  %v310_v16 = vld [vmem:[%s7418_s1 + $0x8e8] sm:$0xff] }
  0xc1   :  { %3889 = vmatpush1.bf16.msra.mxu0 %v3888_v15  ;;  %v1532_v15 = vld [vmem:[%s7420_s2 + $0x200] sm:$0xff]  ;;  %v3942_v24 = vpack.c.bf16 %v336_v17, %v310_v16 }
  0xc2   :  { %3923 = vmatprep.subr.bf16.mxu0 %v3922_v19  ;;  %v3940_v19 = vpack.c.bf16 %v283_v12, %v257_v8  ;;  %v3966_v21 = vpack.c.bf16 %v1532_v15, %v1523_v13  ;;  %v1488_v12 = vld [vmem:[%s7420_s2 + $0xa0] sm:$0xff]  ;;  %v1497_v13 = vld [vmem:[%s7420_s2 + $0xe8] sm:$0xff]  ;;  %v1507_v15 = vld [vmem:[%s7420_s2 + $0x138] sm:$0xff] }
  0xc3   :  { %3917 = vmatpush1.bf16.msra.mxu1 %v3916_v26  ;;  %v1541_v26 = vld [vmem:[%s7420_s2 + $0x248] sm:$0xff]  ;;  %v1516_v17 = vld [vmem:[%s7420_s2 + $0x180] sm:$0xff] }
  0xc4   :  { %1276 = vmatmul.mubr.f32.vlgmr.msra.gmra.mrb[20].mxu0 %v5469_v1  ;;  %3919 = vmatprep.subr.bf16.mxu1 %v3918_v34  ;;  %v1540_v34 = vld [vmem:[%s7420_s2 + $0x240] sm:$0xff] }
  0xc5   :  { %3925 = vmatpush1.bf16.msra.mxu0 %v3924_v27  ;;  %1281 = vmatprep.mubr.f32.mxu0 %v4390_v3  ;;  %v1550_v27 = vld [vmem:[%s7420_s2 + $0x290] sm:$0xff]  ;;  %v3972_v43 = vpack.c.bf16 %v1549_v35, %v1540_v34  ;;  %v1551_v35 = vld [vmem:[%s7420_s2 + $0x298] sm:$0xff] }
  0xc6   :  { %3927 = vmatprep.subr.bf16.mxu0 %v3926_v30  ;;  %v3968_v30 = vpack.c.bf16 %v1531_v23, %v1522_v22  ;;  %v3970_v33 = vpack.c.bf16 %v1550_v27, %v1541_v26  ;;  %v3994_v22 = vpack.c.bf16 %v1516_v17, %v1507_v15  ;;  %v1506_v23 = vld [vmem:[%s7420_s2 + $0x130] sm:$0xff]  ;;  %v1472_v17 = vld [vmem:[%s7420_s2 + $0x20] sm:$0xff] }
  0xc7   :  { %3921 = vmatpush1.bf16.msra.mxu1 %v3920_v40  ;;  %v1568_v40 = vld [vmem:[%s7420_s2 + $0x320] sm:$0xff]  ;;  %v1534_v26 = vld [vmem:[%s7420_s2 + $0x210] sm:$0xff] }
  0xc8   :  { %1282 = vmatmul.mubr.f32.gmra.mrb[22].mxu0 %v5500_v14  ;;  %3955 = vmatprep.subr.bf16.mxu1 %v3954_v47  ;;  %v3974_v46 = vpack.c.bf16 %v1568_v40, %v1559_v39  ;;  %v1558_v47 = vld [vmem:[%s7420_s2 + $0x2d0] sm:$0xff] }
  0xc9   :  { %3929 = vmatpush1.bf16.msra.mxu0 %v3928_v41  ;;  %1429 = vmatprep.mubr.f32.mxu0 %v4390_v3  ;;  %v414_v41 = vld [vmem:[%s7418_s1 + $0xc28] sm:$0xff]  ;;  %v3976_v57 = vpack.c.bf16 %v1567_v48, %v1558_v47  ;;  %v1542_v34 = vld [vmem:[%s7420_s2 + $0x250] sm:$0xff] }
  0xca   :  { %3931 = vmatprep.subr.bf16.mxu0 %v3930_v45  ;;  %1353 = vmatmul.mubr.f32.vlgmr.msra.gmra.mrb[20].mxu1 %v5469_v1  ;;  %v413_v45 = vld [vmem:[%s7418_s1 + $0xc20] sm:$0xff]  ;;  %v3950_v50 = vpack.c.bf16 %v440_v42, %v414_v41  ;;  %v4004_v39 = vpack.c.bf16 %v1551_v35, %v1542_v34  ;;  %v1569_v42 = vld [vmem:[%s7420_s2 + $0x328] sm:$0xff]  ;;  %v1518_v34 = vld [vmem:[%s7420_s2 + $0x190] sm:$0xff] }
  0xcb   :  { %3957 = vmatpush1.bf16.msra.mxu1 %v3956_v55  ;;  %1358 = vmatprep.mubr.f32.mxu1 %v4390_v3  ;;  %v1471_v55 = vld [vmem:[%s7420_s2 + $0x18] sm:$0xff]  ;;  %v1560_v41 = vld [vmem:[%s7420_s2 + $0x2e0] sm:$0xff] }
  0xcc   :  { %3959 = vmatprep.subr.bf16.mxu1 %v3958_v58  ;;  %v3952_v58 = vpack.c.bf16 %v439_v51, %v413_v45  ;;  %v3274_v45 = vld [vmem:[%s7421_s5] ss:$0 sm:$0xff]  ;;  %v1587_v51 = vld [vmem:[%s7420_s2 + $0x3b8] sm:$0xff] }
  0xcd   :  { %3933 = vmatpush1.bf16.msra.mxu0 %v3932_v56  ;;  %v1480_v56 = vld [vmem:[%s7420_s2 + $0x60] sm:$0xff]  ;;  %v1511_v35 = vld [vmem:[%s7420_s2 + $0x158] sm:$0xff] }
  0xce   :  { %3935 = vmatprep.subr.bf16.mxu0 %v3934_v36  ;;  %1359 = vmatmul.mubr.f32.gmra.mrb[22].mxu1 %v5500_v14  ;;  %v1585_v36 = vld [vmem:[%s7420_s2 + $0x3a8] sm:$0xff]  ;;  %v3986_v62 = vpack.c.bf16 %v1480_v56, %v1471_v55  ;;  %v1606_v56 = vld [vmem:[%s7420_s2 + $0x450] sm:$0xff] }
  0xcf   :  { %3961 = vmatpush1.bf16.msra.mxu1 %v3960_v6  ;;  %1676 = vmatprep.mubr.f32.mxu1 %v4390_v3  ;;  %v1595_v6 = vld [vmem:[%s7420_s2 + $0x3f8] sm:$0xff]  ;;  %v3980_v8 = vpack.c.bf16 %v1585_v36, %v1576_v60  ;;  %v1597_v55 = vld [vmem:[%s7420_s2 + $0x408] sm:$0xff]  ;;  %v1596_v36 = vld [vmem:[%s7420_s2 + $0x400] sm:$0xff] }
  0xd0   :  { %3963 = vmatprep.subr.bf16.mxu1 %v3962_v9  ;;  %v3988_v9 = vpack.c.bf16 %v1479_v0, %v1470_v63  ;;  %v4014_v60 = vpack.c.bf16 %v1606_v56, %v1597_v55  ;;  %v1538_v55 = vld [vmem:[%s7420_s2 + $0x230] sm:$0xff] }
  0xd1   :  { %3937 = vmatpush1.bf16.msra.mxu0 %v3936_v7  ;;  %v1604_v7 = vld [vmem:[%s7420_s2 + $0x440] sm:$0xff] }
  0xd2   :  { %3939 = vmatprep.subr.bf16.mxu0 %v3938_v11  ;;  %v3990_v11 = vpack.c.bf16 %v1498_v4, %v1489_v2  ;;  %v3982_v16 = vpack.c.bf16 %v1604_v7, %v1595_v6  ;;  %v1475_v2 = vld [vmem:[%s7420_s2 + $0x38] sm:$0xff]  ;;  %v1484_v4 = vld [vmem:[%s7420_s2 + $0x80] sm:$0xff] }
  0xd3   :  { %3965 = vmatpush1.bf16.msra.mxu1 %v3964_v18  ;;  %v1473_v18 = vld [vmem:[%s7420_s2 + $0x28] sm:$0xff] }
  0xd4   :  { %3967 = vmatprep.subr.bf16.mxu1 %v3966_v21  ;;  %v3992_v21 = vpack.c.bf16 %v1497_v13, %v1488_v12 }
  0xd5   :  { %3941 = vmatpush1.bf16.msra.mxu0 %v3940_v19  ;;  %v1482_v19 = vld [vmem:[%s7420_s2 + $0x70] sm:$0xff] }
  0xd6   :  { %3943 = vmatprep.subr.bf16.mxu0 %v3942_v24  ;;  %v1515_v24 = vld [vmem:[%s7420_s2 + $0x178] sm:$0xff]  ;;  %v4018_v25 = vpack.c.bf16 %v1482_v19, %v1473_v18  ;;  %v1481_v18 = vld [vmem:[%s7420_s2 + $0x68] sm:$0xff]  ;;  %v1474_v19 = vld [vmem:[%s7420_s2 + $0x30] sm:$0xff] }
  0xd7   :  { %3969 = vmatpush1.bf16.msra.mxu1 %v3968_v30  ;;  %v3996_v27 = vpack.c.bf16 %v1515_v24, %v1506_v23  ;;  %v1533_v30 = vld [vmem:[%s7420_s2 + $0x208] sm:$0xff]  ;;  %v1502_v24 = vld [vmem:[%s7420_s2 + $0x110] sm:$0xff] }
  0xd8   :  { %3971 = vmatprep.subr.bf16.mxu1 %v3970_v33  ;;  %v4000_v32 = vpack.c.bf16 %v1533_v30, %v1524_v29  ;;  %v1493_v23 = vld [vmem:[%s7420_s2 + $0xc8] sm:$0xff]  ;;  %v1492_v30 = vld [vmem:[%s7420_s2 + $0xc0] sm:$0xff] }
  0xd9   :  { %3945 = vmatpush1.bf16.msra.mxu0 %v3944_v31  ;;  %v1552_v31 = vld [vmem:[%s7420_s2 + $0x2a0] sm:$0xff] }
  0xda   :  { %3947 = vmatprep.subr.bf16.mxu0 %v3946_v37  ;;  %v1561_v37 = vld [vmem:[%s7420_s2 + $0x2e8] sm:$0xff] }
  0xdb   :  { %3973 = vmatpush1.bf16.msra.mxu1 %v3972_v43  ;;  %v4006_v40 = vpack.c.bf16 %v1570_v38, %v1561_v37  ;;  %v1579_v43 = vld [vmem:[%s7420_s2 + $0x378] sm:$0xff]  ;;  %v1520_v37 = vld [vmem:[%s7420_s2 + $0x1a0] sm:$0xff] }
  0xdc   :  { %3975 = vmatprep.subr.bf16.mxu1 %v3974_v46  ;;  %v4008_v46 = vpack.c.bf16 %v1569_v42, %v1560_v41  ;;  %v1508_v41 = vld [vmem:[%s7420_s2 + $0x140] sm:$0xff]  ;;  %v1517_v42 = vld [vmem:[%s7420_s2 + $0x188] sm:$0xff] }
  0xdd   :  { %3949 = vmatpush1.bf16.msra.mxu0 %v3948_v44  ;;  %v1588_v44 = vld [vmem:[%s7420_s2 + $0x3c0] sm:$0xff] }
  0xde   :  { %3951 = vmatprep.subr.bf16.mxu0 %v3950_v50  ;;  %v4010_v48 = vpack.c.bf16 %v1588_v44, %v1579_v43  ;;  %v1578_v50 = vld [vmem:[%s7420_s2 + $0x370] sm:$0xff] }
  0xdf   :  { %3977 = vmatpush1.bf16.msra.mxu1 %v3976_v57 }
  0xe0   :  { %3979 = vmatprep.subr.bf16.mxu1 %v3978_v59 }
  0xe1   :  { %3953 = vmatpush1.bf16.msra.mxu0 %v3952_v58  ;;  %v4012_v58 = vpack.c.bf16 %v1587_v51, %v1578_v50  ;;  %v1536_v51 = vld [vmem:[%s7420_s2 + $0x220] sm:$0xff] }
  0xe2   :  { %3987 = vmatprep.subr.bf16.mxu0 %v3986_v62  ;;  %v1605_v62 = vld [vmem:[%s7420_s2 + $0x448] sm:$0xff] }
  0xe3   :  { %3981 = vmatpush1.bf16.msra.mxu1 %v3980_v8  ;;  %v4016_v7 = vpack.c.bf16 %v1605_v62, %v1596_v36 }
  0xe4   :  { %1430 = vmatmul.mubr.f32.vlgmr.msra.gmra.mrb[24].mxu0 %v5469_v1  ;;  %3983 = vmatprep.subr.bf16.mxu1 %v3982_v16  ;;  %v1525_v1 = vld [vmem:[%s7420_s2 + $0x1c8] sm:$0xff] }
  0xe5   :  { %3989 = vmatpush1.bf16.msra.mxu0 %v3988_v9  ;;  %1435 = vmatprep.mubr.f32.mxu0 %v4390_v3  ;;  %v3998_v28 = vpack.c.bf16 %v1534_v26, %v1525_v1  ;;  %v4050_v9 = vpack.c.bf16 %v1484_v4, %v1475_v2  ;;  %v4020_v1 = vpack.c.bf16 %v1481_v18, %v1472_v17  ;;  %v1537_v2 = vld [vmem:[%s7420_s2 + $0x228] sm:$0xff]  ;;  %v1544_v17 = vld [vmem:[%s7420_s2 + $0x260] sm:$0xff] }
  0xe6   :  { %3991 = vmatprep.subr.bf16.mxu0 %v3990_v11  ;;  %v1545_v4 = vld [vmem:[%s7420_s2 + $0x268] sm:$0xff] }
  0xe7   :  { %3985 = vmatpush1.bf16.msra.mxu1 %v3984_v20  ;;  %v1483_v20 = vld [vmem:[%s7420_s2 + $0x78] sm:$0xff]  ;;  %v1553_v18 = vld [vmem:[%s7420_s2 + $0x2a8] sm:$0xff] }
  0xe8   :  { %1436 = vmatmul.mubr.f32.gmra.mrb[26].mxu0 %v5500_v14  ;;  %4019 = vmatprep.subr.bf16.mxu1 %v4018_v25  ;;  %v1543_v14 = vld [vmem:[%s7420_s2 + $0x258] sm:$0xff]  ;;  %v4052_v26 = vpack.c.bf16 %v1483_v20, %v1474_v19 }
  0xe9   :  { %3993 = vmatpush1.bf16.msra.mxu0 %v3992_v21  ;;  %1753 = vmatprep.mubr.f32.mxu0 %v4390_v3  ;;  %v4002_v33 = vpack.c.bf16 %v1552_v31, %v1543_v14  ;;  %v1491_v21 = vld [vmem:[%s7420_s2 + $0xb8] sm:$0xff]  ;;  %v1501_v14 = vld [vmem:[%s7420_s2 + $0x108] sm:$0xff] }
  0xea   :  { %3995 = vmatprep.subr.bf16.mxu0 %v3994_v22  ;;  %v1500_v22 = vld [vmem:[%s7420_s2 + $0x100] sm:$0xff]  ;;  %v1509_v31 = vld [vmem:[%s7420_s2 + $0x148] sm:$0xff] }
  0xeb   :  { %v4026_v44 = vpack.c.bf16 %v1518_v34, %v1509_v31  ;;  %v1571_v31 = vld [vmem:[%s7420_s2 + $0x338] sm:$0xff] }
  0xed   :  { %3997 = vmatpush1.bf16.msra.mxu0 %v3996_v27  ;;  %v1490_v27 = vld [vmem:[%s7420_s2 + $0xb0] sm:$0xff] }
  0xee   :  { %3999 = vmatprep.subr.bf16.mxu0 %v3998_v28  ;;  %v1499_v28 = vld [vmem:[%s7420_s2 + $0xf8] sm:$0xff] }
  0xf1   :  { %4001 = vmatpush1.bf16.msra.mxu0 %v4000_v32  ;;  %v4022_v32 = vpack.c.bf16 %v1500_v22, %v1491_v21  ;;  %v1546_v22 = vld [vmem:[%s7420_s2 + $0x270] sm:$0xff] }
  0xf2   :  { %4003 = vmatprep.subr.bf16.mxu0 %v4002_v33  ;;  %v4054_v33 = vpack.c.bf16 %v1502_v24, %v1493_v23  ;;  %v1555_v23 = vld [vmem:[%s7420_s2 + $0x2b8] sm:$0xff] }
  0xf3   :  { %v1563_v24 = vld [vmem:[%s7420_s2 + $0x2f8] sm:$0xff] }
  0xf5   :  { %4005 = vmatpush1.bf16.msra.mxu0 %v4004_v39  ;;  %v4024_v39 = vpack.c.bf16 %v1499_v28, %v1490_v27  ;;  %v1574_v27 = vld [vmem:[%s7420_s2 + $0x350] sm:$0xff]  ;;  %v4036_v28 = vpack.c.bf16 %v1553_v18, %v1544_v17 }
  0xf6   :  { %4007 = vmatprep.subr.bf16.mxu0 %v4006_v40  ;;  %v4056_v40 = vpack.c.bf16 %v1501_v14, %v1492_v30  ;;  %v4068_v30 = vpack.c.bf16 %v1555_v23, %v1546_v22  ;;  %v1562_v14 = vld [vmem:[%s7420_s2 + $0x2f0] sm:$0xff]  ;;  %v1503_v22 = vld [vmem:[%s7420_s2 + $0x118] sm:$0xff] }
  0xf7   :  { %v507_v47 = vpop.f32.mrb[0].mxu0 }
  0xf8   :  { %v1452_v52 = vadd.f32 %v3274_v45, %v507_v47  ;;  %v5947_v54 = vpop.f32.mrb[1].mxu0  ;;  %v1519_v47 = vld [vmem:[%s7420_s2 + $0x198] sm:$0xff] }
  0xf9   :  { %7455 = vst [vmem:[#allocation3_spill] sm:$0xff] %v5947_v54  ;;  %4009 = vmatpush1.bf16.msra.mxu0 %v4008_v46  ;;  %v1510_v46 = vld [vmem:[%s7420_s2 + $0x150] sm:$0xff] }
  0xfa   :  { %v3275_v57 = vmul.f32 -1.442695, %v1452_v52  ;;  %4011 = vmatprep.subr.bf16.mxu0 %v4010_v48  ;;  %v1527_v48 = vld [vmem:[%s7420_s2 + $0x1d8] sm:$0xff] }
  0xfb   :  { %v513_v59 = vpop.f32.mrb[2].mxu0  ;;  %v4030_v36 = vpack.c.bf16 %v1536_v51, %v1527_v48 }
  0xfc   :  { %4275 = vpow2.f32 %v3275_v57  ;;  %v1453_v63 = vadd.f32 %v3274_v45, %v513_v59  ;;  %v5961_v0 = vpop.f32.mrb[3].mxu0  ;;  %v4058_v45 = vpack.c.bf16 %v1520_v37, %v1511_v35  ;;  %v4028_v57 = vpack.c.bf16 %v1517_v42, %v1508_v41  ;;  %v1526_v59 = vld [vmem:[%s7420_s2 + $0x1d0] sm:$0xff]  ;;  %v1564_v35 = vld [vmem:[%s7420_s2 + $0x300] sm:$0xff]  ;;  %v1573_v37 = vld [vmem:[%s7420_s2 + $0x348] sm:$0xff] }
  0xfd   :  { %7456 = vst [vmem:[#allocation4_spill] sm:$0xff] %v5961_v0  ;;  %4013 = vmatpush1.bf16.msra.mxu0 %v4012_v58  ;;  %v5969_v8 = vpop.f32.mrb[0].mxu1  ;;  %v4060_v58 = vpack.c.bf16 %v1519_v47, %v1510_v46  ;;  %v1583_v41 = vld [vmem:[%s7420_s2 + $0x398] sm:$0xff]  ;;  %v1592_v42 = vld [vmem:[%s7420_s2 + $0x3e0] sm:$0xff]  ;;  %v1589_v47 = vld [vmem:[%s7420_s2 + $0x3c8] sm:$0xff] }
  0xfe   :  { %v3276_v6 = vmul.f32 -1.442695, %v1453_v63  ;;  %4015 = vmatprep.subr.bf16.mxu0 %v4014_v60  ;;  %v5971_v49 = vpop.f32.mrb[1].mxu1  ;;  %v1535_v60 = vld [vmem:[%s7420_s2 + $0x218] sm:$0xff]  ;;  %v1580_v46 = vld [vmem:[%s7420_s2 + $0x380] sm:$0xff]  ;;  %v4074_v51 = vpack.c.bf16 %v1592_v42, %v1583_v41  ;;  %v2767_v0 = vld [vmem:[%s7422_s3 + $0x150] sm:$0xff] }
 0x100   :  { %4277 = vpow2.f32 %v3276_v6 }
 0x101   :  { %4017 = vmatpush1.bf16.msra.mxu0 %v4016_v7  ;;  %v5973_v10 = vpop.f32.mrb[2].mxu1  ;;  %v1554_v7 = vld [vmem:[%s7420_s2 + $0x2b0] sm:$0xff] }
 0x102   :  { %4051 = vmatprep.subr.bf16.mxu0 %v4050_v9  ;;  %v5975_v11 = vpop.f32.mrb[3].mxu1  ;;  %v1547_v9 = vld [vmem:[%s7420_s2 + $0x278] sm:$0xff]  ;;  %v4034_v20 = vpack.c.bf16 %v1554_v7, %v1545_v4 }
 0x103   :  { %v1607_v7 = vld [vmem:[%s7420_s2 + $0x458] sm:$0xff] }
 0x106   :  { %v4276_v12 = vpop.eup %4275 }
 0x107   :  { %v1460_v13 = vadd.f32 1.0, %v4276_v12  ;;  %v1556_v12 = vld [vmem:[%s7420_s2 + $0x2c0] sm:$0xff] }
 0x108   :  { %v4066_v21 = vpack.c.bf16 %v1556_v12, %v1547_v9  ;;  %v1600_v9 = vld [vmem:[%s7420_s2 + $0x420] sm:$0xff]  ;;  %v1609_v12 = vld [vmem:[%s7420_s2 + $0x468] sm:$0xff] }
 0x109   :  { %4279 = vrcp.f32 %v1460_v13  ;;  %v4080_v18 = vpack.c.bf16 %v1609_v12, %v1600_v9 }
 0x10a   :  { %v4278_v15 = vpop.eup %4277 }
 0x10b   :  { %v1461_v16 = vadd.f32 1.0, %v4278_v15  ;;  %v4032_v15 = vpack.c.bf16 %v1535_v60, %v1526_v59  ;;  %v1601_v59 = vld [vmem:[%s7420_s2 + $0x428] sm:$0xff]  ;;  %v1610_v60 = vld [vmem:[%s7420_s2 + $0x470] sm:$0xff] }
 0x10c   :  { %v4078_v4 = vpack.c.bf16 %v1610_v60, %v1601_v59  ;;  %v1602_v59 = vld [vmem:[%s7420_s2 + $0x430] sm:$0xff]  ;;  %v1611_v60 = vld [vmem:[%s7420_s2 + $0x478] sm:$0xff] }
 0x10d   :  { %4281 = vrcp.f32 %v1461_v16 }
 0x113   :  { %v4280_v25 = vpop.eup %4279 }
 0x114   :  { %v6007_v29 = vmul.f32 %v4280_v25, %v1452_v52  ;;  %v1529_v52 = vld [vmem:[%s7420_s2 + $0x1e8] sm:$0xff] }
 0x115   :  { %v4062_v62 = vpack.c.bf16 %v1538_v55, %v1529_v52  ;;  %v1582_v52 = vld [vmem:[%s7420_s2 + $0x390] sm:$0xff]  ;;  %v1591_v55 = vld [vmem:[%s7420_s2 + $0x3d8] sm:$0xff] }
 0x116   :  { %1677 = vmatmul.mubr.f32.vlgmr.msra.gmra.mrb[24].mxu1 %v6007_v29  ;;  %1754 = vmatmul.mubr.f32.vlgmr.msra.gmra.mrb[28].mxu0 %v6007_v29 }
 0x117   :  { %v4282_v38 = vpop.eup %4281  ;;  %4021 = vmatpush1.bf16.msra.mxu1 %v4020_v1  ;;  %4053 = vmatpush1.bf16.msra.mxu0 %v4052_v26  ;;  %v6048_v50 = vpop.f32.mrb[4].mxu0  ;;  %v1572_v1 = vld [vmem:[%s7420_s2 + $0x340] sm:$0xff]  ;;  %v1565_v26 = vld [vmem:[%s7420_s2 + $0x308] sm:$0xff] }
 0x118   :  { %v6035_v43 = vmul.f32 %v4282_v38, %v1453_v63  ;;  %1682 = vmatprep.mubr.f32.mxu1 %v4390_v3  ;;  %1759 = vmatprep.mubr.f32.mxu0 %v4390_v3  ;;  %v6059_v56 = vpop.f32.mrb[5].mxu0  ;;  %v1528_v63 = vld [vmem:[%s7420_s2 + $0x1e0] sm:$0xff]  ;;  %v4070_v34 = vpack.c.bf16 %v1574_v27, %v1565_v26  ;;  %v1581_v38 = vld [vmem:[%s7420_s2 + $0x388] sm:$0xff] }
 0x119   :  { %4023 = vmatprep.subr.bf16.mxu1 %v4022_v32  ;;  %4055 = vmatprep.subr.bf16.mxu0 %v4054_v33  ;;  %v4064_v16 = vpack.c.bf16 %v1537_v2, %v1528_v63  ;;  %v4038_v33 = vpack.c.bf16 %v1572_v1, %v1563_v24  ;;  %v1598_v63 = vld [vmem:[%s7420_s2 + $0x410] sm:$0xff]  ;;  %v1512_v24 = vld [vmem:[%s7420_s2 + $0x160] sm:$0xff]  ;;  %v1521_v1 = vld [vmem:[%s7420_s2 + $0x1a8] sm:$0xff] }
 0x11a   :  { %1683 = vmatmul.mubr.f32.gmra.mrb[26].mxu1 %v6035_v43  ;;  %1760 = vmatmul.mubr.f32.gmra.mrb[30].mxu0 %v6035_v43  ;;  %v4048_v17 = vpack.c.bf16 %v1607_v7, %v1598_v63  ;;  %v4090_v26 = vpack.c.bf16 %v1521_v1, %v1512_v24 }
 0x11b   :  { %4025 = vmatpush1.bf16.msra.mxu1 %v4024_v39  ;;  %4057 = vmatpush1.bf16.msra.mxu0 %v4056_v40  ;;  %v6078_v6 = vpop.f32.mrb[6].mxu0  ;;  %v1590_v40 = vld [vmem:[%s7420_s2 + $0x3d0] sm:$0xff] }
 0x11c   :  { %4027 = vmatprep.subr.bf16.mxu1 %v4026_v44  ;;  %4059 = vmatprep.subr.bf16.mxu0 %v4058_v45  ;;  %v6091_v13 = vpop.f32.mrb[7].mxu0  ;;  %v4040_v44 = vpack.c.bf16 %v1571_v31, %v1562_v14  ;;  %v4072_v45 = vpack.c.bf16 %v1573_v37, %v1564_v35  ;;  %v4042_v48 = vpack.c.bf16 %v1590_v40, %v1581_v38  ;;  %v1548_v35 = vld [vmem:[%s7420_s2 + $0x280] sm:$0xff]  ;;  %v1557_v37 = vld [vmem:[%s7420_s2 + $0x2c8] sm:$0xff] }
 0x11d   :  { %1830 = vmatprep.mubr.f32.mxu1 %v4390_v3  ;;  %1907 = vmatprep.mubr.f32.mxu0 %v4390_v3  ;;  %v6099_v19 = vpop.f32.mrb[4].mxu1 }
 0x11e   :  { %v6110_v25 = vpop.f32.mrb[5].mxu1 }
 0x11f   :  { %4029 = vmatpush1.bf16.msra.mxu1 %v4028_v57  ;;  %4061 = vmatpush1.bf16.msra.mxu0 %v4060_v58  ;;  %v1599_v57 = vld [vmem:[%s7420_s2 + $0x418] sm:$0xff]  ;;  %v1608_v58 = vld [vmem:[%s7420_s2 + $0x460] sm:$0xff] }
 0x120   :  { %4031 = vmatprep.subr.bf16.mxu1 %v4030_v36  ;;  %4063 = vmatprep.subr.bf16.mxu0 %v4062_v62  ;;  %v4044_v36 = vpack.c.bf16 %v1589_v47, %v1580_v46  ;;  %v4076_v62 = vpack.c.bf16 %v1591_v55, %v1582_v52  ;;  %v4046_v2 = vpack.c.bf16 %v1608_v58, %v1599_v57  ;;  %v1575_v46 = vld [vmem:[%s7420_s2 + $0x358] sm:$0xff]  ;;  %v1593_v52 = vld [vmem:[%s7420_s2 + $0x3e8] sm:$0xff] }
 0x121   :  { %v6127_v32 = vpop.f32.mrb[6].mxu1 }
 0x122   :  { %v6138_v39 = vpop.f32.mrb[7].mxu1 }
 0x123   :  { %4033 = vmatpush1.bf16.msra.mxu1 %v4032_v15  ;;  %4065 = vmatpush1.bf16.msra.mxu0 %v4064_v16  ;;  %v1476_v15 = vld [vmem:[%s7420_s2 + $0x40] sm:$0xff]  ;;  %v1485_v16 = vld [vmem:[%s7420_s2 + $0x88] sm:$0xff] }
 0x124   :  { %4035 = vmatprep.subr.bf16.mxu1 %v4034_v20  ;;  %4067 = vmatprep.subr.bf16.mxu0 %v4066_v21  ;;  %v4082_v20 = vpack.c.bf16 %v1485_v16, %v1476_v15  ;;  %v1494_v21 = vld [vmem:[%s7420_s2 + $0xd0] sm:$0xff] }
 0x125   :  { %v4086_v23 = vpack.c.bf16 %v1503_v22, %v1494_v21 }
 0x127   :  { %4037 = vmatpush1.bf16.msra.mxu1 %v4036_v28  ;;  %4069 = vmatpush1.bf16.msra.mxu0 %v4068_v30  ;;  %v1530_v28 = vld [vmem:[%s7420_s2 + $0x1f0] sm:$0xff]  ;;  %v1539_v30 = vld [vmem:[%s7420_s2 + $0x238] sm:$0xff] }
 0x128   :  { %4039 = vmatprep.subr.bf16.mxu1 %v4038_v33  ;;  %4071 = vmatprep.subr.bf16.mxu0 %v4070_v34 }
 0x12b   :  { %4041 = vmatpush1.bf16.msra.mxu1 %v4040_v44  ;;  %4073 = vmatpush1.bf16.msra.mxu0 %v4072_v45  ;;  %v1566_v45 = vld [vmem:[%s7420_s2 + $0x310] sm:$0xff] }
 0x12c   :  { %4043 = vmatprep.subr.bf16.mxu1 %v4042_v48  ;;  %4075 = vmatprep.subr.bf16.mxu0 %v4074_v51  ;;  %v1584_v51 = vld [vmem:[%s7420_s2 + $0x3a0] sm:$0xff] }
 0x12d   :  { %v4106_v57 = vpack.c.bf16 %v1593_v52, %v1584_v51  ;;  %v2729_v51 = vld [vmem:[%s7422_s3 + $0x20] sm:$0xff]  ;;  %v2730_v52 = vld [vmem:[%s7422_s3 + $0x28] sm:$0xff] }
 0x12f   :  { %4045 = vmatpush1.bf16.msra.mxu1 %v4044_v36  ;;  %4077 = vmatpush1.bf16.msra.mxu0 %v4076_v62  ;;  %v4110_v62 = vpack.c.bf16 %v1611_v60, %v1602_v59  ;;  %v2731_v60 = vld [vmem:[%s7422_s3 + $0x30] sm:$0xff] }
 0x130   :  { %4047 = vmatprep.subr.bf16.mxu1 %v4046_v2  ;;  %4079 = vmatprep.subr.bf16.mxu0 %v4078_v4  ;;  %v6257_v2 = vld [vmem:[%s7421_s5 + $0x3] ss:$4 sm:$0xff] }
 0x131   :  { %v2196_v7 = vrot.slane %v6257_v2, %v2026_v61 }
 0x133   :  { %4049 = vmatpush1.bf16.msra.mxu1 %v4048_v17  ;;  %4081 = vmatpush1.bf16.msra.mxu0 %v4080_v18 }
 0x134   :  { %4083 = vmatprep.subr.bf16.mxu1 %v4082_v20 }
 0x136   :  { %1831 = vmatmul.mubr.f32.vlgmr.msra.gmra.mrb[28].mxu1 %v6007_v29  ;;  %1908 = vmatmul.mubr.f32.vlgmr.msra.gmra.mrb[32].mxu0 %v6007_v29 }
 0x137   :  { %4085 = vmatpush3.bf16.msra.mxu1 %v4082_v20  ;;  %1836 = vmatprep.mubr.f32.mxu1 %v4390_v3  ;;  %v6207_v27 = vpop.f32.mrb[8].mxu0 }
 0x138   :  { %1913 = vmatprep.mubr.f32.mxu0 %v4390_v3  ;;  %4087 = vmatprep.subr.bf16.mxu1 %v4086_v23  ;;  %v817_v14 = vpop.f32.mrb[9].mxu0  ;;  %v4094_v3 = vpack.c.bf16 %v1539_v30, %v1530_v28  ;;  %v2741_v28 = vld [vmem:[%s7422_s3 + $0x80] sm:$0xff]  ;;  %v2742_v30 = vld [vmem:[%s7422_s3 + $0x88] sm:$0xff] }
 0x139   :  { %v2043_v31 = vadd.f32 %v5737_v5, %v817_v14  ;;  %v4114_v14 = vpack.c.bf16 %v2742_v30, %v2741_v28  ;;  %v2734_v28 = vld [vmem:[%s7422_s3 + $0x48] sm:$0xff] }
 0x13a   :  { %1837 = vmatmul.mubr.f32.gmra.mrb[30].mxu1 %v6035_v43  ;;  %1914 = vmatmul.mubr.f32.gmra.mrb[34].mxu0 %v6035_v43 }
 0x13b   :  { %4089 = vmatpush3.bf16.msra.mxu1 %v4086_v23  ;;  %3500 = vmatprep.mubr.f32.mxu1 %v6007_v29  ;;  %v2082_v33 = vmul.f32 1.442695, %v2043_v31  ;;  %v6219_v34 = vpop.f32.mrb[10].mxu0  ;;  %v4098_v29 = vpack.c.bf16 %v1557_v37, %v1548_v35  ;;  %vm2059_vm0 = vcmp.gt.f32.partialorder %v2043_v31, 20.0  ;;  %v2743_v35 = vld [vmem:[%s7422_s3 + $0x90] sm:$0xff]  ;;  %v2744_v37 = vld [vmem:[%s7422_s3 + $0x98] sm:$0xff] }
 0x13c   :  { %4091 = vmatprep.subr.bf16.mxu1 %v4090_v26  ;;  %v823_v38 = vpop.f32.mrb[11].mxu0  ;;  %4115 = vmatprep.subr.bf16.mxu0 %v4114_v14 }
 0x13d   :  { %4283 = vpow2.f32 %v2082_v33  ;;  %v2051_v40 = vadd.f32 %v5737_v5, %v823_v38  ;;  %v6228_v41 = vpop.f32.mrb[8].mxu1  ;;  %v4102_v5 = vpack.c.bf16 %v1575_v46, %v1566_v45  ;;  %v4118_v38 = vpack.c.bf16 %v2744_v37, %v2743_v35  ;;  %v2745_v45 = vld [vmem:[%s7422_s3 + $0xa0] sm:$0xff]  ;;  %v2746_v46 = vld [vmem:[%s7422_s3 + $0xa8] sm:$0xff] }
 0x13e   :  { %v6230_v44 = vpop.f32.mrb[9].mxu1 }
 0x13f   :  { %4093 = vmatpush3.bf16.msra.mxu1 %v4090_v26  ;;  %v2098_v42 = vmul.f32 1.442695, %v2051_v40  ;;  %vm2067_vm1 = vcmp.gt.f32.partialorder %v2051_v40, 20.0 }
 0x140   :  { %4095 = vmatprep.subr.bf16.mxu1 %v4094_v3 }
 0x141   :  { %4285 = vpow2.f32 %v2098_v42  ;;  %v6238_v47 = vpop.f32.mrb[10].mxu1 }
 0x142   :  { %v6240_v48 = vpop.f32.mrb[11].mxu1 }
 0x143   :  { %4097 = vmatpush3.bf16.msra.mxu1 %v4094_v3  ;;  %v2726_v3 = vld [vmem:[%s7422_s3 + $0x8] sm:$0xff] }
 0x144   :  { %4099 = vmatprep.subr.bf16.mxu1 %v4098_v29 }
 0x147   :  { %4101 = vmatpush3.bf16.msra.mxu1 %v4098_v29  ;;  %v4284_v55 = vpop.eup %4283  ;;  %v2728_v29 = vld [vmem:[%s7422_s3 + $0x18] sm:$0xff] }
 0x148   :  { %4103 = vmatprep.subr.bf16.mxu1 %v4102_v5  ;;  %v2107_v58 = vadd.f32 1.0, %v4284_v55  ;;  %v4124_v55 = vpack.c.bf16 %v2730_v52, %v2729_v51  ;;  %v2737_v52 = vld [vmem:[%s7422_s3 + $0x60] sm:$0xff] }
 0x14a   :  { %4287 = vlog2.f32 %v2107_v58  ;;  %v2748_v58 = vld [vmem:[%s7422_s3 + $0xb8] sm:$0xff] }
 0x14b   :  { %4105 = vmatpush3.bf16.msra.mxu1 %v4102_v5  ;;  %v4286_v36 = vpop.eup %4285  ;;  %v4122_v5 = vpack.c.bf16 %v2746_v46, %v2745_v45  ;;  %v2753_v45 = vld [vmem:[%s7422_s3 + $0xe0] sm:$0xff]  ;;  %v2754_v46 = vld [vmem:[%s7422_s3 + $0xe8] sm:$0xff] }
 0x14c   :  { %4107 = vmatprep.subr.bf16.mxu1 %v4106_v57  ;;  %v2115_v63 = vadd.f32 1.0, %v4286_v36  ;;  %v2732_v36 = vld [vmem:[%s7422_s3 + $0x38] sm:$0xff]  ;;  %v4138_v51 = vpack.c.bf16 %v2754_v46, %v2753_v45 }
 0x14e   :  { %4289 = vlog2.f32 %v2115_v63  ;;  %v4128_v63 = vpack.c.bf16 %v2732_v36, %v2731_v60  ;;  %v2756_v60 = vld [vmem:[%s7422_s3 + $0xf8] sm:$0xff] }
 0x14f   :  { %4109 = vmatpush3.bf16.msra.mxu1 %v4106_v57  ;;  %v2747_v57 = vld [vmem:[%s7422_s3 + $0xb0] sm:$0xff] }
 0x150   :  { %4111 = vmatprep.subr.bf16.mxu1 %v4110_v62  ;;  %v4126_v59 = vpack.c.bf16 %v2748_v58, %v2747_v57 }
 0x153   :  { %4113 = vmatpush3.bf16.msra.mxu1 %v4110_v62 }
 0x154   :  { %v4288_v4 = vpop.eup %4287 }
 0x155   :  { %v2131_v9 = vmul.f32 0.6931472, %v4288_v4 }
 0x156   :  { %3501 = vmatmul.mubr.f32.vlgmr.msra.gmra.mrb[32].mxu1 %v6035_v43 }
 0x157   :  { %v6263_v12 = vpop.f32.mrb[12].mxu0  ;;  %v6265_v15 = vsel %vm2059_vm0, %v2043_v31, %v2131_v9  ;;  %v2725_v31 = vld [vmem:[%s7422_s3] sm:$0xff]  ;;  %v2750_v9 = vld [vmem:[%s7422_s3 + $0xc8] sm:$0xff] }
 0x158   :  { %7457 = vst [vmem:[#allocation5_spill] sm:$0xff] %v6265_v15  ;;  %v4290_v16 = vpop.eup %4289  ;;  %v6267_v17 = vpop.f32.mrb[13].mxu0  ;;  %v6270_v18 = vmul.f32 %v2196_v7, %v6265_v15  ;;  %v4116_v33 = vpack.c.bf16 %v2726_v3, %v2725_v31  ;;  %v2751_v3 = vld [vmem:[%s7422_s3 + $0xd0] sm:$0xff] }
 0x159   :  { %v2147_v20 = vmul.f32 0.6931472, %v4290_v16 }
 0x15a   :  { %4117 = vmatpush3.bf16.msra.mxu0 %v4116_v33  ;;  %v2752_v33 = vld [vmem:[%s7422_s3 + $0xd8] sm:$0xff] }
 0x15b   :  { %v6272_v21 = vpop.f32.mrb[14].mxu0  ;;  %v6274_v22 = vsel %vm2067_vm1, %v2051_v40, %v2147_v20  ;;  %v2727_v40 = vld [vmem:[%s7422_s3 + $0x10] sm:$0xff]  ;;  %4119 = vmatprep.subr.bf16.mxu0 %v4118_v38  ;;  %v2733_v20 = vld [vmem:[%s7422_s3 + $0x40] sm:$0xff]  ;;  %v4134_v37 = vpack.c.bf16 %v2752_v33, %v2751_v3 }
 0x15c   :  { %7458 = vst [vmem:[#allocation6_spill] sm:$0xff] %v6274_v22  ;;  %v6276_v61 = vpop.f32.mrb[15].mxu0  ;;  %v6279_v43 = vmul.f32 %v2196_v7, %v6274_v22  ;;  %v4120_v42 = vpack.c.bf16 %v2728_v29, %v2727_v40  ;;  %v2749_v7 = vld [vmem:[%s7422_s3 + $0xc0] sm:$0xff]  ;;  %v4132_v14 = vpack.c.bf16 %v2734_v28, %v2733_v20  ;;  %v2735_v38 = vld [vmem:[%s7422_s3 + $0x50] sm:$0xff]  ;;  %v2736_v40 = vld [vmem:[%s7422_s3 + $0x58] sm:$0xff] }
 0x15d   :  { %7459 = vst [vmem:[#allocation7_spill] sm:$0xff] %v6276_v61  ;;  %v6281_v23 = vpop.f32.mrb[12].mxu1  ;;  %v4130_v16 = vpack.c.bf16 %v2750_v9, %v2749_v7  ;;  %v2740_v7 = vld [vmem:[%s7422_s3 + $0x78] sm:$0xff]  ;;  %v2773_v28 = vld [vmem:[%s7422_s3 + $0x180] sm:$0xff] }
 0x15e   :  { %7460 = vst [vmem:[#allocation8_spill] sm:$0xff] %v6279_v43  ;;  %v6283_v24 = vpop.f32.mrb[13].mxu1  ;;  %4121 = vmatpush3.bf16.msra.mxu0 %v4120_v42  ;;  %v4136_v42 = vpack.c.bf16 %v2736_v40, %v2735_v38  ;;  %v2805_v3 = vld [vmem:[%s7422_s3 + $0x280] sm:$0xff]  ;;  %v2758_v40 = vld [vmem:[%s7422_s3 + $0x108] sm:$0xff] }
 0x15f   :  { %4123 = vmatprep.subr.bf16.mxu0 %v4122_v5  ;;  %v2757_v38 = vld [vmem:[%s7422_s3 + $0x100] sm:$0xff] }
 0x160   :  { %v4148_v45 = vpack.c.bf16 %v2758_v40, %v2757_v38  ;;  %v2761_v40 = vld [vmem:[%s7422_s3 + $0x120] sm:$0xff] }
 0x161   :  { %v6285_v1 = vpop.f32.mrb[14].mxu1 }
 0x162   :  { %7461 = vst [vmem:[#allocation9_spill] sm:$0xff] %v6285_v1  ;;  %v6287_v26 = vpop.f32.mrb[15].mxu1  ;;  %4125 = vmatpush3.bf16.msra.mxu0 %v4124_v55  ;;  %v2738_v55 = vld [vmem:[%s7422_s3 + $0x68] sm:$0xff] }
 0x163   :  { %7462 = vst [vmem:[#allocation10_spill] sm:$0xff] %v6287_v26  ;;  %4127 = vmatprep.subr.bf16.mxu0 %v4126_v59  ;;  %v4140_v58 = vpack.c.bf16 %v2738_v55, %v2737_v52  ;;  %v2755_v59 = vld [vmem:[%s7422_s3 + $0xf0] sm:$0xff]  ;;  %v2776_v55 = vld [vmem:[%s7422_s3 + $0x198] sm:$0xff] }
 0x164   :  { %v4142_v36 = vpack.c.bf16 %v2756_v60, %v2755_v59  ;;  %v2775_v52 = vld [vmem:[%s7422_s3 + $0x190] sm:$0xff] }
 0x165   :  { %v4150_v59 = vpack.c.bf16 %v2776_v55, %v2775_v52  ;;  %v2759_v60 = vld [vmem:[%s7422_s3 + $0x110] sm:$0xff]  ;;  %v7427_v52 = vsub.s32 2, %v5702_v53 }
 0x166   :  { %4129 = vmatpush3.bf16.msra.mxu0 %v4128_v63  ;;  %v2739_v63 = vld [vmem:[%s7422_s3 + $0x70] sm:$0xff] }
 0x167   :  { %4131 = vmatprep.subr.bf16.mxu0 %v4130_v16  ;;  %v4144_v9 = vpack.c.bf16 %v2740_v7, %v2739_v63  ;;  %v7426_v63 = vsub.s32 1, %v5702_v53 }
 0x16a   :  { %4133 = vmatpush3.bf16.msra.mxu0 %v4132_v14  ;;  %v2774_v14 = vld [vmem:[%s7422_s3 + $0x188] sm:$0xff] }
 0x16b   :  { %4135 = vmatprep.subr.bf16.mxu0 %v4134_v37  ;;  %v4146_v33 = vpack.c.bf16 %v2774_v14, %v2773_v28  ;;  %v2806_v37 = vld [vmem:[%s7422_s3 + $0x288] sm:$0xff]  ;;  %v2777_v14 = vld [vmem:[%s7422_s3 + $0x1a0] sm:$0xff] }
 0x16d   :  { %4147 = vmatprep.subr.bf16.mxu1 %v4146_v33  ;;  %v6454_v33 = vld [vmem:[%s7421_s5 + $0x2] ss:$4 sm:$0xff] }
 0x16e   :  { %4137 = vmatpush3.bf16.msra.mxu0 %v4136_v42  ;;  %v4178_v42 = vpack.c.bf16 %v2806_v37, %v2805_v3  ;;  %4149 = vmatpush3.bf16.msra.mxu1 %v4148_v45  ;;  %v2778_v3 = vld [vmem:[%s7422_s3 + $0x1a8] sm:$0xff]  ;;  %v2003_v45 = vrot.slane %v6454_v33, %v7426_v63  ;;  %v2765_v63 = vld [vmem:[%s7422_s3 + $0x140] sm:$0xff] }
 0x16f   :  { %4139 = vmatprep.subr.bf16.mxu0 %v4138_v51  ;;  %4151 = vmatprep.subr.bf16.mxu1 %v4150_v59  ;;  %v4154_v38 = vpack.c.bf16 %v2778_v3, %v2777_v14 }
 0x172   :  { %4141 = vmatpush3.bf16.msra.mxu0 %v4140_v58  ;;  %v7425_v58 = vsub.s32 0, %v5702_v53 }
 0x173   :  { %4143 = vmatprep.subr.bf16.mxu0 %v4142_v36  ;;  %v2760_v36 = vld [vmem:[%s7422_s3 + $0x118] sm:$0xff] }
 0x174   :  { %v1999_v37 = vrot.slane %v6454_v33, %v7425_v58 }
 0x176   :  { %4145 = vmatpush3.bf16.msra.mxu0 %v4144_v9  ;;  %v4152_v9 = vpack.c.bf16 %v2760_v36, %v2759_v60  ;;  %v2779_v36 = vld [vmem:[%s7422_s3 + $0x1b0] sm:$0xff]  ;;  %v6480_v14 = vadd.f32 %v1999_v37, %v5969_v8  ;;  %v2781_v8 = vld [vmem:[%s7422_s3 + $0x1c0] sm:$0xff] }
 0x177   :  { %v6337_v62 = vpop.f32.mrb[16].mxu0  ;;  %4179 = vmatprep.subr.bf16.mxu0 %v4178_v42  ;;  %v2762_v42 = vld [vmem:[%s7422_s3 + $0x128] sm:$0xff] }
 0x178   :  { %v6339_v4 = vpop.f32.mrb[17].mxu0  ;;  %4153 = vmatpush3.bf16.msra.mxu1 %v4152_v9  ;;  %v4156_v59 = vpack.c.bf16 %v2762_v42, %v2761_v40  ;;  %v2780_v9 = vld [vmem:[%s7422_s3 + $0x1b8] sm:$0xff]  ;;  %v2763_v40 = vld [vmem:[%s7422_s3 + $0x130] sm:$0xff]  ;;  %v6489_v42 = vadd.f32 %v2003_v45, %v5971_v49  ;;  %vm2052_vm2 = vcmp.gt.f32.partialorder %v6480_v14, 20.0 }
 0x179   :  { %7463 = vst [vmem:[#allocation11_spill] sm:$0xff] %v6339_v4  ;;  %4155 = vmatprep.subr.bf16.mxu1 %v4154_v38  ;;  %v4158_v3 = vpack.c.bf16 %v2780_v9, %v2779_v36  ;;  %v2764_v38 = vld [vmem:[%s7422_s3 + $0x138] sm:$0xff]  ;;  %v2782_v36 = vld [vmem:[%s7422_s3 + $0x1c8] sm:$0xff]  ;;  %v2068_v9 = vmul.f32 1.442695, %v6480_v14 }
 0x17a   :  { %v4160_v58 = vpack.c.bf16 %v2764_v38, %v2763_v40  ;;  %v4162_v49 = vpack.c.bf16 %v2782_v36, %v2781_v8  ;;  %v2783_v8 = vld [vmem:[%s7422_s3 + $0x1d0] sm:$0xff]  ;;  %v2784_v36 = vld [vmem:[%s7422_s3 + $0x1d8] sm:$0xff]  ;;  %vm2053_vm3 = vcmp.gt.f32.partialorder %v6489_v42, 20.0 }
 0x17b   :  { %v6353_v30 = vpop.f32.mrb[18].mxu0  ;;  %4291 = vpow2.f32 %v2068_v9  ;;  %v2785_v9 = vld [vmem:[%s7422_s3 + $0x1e0] sm:$0xff] }
 0x17c   :  { %7464 = vst [vmem:[#allocation12_spill] sm:$0xff] %v6353_v30  ;;  %v6355_v31 = vpop.f32.mrb[19].mxu0  ;;  %4157 = vmatpush3.bf16.msra.mxu1 %v4156_v59  ;;  %v6494_v59 = vrot.slane %v6454_v33, %v7427_v52  ;;  %v4166_v52 = vpack.c.bf16 %v2784_v36, %v2783_v8 }
 0x17d   :  { %7465 = vst [vmem:[#allocation13_spill] sm:$0xff] %v6355_v31  ;;  %v6363_v35 = vpop.f32.mrb[16].mxu1  ;;  %4159 = vmatprep.subr.bf16.mxu1 %v4158_v3  ;;  %v2766_v3 = vld [vmem:[%s7422_s3 + $0x148] sm:$0xff] }
 0x17e   :  { %v6371_v29 = vpop.f32.mrb[17].mxu1  ;;  %v6512_v40 = vadd.f32 %v6494_v59, %v6048_v50  ;;  %v4164_v38 = vpack.c.bf16 %v2766_v3, %v2765_v63  ;;  %v2768_v50 = vld [vmem:[%s7422_s3 + $0x158] sm:$0xff]  ;;  %v7429_v3 = vsub.s32 3, %v5702_v53  ;;  %v6593_v15 = vadd.f32 %v6494_v59, %v6078_v6 }
 0x180   :  { %4161 = vmatpush3.bf16.msra.mxu1 %v4160_v58  ;;  %v2070_v58 = vmul.f32 1.442695, %v6489_v42  ;;  %v2072_v63 = vmul.f32 1.442695, %v6512_v40  ;;  %v2088_v6 = vmul.f32 1.442695, %v6593_v15 }
 0x181   :  { %v6379_v5 = vpop.f32.mrb[18].mxu1  ;;  %4163 = vmatprep.subr.bf16.mxu1 %v4162_v49  ;;  %v4168_v49 = vpack.c.bf16 %v2768_v50, %v2767_v0  ;;  %v2770_v0 = vld [vmem:[%s7422_s3 + $0x168] sm:$0xff]  ;;  %v6542_v50 = vadd.f32 %v1999_v37, %v5973_v10  ;;  %v2771_v10 = vld [vmem:[%s7422_s3 + $0x170] sm:$0xff]  ;;  %v2772_v37 = vld [vmem:[%s7422_s3 + $0x178] sm:$0xff]  ;;  %vm2054_vm4 = vcmp.gt.f32.partialorder %v6512_v40, 20.0  ;;  %vm2062_vm9 = vcmp.gt.f32.partialorder %v6593_v15, 20.0 }
 0x182   :  { %v6387_v57 = vpop.f32.mrb[19].mxu1  ;;  %4293 = vpow2.f32 %v2070_v58  ;;  %v2769_v58 = vld [vmem:[%s7422_s3 + $0x160] sm:$0xff] }
 0x183   :  { %4295 = vpow2.f32 %v2072_v63  ;;  %v4172_v36 = vpack.c.bf16 %v2770_v0, %v2769_v58  ;;  %v2788_v63 = vld [vmem:[%s7422_s3 + $0x1f8] sm:$0xff]  ;;  %vm2060_vm5 = vcmp.gt.f32.partialorder %v6542_v50, 20.0 }
 0x184   :  { %4165 = vmatpush3.bf16.msra.mxu1 %v4164_v38  ;;  %v2786_v38 = vld [vmem:[%s7422_s3 + $0x1e8] sm:$0xff] }
 0x185   :  { %4167 = vmatprep.subr.bf16.mxu1 %v4166_v52  ;;  %v4170_v8 = vpack.c.bf16 %v2786_v38, %v2785_v9  ;;  %v7431_v52 = vsub.s32 4, %v5702_v53  ;;  %v2787_v9 = vld [vmem:[%s7422_s3 + $0x1f0] sm:$0xff]  ;;  %v6554_v38 = vadd.f32 %v2003_v45, %v5975_v11  ;;  %v2084_v11 = vmul.f32 1.442695, %v6542_v50 }
 0x186   :  { %v4174_v58 = vpack.c.bf16 %v2788_v63, %v2787_v9 }
 0x187   :  { %4297 = vpow2.f32 %v2084_v11  ;;  %vm2061_vm6 = vcmp.gt.f32.partialorder %v6554_v38, 20.0 }
 0x188   :  { %4169 = vmatpush3.bf16.msra.mxu1 %v4168_v49  ;;  %v2011_v49 = vrot.slane %v6454_v33, %v7429_v3  ;;  %v4292_v3 = vpop.eup %4291 }
 0x189   :  { %4171 = vmatprep.subr.bf16.mxu1 %v4170_v8  ;;  %v2015_v8 = vrot.slane %v6454_v33, %v7431_v52  ;;  %v2086_v52 = vmul.f32 1.442695, %v6554_v38 }
 0x18a   :  { %v6570_v63 = vadd.f32 %v2011_v49, %v6059_v56  ;;  %v7471_v56 = vsub.s32 5, %v5702_v53 }
 0x18b   :  { %v6583_v0 = vadd.f32 %v2015_v8, %v6099_v19  ;;  %4299 = vpow2.f32 %v2086_v52 }
 0x18c   :  { %4173 = vmatpush3.bf16.msra.mxu1 %v4172_v36  ;;  %v4176_v36 = vpack.c.bf16 %v2772_v37, %v2771_v10  ;;  %v4294_v9 = vpop.eup %4293  ;;  %v2837_v10 = vld [vmem:[%s7422_s3 + $0x380] sm:$0xff]  ;;  %v2838_v37 = vld [vmem:[%s7422_s3 + $0x388] sm:$0xff]  ;;  %v2019_v54 = vrot.slane %v6454_v33, %v7471_v56  ;;  %vm2055_vm7 = vcmp.gt.f32.partialorder %v6570_v63, 20.0 }
 0x18d   :  { %4175 = vmatprep.subr.bf16.mxu1 %v4174_v58  ;;  %v2100_v58 = vadd.f32 1.0, %v4292_v3  ;;  %v4296_v31 = vpop.eup %4295  ;;  %v7473_v3 = vsub.s32 6, %v5702_v53  ;;  %vm2056_vm8 = vcmp.gt.f32.partialorder %v6583_v0, 20.0 }
 0x18e   :  { %v6602_v11 = vadd.f32 %v2019_v54, %v6110_v25 }
 0x18f   :  { %v2023_v19 = vrot.slane %v6454_v33, %v7473_v3  ;;  %4301 = vlog2.f32 %v2100_v58  ;;  %v6609_v33 = vadd.f32 %v2011_v49, %v6091_v13 }
 0x190   :  { %4177 = vmatpush3.bf16.msra.mxu1 %v4176_v36  ;;  %v2101_v36 = vadd.f32 1.0, %v4294_v9  ;;  %v2076_v9 = vmul.f32 1.442695, %v6583_v0  ;;  %vm2057_vm10 = vcmp.gt.f32.partialorder %v6602_v11, 20.0 }
 0x191   :  { %v6606_v59 = vadd.f32 %v2023_v19, %v6207_v27  ;;  %v4298_v52 = vpop.eup %4297  ;;  %v6618_v27 = vadd.f32 %v2015_v8, %v6127_v32  ;;  %v7475_v8 = vsub.s32 1, %v5702_v53  ;;  %vm2063_vm11 = vcmp.gt.f32.partialorder %v6609_v33, 20.0 }
 0x192   :  { %4303 = vlog2.f32 %v2101_v36  ;;  %v2108_v49 = vadd.f32 1.0, %v4298_v52  ;;  %v7476_v52 = vsub.s32 0, %v5702_v53 }
 0x193   :  { %v2080_v25 = vmul.f32 1.442695, %v6606_v59  ;;  %vm2058_vm12 = vcmp.gt.f32.partialorder %v6606_v59, 20.0  ;;  %vm2064_vm14 = vcmp.gt.f32.partialorder %v6618_v27, 20.0 }
 0x197   :  { %v6401_v16 = vpop.f32.mrb[20].mxu0 }
 0x198   :  { %v6403_v20 = vpop.f32.mrb[21].mxu0 }
 0x19b   :  { %v6423_v46 = vpop.f32.mrb[22].mxu0 }
 0x19c   :  { %v6425_v51 = vpop.f32.mrb[23].mxu0 }
 0x19d   :  { %7466 = vst [vmem:[#allocation14_spill] sm:$0xff] %v6425_v51  ;;  %v6441_v7 = vpop.f32.mrb[20].mxu1 }
 0x19e   :  { %v6443_v28 = vpop.f32.mrb[21].mxu1 }
 0x1a1   :  { %v6469_v55 = vpop.f32.mrb[22].mxu1 }
 0x1a2   :  { %7467 = vst [vmem:[#allocation15_spill] sm:$0xff] %v6469_v55  ;;  %v6471_v60 = vpop.f32.mrb[23].mxu1  ;;  %v2074_v55 = vmul.f32 1.442695, %v6570_v63 }
 0x1a3   :  { %7468 = vst [vmem:[#allocation16_spill] sm:$0xff] %v6471_v60 }
 0x1a4   :  { %4305 = vpow2.f32 %v2074_v55  ;;  %v6615_v55 = vadd.f32 %v2019_v54, %v6138_v39 }
 0x1a5   :  { %4307 = vpow2.f32 %v2076_v9  ;;  %v2092_v9 = vmul.f32 1.442695, %v6618_v27 }
 0x1a6   :  { %v2094_v56 = vmul.f32 1.442695, %v6615_v55  ;;  %vm2065_vm13 = vcmp.gt.f32.partialorder %v6615_v55, 20.0 }
 0x1b7   :  { %v6567_v45 = vpop.f32.mrb[24].mxu0 }
 0x1b8   :  { %7469 = vst [vmem:[#allocation17_spill] sm:$0xff] %v6567_v45  ;;  %v6573_v43 = vpop.f32.mrb[25].mxu0 }
 0x1b9   :  { %7470 = vst [vmem:[#allocation18_spill] sm:$0xff] %v6573_v43  ;;  %v4210_v43 = vpack.c.bf16 %v2838_v37, %v2837_v10  ;;  %v2102_v10 = vadd.f32 1.0, %v4296_v31  ;;  %v2090_v31 = vmul.f32 1.442695, %v6609_v33  ;;  %v4300_v37 = vpop.eup %4299 }
 0x1ba   :  { %v4302_v13 = vpop.eup %4301  ;;  %v2109_v3 = vadd.f32 1.0, %v4300_v37 }
 0x1bb   :  { %v6588_v4 = vpop.f32.mrb[26].mxu0  ;;  %4211 = vmatprep.subr.bf16.mxu1 %v4210_v43  ;;  %v2078_v43 = vmul.f32 1.442695, %v6602_v11  ;;  %4309 = vlog2.f32 %v2102_v10  ;;  %v4304_v58 = vpop.eup %4303 }
 0x1bc   :  { %7472 = vst [vmem:[#allocation19_spill] sm:$0xff] %v6588_v4  ;;  %v6598_v22 = vpop.f32.mrb[27].mxu0  ;;  %4311 = vpow2.f32 %v2088_v6  ;;  %v4306_v36 = vpop.eup %4305  ;;  %v2117_v6 = vmul.f32 0.6931472, %v4302_v13 }
 0x1bd   :  { %7474 = vst [vmem:[#allocation20_spill] sm:$0xff] %v6598_v22  ;;  %4313 = vpow2.f32 %v2078_v43  ;;  %v4308_v10 = vpop.eup %4307  ;;  %v2103_v39 = vadd.f32 1.0, %v4306_v36  ;;  %v2119_v43 = vmul.f32 0.6931472, %v4304_v58 }
 0x1be   :  { %4315 = vpow2.f32 %v2080_v25  ;;  %v6627_v25 = vrot.slane %v6257_v2, %v7475_v8  ;;  %v2104_v13 = vadd.f32 1.0, %v4308_v10  ;;  %v6636_v58 = vsel %vm2052_vm2, %v6480_v14, %v2117_v6 }
 0x1bf   :  { %4317 = vpow2.f32 %v2090_v31  ;;  %v2168_v31 = vrot.slane %v6257_v2, %v7476_v52  ;;  %v7477_v10 = vsub.s32 2, %v5702_v53 }
 0x1c0   :  { %4319 = vlog2.f32 %v2108_v49  ;;  %v6633_v49 = vadd.f32 %v2023_v19, %v6219_v34 }
 0x1c1   :  { %4321 = vpow2.f32 %v2094_v56  ;;  %v2205_v52 = vmul.f32 %v2168_v31, %v6636_v58  ;;  %v6646_v34 = vrot.slane %v6257_v2, %v7477_v10 }
 0x1c2   :  { %4323 = vlog2.f32 %v2109_v3  ;;  %v6639_v3 = vsel %vm2053_vm3, %v6489_v42, %v2119_v43  ;;  %v2096_v14 = vmul.f32 1.442695, %v6633_v49  ;;  %vm2066_vm15 = vcmp.gt.f32.partialorder %v6633_v49, 20.0 }
 0x1c3   :  { %4325 = vpow2.f32 %v2092_v9  ;;  %v2206_v19 = vmul.f32 %v6627_v25, %v6639_v3 }
 0x1c4   :  { %4327 = vlog2.f32 %v2103_v39 }
 0x1c5   :  { %v4310_v54 = vpop.eup %4309  ;;  %4329 = vlog2.f32 %v2104_v13  ;;  %v2223_v4 = vmul.f32 1.442695, %v2206_v19 }
 0x1c6   :  { %v4312_v32 = vpop.eup %4311  ;;  %v2121_v56 = vmul.f32 0.6931472, %v4310_v54 }
 0x1c7   :  { %v4314_v37 = vpop.eup %4313  ;;  %v2110_v36 = vadd.f32 1.0, %v4312_v32  ;;  %v2221_v32 = vmul.f32 1.442695, %v2205_v52 }
 0x1c8   :  { %v4316_v9 = vpop.eup %4315  ;;  %v2105_v22 = vadd.f32 1.0, %v4314_v37  ;;  %v6652_v42 = vsel %vm2054_vm4, %v6512_v40, %v2121_v56 }
 0x1c9   :  { %v4318_v8 = vpop.eup %4317  ;;  %v2106_v6 = vadd.f32 1.0, %v4316_v9  ;;  %4331 = vlog2.f32 %v2110_v36  ;;  %v2207_v37 = vmul.f32 %v6646_v34, %v6652_v42 }
 0x1ca   :  { %v4320_v54 = vpop.eup %4319  ;;  %v2111_v39 = vadd.f32 1.0, %v4318_v8  ;;  %4333 = vlog2.f32 %v2105_v22 }
 0x1cb   :  { %v4322_v43 = vpop.eup %4321  ;;  %4335 = vpow2.f32 %v2096_v14  ;;  %v2225_v13 = vmul.f32 1.442695, %v2207_v37  ;;  %v2133_v36 = vmul.f32 0.6931472, %v4320_v54 }
 0x1cc   :  { %v4324_v10 = vpop.eup %4323  ;;  %4337 = vlog2.f32 %v2106_v6  ;;  %v2113_v51 = vadd.f32 1.0, %v4322_v43 }
 0x1cd   :  { %v4326_v60 = vpop.eup %4325  ;;  %4339 = vlog2.f32 %v2111_v39  ;;  %v2135_v9 = vmul.f32 0.6931472, %v4324_v10  ;;  %v6660_v14 = vsel %vm2060_vm5, %v6542_v50, %v2133_v36 }
 0x1ce   :  { %v4328_v40 = vpop.eup %4327  ;;  %4341 = vpow2.f32 %v2221_v32  ;;  %v2112_v56 = vadd.f32 1.0, %v4326_v60  ;;  %v7478_v60 = vsub.s32 3, %v5702_v53  ;;  %v2213_v50 = vmul.f32 %v2168_v31, %v6660_v14 }
 0x1cf   :  { %4343 = vpow2.f32 %v2223_v4  ;;  %v4330_v8 = vpop.eup %4329  ;;  %v2123_v22 = vmul.f32 0.6931472, %v4328_v40  ;;  %v2157_v4 = vsel %vm2061_vm6, %v6554_v38, %v2135_v9  ;;  %v7479_v40 = vsub.s32 5, %v5702_v53 }
 0x1d0   :  { %4345 = vlog2.f32 %v2113_v51  ;;  %v6666_v6 = vrot.slane %v6257_v2, %v7478_v60  ;;  %v2125_v54 = vmul.f32 0.6931472, %v4330_v8  ;;  %v2214_v38 = vmul.f32 %v6627_v25, %v2157_v4 }
 0x1d1   :  { %4347 = vpow2.f32 %v2225_v13  ;;  %v6669_v51 = vsel %vm2055_vm7, %v6570_v63, %v2123_v22  ;;  %v6678_v13 = vrot.slane %v6257_v2, %v7479_v40  ;;  %v7481_v9 = vsub.s32 6, %v5702_v53 }
 0x1d2   :  { %4349 = vlog2.f32 %v2112_v56  ;;  %v7480_v56 = vsub.s32 4, %v5702_v53  ;;  %v2208_v31 = vmul.f32 %v6666_v6, %v6669_v51  ;;  %v6691_v25 = vsel %vm2056_vm8, %v6583_v0, %v2125_v54 }
 0x1d3   :  { %v4332_v52 = vpop.eup %4331  ;;  %v6696_v8 = vrot.slane %v6257_v2, %v7481_v9  ;;  %v6702_v40 = vmul.f32 1.442695, %v2213_v50  ;;  %v6709_v9 = vmul.f32 1.442695, %v2214_v38 }
 0x1d4   :  { %v4334_v19 = vpop.eup %4333  ;;  %v2137_v43 = vmul.f32 0.6931472, %v4332_v52  ;;  %v6683_v63 = vrot.slane %v6257_v2, %v7480_v56  ;;  %v2227_v38 = vmul.f32 1.442695, %v2208_v31 }
 0x1d5   :  { %v4336_v39 = vpop.eup %4335  ;;  %v2127_v10 = vmul.f32 0.6931472, %v4334_v19 }
 0x1d6   :  { %v4338_v32 = vpop.eup %4337  ;;  %v2114_v52 = vadd.f32 1.0, %v4336_v39  ;;  %v2158_v19 = vsel %vm2062_vm9, %v6593_v15, %v2137_v43  ;;  %v2209_v39 = vmul.f32 %v6683_v63, %v6691_v25 }
 0x1d7   :  { %v4340_v37 = vpop.eup %4339  ;;  %v2129_v60 = vmul.f32 0.6931472, %v4338_v32  ;;  %v6714_v15 = vsel %vm2057_vm10, %v6602_v11, %v2127_v10  ;;  %v2215_v30 = vmul.f32 %v6646_v34, %v2158_v19 }
 0x1d8   :  { %v6685_v36 = vpop.eup %4341  ;;  %v2139_v56 = vmul.f32 0.6931472, %v4340_v37  ;;  %4351 = vlog2.f32 %v2114_v52  ;;  %v2210_v34 = vmul.f32 %v6678_v13, %v6714_v15 }
 0x1d9   :  { %v6698_v22 = vpop.eup %4343  ;;  %v2285_v54 = vmul.f32 0.0, %v6685_v36  ;;  %v6729_v26 = vsel %vm2058_vm12, %v6606_v59, %v2129_v60  ;;  %v2229_v60 = vmul.f32 1.442695, %v2209_v39  ;;  %4353 = vpow2.f32 %v2227_v38 }
 0x1da   :  { %v4346_v0 = vpop.eup %4345  ;;  %v2286_v50 = vmul.f32 0.0, %v6698_v22  ;;  %v6739_v31 = vsel %vm2063_vm11, %v6609_v33, %v2139_v56  ;;  %v2211_v33 = vmul.f32 %v6696_v8, %v6729_v26 }
 0x1db   :  { %v6718_v43 = vpop.eup %4347  ;;  %4355 = vpow2.f32 %v2229_v60 }
 0x1dc   :  { %v4350_v1 = vpop.eup %4349  ;;  %v2287_v59 = vmul.f32 0.0, %v6718_v43 }
 0x1dd   :  { %v2141_v56 = vmul.f32 0.6931472, %v4350_v1 }
 0x1df   :  { %v6784_v38 = vsel %vm2064_vm14, %v6618_v27, %v2141_v56 }
 0x1e0   :  { %7485 = vst [vmem:[#allocation24_spill] sm:$0xff] %v6784_v38  ;;  %v2217_v27 = vmul.f32 %v6683_v63, %v6784_v38 }
 0x1e9   :  { %v6706_v53 = vpop.f32.mrb[24].mxu1  ;;  %v1755_v2 = vpop.f32.mrb[28].mxu0 }
 0x1ea   :  { %7482 = vst [vmem:[#allocation21_spill] sm:$0xff] %v6706_v53  ;;  %v2254_v32 = vmul.f32 %v6639_v3, %v1755_v2  ;;  %v1680_v37 = vpop.f32.mrb[25].mxu1  ;;  %v1757_v53 = vpop.f32.mrb[29].mxu0 }
 0x1eb   :  { %v2253_v11 = vmul.f32 %v6636_v58, %v1680_v37  ;;  %v2255_v10 = vmul.f32 %v6652_v42, %v1757_v53  ;;  %v2143_v58 = vmul.f32 0.6931472, %v4346_v0 }
 0x1ec   :  { %v6732_v3 = vmul.f32 %v2254_v32, %v6230_v44 }
 0x1ed   :  { %v6742_v42 = vmul.f32 %v2253_v11, %v6228_v41  ;;  %v6745_v53 = vmul.f32 %v2255_v10, %v6263_v12  ;;  %v6748_v52 = vpop.f32.mrb[26].mxu1  ;;  %v1761_v44 = vpop.f32.mrb[30].mxu0 }
 0x1ee   :  { %7483 = vst [vmem:[#allocation22_spill] sm:$0xff] %v6748_v52  ;;  %v2294_v2 = vadd.f32 %v2286_v50, %v6732_v3  ;;  %v2262_v32 = vmul.f32 %v2157_v4, %v1761_v44  ;;  %v1686_v37 = vpop.f32.mrb[27].mxu1  ;;  %v1763_v61 = vpop.f32.mrb[31].mxu0  ;;  %v2231_v4 = vmul.f32 1.442695, %v2210_v34  ;;  %v6774_v34 = vsel %vm2065_vm13, %v6615_v55, %v2143_v58 }
 0x1ef   :  { %v2293_v41 = vadd.f32 %v2285_v54, %v6742_v42  ;;  %v2295_v12 = vadd.f32 %v2287_v59, %v6745_v53  ;;  %v2261_v0 = vmul.f32 %v6660_v14, %v1686_v37  ;;  %v2263_v11 = vmul.f32 %v2158_v19, %v1763_v61  ;;  %7484 = vst [vmem:[#allocation23_spill] sm:$0xff] %v6774_v34 }
 0x1f0   :  { %v2302_v10 = vmul.f32 %v2294_v2, %v6371_v29  ;;  %v2326_v52 = vrot.slane %v2294_v2, 6  ;;  %v6758_v39 = vmul.f32 %v2262_v32, %v6240_v48  ;;  %v2233_v14 = vmul.f32 1.442695, %v2211_v33  ;;  %v4352_v2 = vpop.eup %4351 }
 0x1f1   :  { %v2301_v50 = vmul.f32 %v2293_v41, %v6363_v35  ;;  %v2325_v44 = vrot.slane %v2293_v41, 6  ;;  %v2303_v45 = vmul.f32 %v2295_v12, %v6401_v16  ;;  %v2327_v1 = vrot.slane %v2295_v12, 6 }
 0x1f2   :  { %2310 = vst [vmem:[#allocation2 + $0x8] sm:$0x3] %v2302_v10  ;;  %v2342_v54 = vmul.f32 %v6698_v22, %v2326_v52  ;;  %v6764_v59 = vmul.f32 %v2261_v0, %v6238_v47  ;;  %v6767_v61 = vmul.f32 %v2263_v11, %v6272_v21  ;;  %v2241_v47 = vmul.f32 1.442695, %v2215_v30 }
 0x1f3   :  { %2309 = vst [vmem:[#allocation2] sm:$0x3] %v2301_v50  ;;  %v2341_v48 = vmul.f32 %v6685_v36, %v2325_v44  ;;  %2311 = vst [vmem:[#allocation2 + $0x10] sm:$0x3] %v2303_v45  ;;  %v2343_v19 = vmul.f32 %v6718_v43, %v2327_v1  ;;  %v2216_v21 = vmul.f32 %v6666_v6, %v6739_v31  ;;  %4357 = vpow2.f32 %v2231_v4 }
 0x1f4   :  { %v2350_v52 = vadd.f32 %v2342_v54, %v6732_v3  ;;  %4359 = vpow2.f32 %v2233_v14  ;;  %v2218_v30 = vmul.f32 %v6678_v13, %v6774_v34  ;;  %v2145_v56 = vmul.f32 0.6931472, %v4352_v2  ;;  %v6806_v54 = vpop.eup %4353 }
 0x1f5   :  { %v2349_v32 = vadd.f32 %v2341_v48, %v6742_v42  ;;  %v2351_v45 = vadd.f32 %v2343_v19, %v6745_v53  ;;  %4361 = vpow2.f32 %v6709_v9  ;;  %v2243_v11 = vmul.f32 1.442695, %v2216_v21 }
 0x1f6   :  { %v2358_v55 = vmul.f32 %v2350_v52, %v6371_v29  ;;  %v2382_v58 = vrot.slane %v2350_v52, 6  ;;  %4363 = vpow2.f32 %v6702_v40  ;;  %v2247_v63 = vmul.f32 1.442695, %v2218_v30  ;;  %v6810_v52 = vpop.eup %4355  ;;  %v6846_v30 = vld [vmem:[%s7422_s3 + $0x210] sm:$0xff] }
 0x1f7   :  { %v2357_v6 = vmul.f32 %v2349_v32, %v6363_v35  ;;  %v2381_v60 = vrot.slane %v2349_v32, 6  ;;  %v2359_v37 = vmul.f32 %v2351_v45, %v6401_v16  ;;  %v2383_v33 = vrot.slane %v2351_v45, 6  ;;  %v6821_v45 = vld [vmem:[%s7422_s3 + $0x200] sm:$0xff] }
 0x1f8   :  { %2366 = vst [vmem:[#allocation2 + $0x8] sm:$0xc] %v2358_v55  ;;  %v2398_v41 = vmul.f32 %v6698_v22, %v2382_v58  ;;  %4365 = vpow2.f32 %v2241_v47  ;;  %v2245_v44 = vmul.f32 1.442695, %v2217_v27  ;;  %v6804_v1 = vsel %vm2066_vm15, %v6633_v49, %v2145_v56  ;;  %v6841_v58 = vld [vmem:[%s7422_s3 + $0x298] sm:$0xff] }
 0x1f9   :  { %2365 = vst [vmem:[#allocation2] sm:$0xc] %v2357_v6  ;;  %v2397_v12 = vmul.f32 %v6685_v36, %v2381_v60  ;;  %2367 = vst [vmem:[#allocation2 + $0x10] sm:$0xc] %v2359_v37  ;;  %v2399_v13 = vmul.f32 %v6718_v43, %v2383_v33  ;;  %4367 = vpow2.f32 %v2243_v11  ;;  %v2235_v21 = vmul.f32 1.442695, %v6270_v18 }
 0x1fa   :  { %v2406_v0 = vadd.f32 %v2398_v41, %v6732_v3  ;;  %7486 = vst [vmem:[#allocation25_spill] sm:$0xff] %v6804_v1  ;;  %4369 = vpow2.f32 %v2247_v63  ;;  %v6854_v60 = vmul.f32 0.0, %v6810_v52  ;;  %v6859_v37 = vld [vmem:[%s7422_s3 + $0x218] sm:$0xff]  ;;  %v6864_v33 = vld [vmem:[%s7422_s3 + $0x2a0] sm:$0xff] }
 0x1fb   :  { %v2405_v9 = vadd.f32 %v2397_v12, %v6742_v42  ;;  %v2407_v10 = vadd.f32 %v2399_v13, %v6745_v53  ;;  %4371 = vpow2.f32 %v2245_v44  ;;  %v6880_v12 = vld [vmem:[%s7422_s3 + $0x220] sm:$0xff]  ;;  %v6885_v13 = vld [vmem:[%s7422_s3 + $0x228] sm:$0xff]  ;;  %v6909_v44 = vld [vmem:[%s7422_s3 + $0x238] sm:$0xff] }
 0x1fc   :  { %v2414_v4 = vmul.f32 %v2406_v0, %v6371_v29  ;;  %v2438_v50 = vrot.slane %v2406_v0, 6  ;;  %v6890_v0 = vld [vmem:[%s7422_s3 + $0x2b0] sm:$0xff]  ;;  %4373 = vpow2.f32 %v2235_v21  ;;  %v6934_v21 = vld [vmem:[%s7422_s3 + $0x240] sm:$0xff] }
 0x1fd   :  { %v2413_v40 = vmul.f32 %v2405_v9, %v6363_v35  ;;  %v2437_v14 = vrot.slane %v2405_v9, 6  ;;  %v2415_v48 = vmul.f32 %v2407_v10, %v6401_v16  ;;  %v2439_v19 = vrot.slane %v2407_v10, 6  ;;  %v6814_v2 = vpop.eup %4357  ;;  %7491 = vst [vmem:[#allocation30_spill] sm:$0xff] %v6934_v21 }
 0x1fe   :  { %2422 = vst [vmem:[#allocation2 + $0x8] sm:$0x30] %v2414_v4  ;;  %v2454_v47 = vmul.f32 %v6698_v22, %v2438_v50  ;;  %v6826_v22 = vld [vmem:[%s7422_s3 + $0x208] sm:$0xff]  ;;  %v6828_v18 = vpop.eup %4359  ;;  %v6875_v56 = vmul.f32 0.0, %v6814_v2  ;;  %v6899_v4 = vld [vmem:[%s7422_s3 + $0x2b8] sm:$0xff]  ;;  %v6904_v50 = vld [vmem:[%s7422_s3 + $0x230] sm:$0xff] }
 0x1ff   :  { %2421 = vst [vmem:[#allocation2] sm:$0x30] %v2413_v40  ;;  %v2453_v49 = vmul.f32 %v6685_v36, %v2437_v14  ;;  %2423 = vst [vmem:[#allocation2 + $0x10] sm:$0x30] %v2415_v48  ;;  %v2455_v32 = vmul.f32 %v6718_v43, %v2439_v19  ;;  %v2219_v36 = vmul.f32 %v6696_v8, %v6804_v1  ;;  %v6836_v43 = vld [vmem:[%s7422_s3 + $0x290] sm:$0xff]  ;;  %v6851_v8 = vmul.f32 0.0, %v6806_v54 }
 0x200   :  { %7487 = vst [vmem:[#allocation26_spill] sm:$0xff] %v6828_v18  ;;  %v2462_v55 = vadd.f32 %v2454_v47, %v6732_v3  ;;  %v6915_v40 = vmul.f32 0.0, %v6828_v18  ;;  %v6924_v19 = vld [vmem:[%s7422_s3 + $0x2c0] sm:$0xff]  ;;  %v6929_v47 = vld [vmem:[%s7422_s3 + $0x2c8] sm:$0xff] }
 0x201   :  { %v2461_v3 = vadd.f32 %v2453_v49, %v6742_v42  ;;  %v2463_v6 = vadd.f32 %v2455_v32, %v6745_v53  ;;  %v6869_v42 = vld [vmem:[%s7422_s3 + $0x2a8] sm:$0xff]  ;;  %v6871_v53 = vpop.eup %4361  ;;  %v6917_v14 = vmul.f32 1.442695, %v2219_v36  ;;  %7489 = vst [vmem:[#allocation28_spill] sm:$0xff] %v6924_v19  ;;  %7490 = vst [vmem:[#allocation29_spill] sm:$0xff] %v6929_v47 }
 0x202   :  { %v2470_v41 = vmul.f32 %v2462_v55, %v6371_v29  ;;  %v2494_v27 = vrot.slane %v2462_v55, 6  ;;  %v6892_v29 = vpop.eup %4363  ;;  %v6999_v55 = vld [vmem:[%s7422_s3 + $0x2e8] sm:$0xff] }
 0x203   :  { %v2469_v11 = vmul.f32 %v2461_v3, %v6363_v35  ;;  %v2493_v9 = vrot.slane %v2461_v3, 6  ;;  %v2471_v10 = vmul.f32 %v2463_v6, %v6401_v16  ;;  %v2495_v63 = vrot.slane %v2463_v6, 6  ;;  %v6911_v35 = vpop.eup %4365  ;;  %7488 = vst [vmem:[#allocation27_spill] sm:$0xff] %v6917_v14  ;;  %v6945_v3 = vld [vmem:[%s7422_s3 + $0x248] sm:$0xff]  ;;  %v6950_v6 = vld [vmem:[%s7422_s3 + $0x2d0] sm:$0xff] }
 0x204   :  { %2478 = vst [vmem:[#allocation2 + $0x8] sm:$0xc0] %v2470_v41  ;;  %v2510_v16 = vmul.f32 %v6871_v53, %v2494_v27  ;;  %7492 = vst [vmem:[#allocation31_spill] sm:$0xff] %v6945_v3  ;;  %v6955_v41 = vld [vmem:[%s7422_s3 + $0x2d8] sm:$0xff] }
 0x205   :  { %2477 = vst [vmem:[#allocation2] sm:$0xc0] %v2469_v11  ;;  %2479 = vst [vmem:[#allocation2 + $0x10] sm:$0xc0] %v2471_v10  ;;  %v2509_v49 = vmul.f32 %v6892_v29, %v2493_v9  ;;  %v2511_v32 = vmul.f32 %v6911_v35, %v2495_v63  ;;  %v6978_v9 = vld [vmem:[%s7422_s3 + $0x258] sm:$0xff]  ;;  %v6980_v10 = vpop.eup %4367 }
 0x206   :  { %7493 = vst [vmem:[#allocation32_spill] sm:$0xff] %v6950_v6  ;;  %7494 = vst [vmem:[#allocation33_spill] sm:$0xff] %v6955_v41  ;;  %v2518_v27 = vadd.f32 %v2510_v16, %v6758_v39  ;;  %v6973_v16 = vld [vmem:[%s7422_s3 + $0x250] sm:$0xff]  ;;  %v6987_v11 = vpop.eup %4369 }
 0x207   :  { %v2517_v63 = vadd.f32 %v2509_v49, %v6764_v59  ;;  %v2519_v36 = vadd.f32 %v2511_v32, %v6767_v61  ;;  %7495 = vst [vmem:[#allocation34_spill] sm:$0xff] %v6980_v10  ;;  %7496 = vst [vmem:[#allocation35_spill] sm:$0xff] %v6987_v11  ;;  %v7001_v48 = vpop.eup %4371  ;;  %v4200_v41 = vpack.c.bf16 %v6978_v9, %v6973_v16 }
 0x208   :  { %v2526_v49 = vmul.f32 %v2518_v27, %v6387_v57  ;;  %v2550_v32 = vrot.slane %v2518_v27, 6  ;;  %v6994_v27 = vld [vmem:[%s7422_s3 + $0x2e0] sm:$0xff]  ;;  %7497 = vst [vmem:[#allocation36_spill] sm:$0xff] %v7001_v48  ;;  %v7012_v47 = vpop.eup %4373 }
 0x209   :  { %v2525_v14 = vmul.f32 %v2517_v63, %v6379_v5  ;;  %v2549_v1 = vrot.slane %v2517_v63, 6  ;;  %v2527_v38 = vmul.f32 %v2519_v36, %v6423_v46  ;;  %v2551_v34 = vrot.slane %v2519_v36, 6  ;;  %v1832_v18 = vpop.f32.mrb[28].mxu1  ;;  %v1909_v19 = vpop.f32.mrb[32].mxu0 }
 0x20a   :  { %2534 = vst [vmem:[#allocation2 + $0x48] sm:$0x3] %v2526_v49  ;;  %v2566_v63 = vmul.f32 %v6871_v53, %v2550_v32  ;;  %v2256_v11 = vmul.f32 %v6669_v51, %v1832_v18  ;;  %v2258_v36 = vmul.f32 %v6714_v15, %v1909_v19  ;;  %v1834_v10 = vpop.f32.mrb[29].mxu1  ;;  %v1911_v6 = vpop.f32.mrb[33].mxu0 }
 0x20b   :  { %2533 = vst [vmem:[#allocation2 + $0x40] sm:$0x3] %v2525_v14  ;;  %v2565_v21 = vmul.f32 %v6892_v29, %v2549_v1  ;;  %2535 = vst [vmem:[#allocation2 + $0x50] sm:$0x3] %v2527_v38  ;;  %v2567_v3 = vmul.f32 %v6911_v35, %v2551_v34  ;;  %v2257_v48 = vmul.f32 %v6691_v25, %v1834_v10  ;;  %v2710_v32 = vld [vmem:[#allocation2 + $0x8] sm:$0xff] }
 0x20c   :  { %v2259_v49 = vmul.f32 %v6729_v26, %v1911_v6  ;;  %v2574_v51 = vadd.f32 %v2566_v63, %v6758_v39  ;;  %v7016_v15 = vmul.f32 %v2256_v11, %v6267_v17  ;;  %v7019_v18 = vmul.f32 %v2258_v36, %v6283_v24  ;;  %2923 = vmatprep.mubr.f32.mxu0 %v2710_v32  ;;  %v2709_v1 = vld [vmem:[#allocation2] sm:$0xff] }
 0x20d   :  { %v4202_v34 = vpack.c.bf16 %v6999_v55, %v6994_v27  ;;  %v2573_v25 = vadd.f32 %v2565_v21, %v6764_v59  ;;  %v2575_v26 = vadd.f32 %v2567_v3, %v6767_v61  ;;  %v7026_v38 = vmul.f32 %v2257_v48, %v6281_v23  ;;  %v1838_v17 = vpop.f32.mrb[30].mxu1  ;;  %v7031_v19 = vpop.f32.mrb[34].mxu0  ;;  %2924 = vmatmul.mubr.f32.vlgmr.msra.gmra.mrb[36].mxu0 %v2709_v1  ;;  %v2821_v55 = vld [vmem:[%s7422_s3 + $0x300] sm:$0xff] }
 0x20e   :  { %v7029_v14 = vmul.f32 %v2259_v49, %v6337_v62  ;;  %v2582_v24 = vmul.f32 %v2574_v51, %v6387_v57  ;;  %v2606_v6 = vrot.slane %v2574_v51, 6  ;;  %v2296_v11 = vadd.f32 %v6851_v8, %v7016_v15  ;;  %v7038_v3 = vpop.f32.mrb[31].mxu1  ;;  %v7040_v23 = vpop.f32.mrb[35].mxu0 }
 0x20f   :  { %v2298_v21 = vadd.f32 %v6875_v56, %v7019_v18  ;;  %v7498_v62 = vpack.c.bf16 %v6826_v22, %v6821_v45  ;;  %v2581_v48 = vmul.f32 %v2573_v25, %v6379_v5  ;;  %v2605_v10 = vrot.slane %v2573_v25, 6 }
 0x210   :  { %v2583_v63 = vmul.f32 %v2575_v26, %v6423_v46  ;;  %v2607_v36 = vrot.slane %v2575_v26, 6  ;;  %v7499_v8 = vpack.c.bf16 %v6841_v58, %v6836_v43  ;;  %2590 = vst [vmem:[#allocation2 + $0x48] sm:$0xc] %v2582_v24  ;;  %v2622_v56 = vmul.f32 %v6871_v53, %v2606_v6 }
 0x211   :  { %4181 = vmatpush3.bf16.msra.mxu0 %v7498_v62  ;;  %v2304_v49 = vmul.f32 %v2296_v11, %v6403_v20  ;;  %v2328_v32 = vrot.slane %v2296_v11, 6  ;;  %v2306_v51 = vmul.f32 %v2298_v21, %v6443_v28  ;;  %2589 = vst [vmem:[#allocation2 + $0x40] sm:$0xc] %v2581_v48  ;;  %v2621_v45 = vmul.f32 %v6892_v29, %v2605_v10 }
 0x212   :  { %4183 = vmatprep.subr.bf16.mxu0 %v7499_v8  ;;  %2591 = vst [vmem:[#allocation2 + $0x50] sm:$0xc] %v2583_v63  ;;  %v2623_v22 = vmul.f32 %v6911_v35, %v2607_v36  ;;  %v2330_v1 = vrot.slane %v2298_v21, 6  ;;  %v2297_v25 = vadd.f32 %v6854_v60, %v7026_v38  ;;  %v2630_v43 = vadd.f32 %v2622_v56, %v6758_v39 }
 0x213   :  { %2312 = vst [vmem:[#allocation2 + $0x18] sm:$0x3] %v2304_v49  ;;  %v2344_v58 = vmul.f32 %v6806_v54, %v2328_v32  ;;  %2314 = vst [vmem:[#allocation2 + $0x28] sm:$0x3] %v2306_v51  ;;  %v2299_v26 = vadd.f32 %v6915_v40, %v7029_v14  ;;  %v2264_v24 = vmul.f32 %v6739_v31, %v1838_v17 }
 0x214   :  { %v7500_v6 = vpack.c.bf16 %v6859_v37, %v6846_v30  ;;  %v2629_v11 = vadd.f32 %v2621_v45, %v6764_v59  ;;  %v2631_v21 = vadd.f32 %v2623_v22, %v6767_v61  ;;  %v2346_v60 = vmul.f32 %v6814_v2, %v2330_v1  ;;  %v7503_v22 = vld [vmem:[#allocation17_spill] sm:$0xff] }
 0x215   :  { %v2305_v62 = vmul.f32 %v2297_v25, %v6441_v7  ;;  %v7501_v48 = vpack.c.bf16 %v6869_v42, %v6864_v33  ;;  %v2638_v40 = vmul.f32 %v2630_v43, %v6387_v57  ;;  %v2662_v10 = vrot.slane %v2630_v43, 6 }
 0x216   :  { %4185 = vmatpush3.bf16.msra.mxu0 %v7500_v6  ;;  %v2352_v31 = vadd.f32 %v2344_v58, %v7016_v15  ;;  %v2329_v17 = vrot.slane %v2297_v25, 6  ;;  %v2637_v30 = vmul.f32 %v2629_v11, %v6379_v5  ;;  %v2661_v37 = vrot.slane %v2629_v11, 6 }
 0x217   :  { %4187 = vmatprep.subr.bf16.mxu0 %v7501_v48  ;;  %v2639_v63 = vmul.f32 %v2631_v21, %v6423_v46  ;;  %v2663_v36 = vrot.slane %v2631_v21, 6  ;;  %2313 = vst [vmem:[#allocation2 + $0x20] sm:$0x3] %v2305_v62  ;;  %2646 = vst [vmem:[#allocation2 + $0x48] sm:$0x30] %v2638_v40  ;;  %v2678_v8 = vmul.f32 %v6871_v53, %v2662_v10  ;;  %v2331_v6 = vrot.slane %v2299_v26, 6 }
 0x218   :  { %v2360_v56 = vmul.f32 %v2352_v31, %v6403_v20  ;;  %v2384_v33 = vrot.slane %v2352_v31, 6  ;;  %v2354_v42 = vadd.f32 %v2346_v60, %v7019_v18  ;;  %v7502_v49 = vpack.c.bf16 %v6885_v13, %v6880_v12  ;;  %2645 = vst [vmem:[#allocation2 + $0x40] sm:$0x30] %v2637_v30  ;;  %v7508_v48 = vld [vmem:[#allocation28_spill] sm:$0xff] }
 0x219   :  { %v2677_v32 = vmul.f32 %v6892_v29, %v2661_v37  ;;  %2647 = vst [vmem:[#allocation2 + $0x50] sm:$0x30] %v2639_v63  ;;  %v2679_v51 = vmul.f32 %v6911_v35, %v2663_v36  ;;  %v2345_v45 = vmul.f32 %v6810_v52, %v2329_v17  ;;  %v2307_v1 = vmul.f32 %v2299_v26, %v7503_v22  ;;  %v7510_v17 = vld [vmem:[#allocation26_spill] sm:$0xff]  ;;  %v7512_v30 = vld [vmem:[#allocation24_spill] sm:$0xff]  ;;  %v7513_v63 = vld [vmem:[#allocation25_spill] sm:$0xff] }
 0x21a   :  { %4189 = vmatpush3.bf16.msra.mxu0 %v7502_v49  ;;  %v7504_v53 = vpack.c.bf16 %v6899_v4, %v6890_v0  ;;  %v2686_v25 = vadd.f32 %v2678_v8, %v6758_v39  ;;  %2368 = vst [vmem:[#allocation2 + $0x18] sm:$0xc] %v2360_v56  ;;  %v2400_v12 = vmul.f32 %v6806_v54, %v2384_v33  ;;  %v2386_v43 = vrot.slane %v2354_v42, 6  ;;  %v7505_v4 = vld [vmem:[#allocation7_spill] sm:$0xff] }
 0x21b   :  { %v2362_v13 = vmul.f32 %v2354_v42, %v6443_v28  ;;  %v2685_v29 = vadd.f32 %v2677_v32, %v6764_v59  ;;  %v2687_v35 = vadd.f32 %v2679_v51, %v6767_v61  ;;  %v2353_v58 = vadd.f32 %v2345_v45, %v7026_v38  ;;  %2315 = vst [vmem:[#allocation2 + $0x30] sm:$0x3] %v2307_v1  ;;  %v7514_v49 = vld [vmem:[#allocation31_spill] sm:$0xff]  ;;  %v7515_v32 = vld [vmem:[#allocation30_spill] sm:$0xff]  ;;  %v7518_v1 = vld [vmem:[#allocation9_spill] sm:$0xff] }
 0x21c   :  { %4191 = vmatprep.subr.bf16.mxu0 %v7504_v53  ;;  %v2694_v11 = vmul.f32 %v2686_v25, %v6387_v57  ;;  %v2408_v0 = vadd.f32 %v2400_v12, %v7016_v15  ;;  %v2402_v39 = vmul.f32 %v6814_v2, %v2386_v43  ;;  %v7099_v21 = vmul.f32 %v2264_v24, %v7505_v4  ;;  %v7507_v57 = vld [vmem:[#allocation29_spill] sm:$0xff]  ;;  %v7519_v25 = vld [vmem:[#allocation12_spill] sm:$0xff] }
 0x21d   :  { %2370 = vst [vmem:[#allocation2 + $0x28] sm:$0xc] %v2362_v13  ;;  %v7506_v60 = vpack.c.bf16 %v6909_v44, %v6904_v50  ;;  %v2693_v59 = vmul.f32 %v2685_v29, %v6379_v5  ;;  %v2695_v61 = vmul.f32 %v2687_v35, %v6423_v46  ;;  %v2361_v26 = vmul.f32 %v2353_v58, %v6441_v7  ;;  %v7511_v46 = vld [vmem:[#allocation23_spill] sm:$0xff]  ;;  %v7520_v13 = vld [vmem:[#allocation33_spill] sm:$0xff]  ;;  %v7521_v43 = vld [vmem:[#allocation32_spill] sm:$0xff] }
 0x21e   :  { %v2385_v62 = vrot.slane %v2353_v58, 6  ;;  %v7509_v40 = vpack.c.bf16 %v7507_v57, %v7508_v48  ;;  %2702 = vst [vmem:[#allocation2 + $0x48] sm:$0xc0] %v2694_v11  ;;  %v2416_v10 = vmul.f32 %v2408_v0, %v6403_v20  ;;  %v2440_v24 = vrot.slane %v2408_v0, 6  ;;  %v2819_v0 = vld [vmem:[%s7422_s3 + $0x2f0] sm:$0xff]  ;;  %v2804_v57 = vld [vmem:[%s7422_s3 + $0x278] sm:$0xff] }
 0x21f   :  { %4193 = vmatpush3.bf16.msra.mxu0 %v7506_v60  ;;  %v2410_v31 = vadd.f32 %v2402_v39, %v7019_v18  ;;  %v2347_v50 = vmul.f32 %v7510_v17, %v2331_v6  ;;  %2701 = vst [vmem:[#allocation2 + $0x40] sm:$0xc0] %v2693_v59  ;;  %2703 = vst [vmem:[#allocation2 + $0x50] sm:$0xc0] %v2695_v61  ;;  %v2266_v44 = vmul.f32 %v7511_v46, %v7031_v19  ;;  %v2801_v19 = vld [vmem:[%s7422_s3 + $0x260] sm:$0xff]  ;;  %v2820_v39 = vld [vmem:[%s7422_s3 + $0x2f8] sm:$0xff] }
 0x220   :  { %4195 = vmatprep.subr.bf16.mxu0 %v7509_v40  ;;  %2369 = vst [vmem:[#allocation2 + $0x20] sm:$0xc] %v2361_v26  ;;  %v2401_v5 = vmul.f32 %v6810_v52, %v2385_v62  ;;  %v2265_v37 = vmul.f32 %v7512_v30, %v7038_v3  ;;  %v2267_v36 = vmul.f32 %v7513_v63, %v7040_v23  ;;  %2424 = vst [vmem:[#allocation2 + $0x18] sm:$0x30] %v2416_v10  ;;  %v2802_v3 = vld [vmem:[%s7422_s3 + $0x268] sm:$0xff]  ;;  %v2803_v62 = vld [vmem:[%s7422_s3 + $0x270] sm:$0xff] }
 0x221   :  { %v2456_v8 = vmul.f32 %v6806_v54, %v2440_v24  ;;  %v2418_v56 = vmul.f32 %v2410_v31, %v6443_v28  ;;  %v2442_v33 = vrot.slane %v2410_v31, 6  ;;  %v2355_v42 = vadd.f32 %v2347_v50, %v7029_v14  ;;  %v7517_v54 = vld [vmem:[#allocation10_spill] sm:$0xff]  ;;  %v7523_v48 = vld [vmem:[#allocation27_spill] sm:$0xff] }
 0x222   :  { %v7516_v51 = vpack.c.bf16 %v7514_v49, %v7515_v32  ;;  %v2409_v23 = vadd.f32 %v2401_v5, %v7026_v38  ;;  %v7134_v45 = vmul.f32 %v2266_v44, %v7517_v54  ;;  %v7137_v53 = vmul.f32 %v2265_v37, %v7518_v1  ;;  %v7524_v10 = vld [vmem:[#allocation34_spill] sm:$0xff]  ;;  %v7525_v5 = vld [vmem:[#allocation35_spill] sm:$0xff]  ;;  %v2822_v44 = vld [vmem:[%s7422_s3 + $0x308] sm:$0xff] }
 0x223   :  { %v7140_v12 = vmul.f32 %v2267_v36, %v7519_v25  ;;  %v7522_v29 = vpack.c.bf16 %v7520_v13, %v7521_v43  ;;  %v2464_v35 = vadd.f32 %v2456_v8, %v7016_v15  ;;  %2426 = vst [vmem:[#allocation2 + $0x28] sm:$0x30] %v2418_v56  ;;  %v2458_v58 = vmul.f32 %v6814_v2, %v2442_v33  ;;  %v2840_v30 = vld [vmem:[%s7422_s3 + $0x398] sm:$0xff]  ;;  %v7198_v49 = vld [vmem:[%s7422_s3 + $0x310] sm:$0xff]  ;;  %v7528_v25 = vld [vmem:[#allocation16_spill] sm:$0xff] }
 0x224   :  { %4197 = vmatpush3.bf16.msra.mxu0 %v7516_v51  ;;  %v2363_v6 = vmul.f32 %v2355_v42, %v7503_v22  ;;  %v2387_v11 = vrot.slane %v2355_v42, 6  ;;  %v2417_v4 = vmul.f32 %v2409_v23, %v6441_v7  ;;  %v2441_v60 = vrot.slane %v2409_v23, 6  ;;  %v7526_v8 = vld [vmem:[#allocation14_spill] sm:$0xff] }
 0x225   :  { %4199 = vmatprep.subr.bf16.mxu0 %v7522_v29  ;;  %v4204_v59 = vpack.c.bf16 %v2802_v3, %v2801_v19  ;;  %v2472_v15 = vmul.f32 %v2464_v35, %v6403_v20  ;;  %v2496_v61 = vrot.slane %v2464_v35, 6  ;;  %v2466_v2 = vadd.f32 %v2458_v58, %v7019_v18  ;;  %v2718_v18 = vld [vmem:[#allocation2 + $0x48] sm:$0xff]  ;;  %v7203_v32 = vld [vmem:[%s7422_s3 + $0x318] sm:$0xff] }
 0x226   :  { %2371 = vst [vmem:[#allocation2 + $0x30] sm:$0xc] %v2363_v6  ;;  %v2403_v26 = vmul.f32 %v7510_v17, %v2387_v11  ;;  %2425 = vst [vmem:[#allocation2 + $0x20] sm:$0x30] %v2417_v4  ;;  %v2457_v20 = vmul.f32 %v6810_v52, %v2441_v60  ;;  %4375 = vpow2.f32 %v7523_v48  ;;  %v4206_v9 = vpack.c.bf16 %v2820_v39, %v2819_v0  ;;  %v2717_v31 = vld [vmem:[#allocation2 + $0x40] sm:$0xff]  ;;  %v7529_v58 = vld [vmem:[#allocation6_spill] sm:$0xff] }
 0x227   :  { %2480 = vst [vmem:[#allocation2 + $0x18] sm:$0xc0] %v2472_v15  ;;  %v2498_v16 = vrot.slane %v2466_v2, 6  ;;  %v2512_v24 = vmul.f32 %v7524_v10, %v2496_v61  ;;  %2928 = vmatprep.mubr.f32.mxu0 %v2718_v18  ;;  %v4208_v50 = vpack.c.bf16 %v2804_v57, %v2803_v62  ;;  %v4212_v3 = vpack.c.bf16 %v2822_v44, %v2821_v55  ;;  %v7530_v11 = vld [vmem:[#allocation5_spill] sm:$0xff]  ;;  %v7531_v57 = vld [vmem:[#allocation15_spill] sm:$0xff]  ;;  %v2826_v55 = vld [vmem:[%s7422_s3 + $0x328] sm:$0xff] }
 0x228   :  { %4201 = vmatpush3.bf16.msra.mxu0 %v4200_v41  ;;  %v2474_v41 = vmul.f32 %v2466_v2, %v6443_v28  ;;  %v2411_v40 = vadd.f32 %v2403_v26, %v7029_v14  ;;  %v2465_v52 = vadd.f32 %v2457_v20, %v7026_v38  ;;  %v2839_v38 = vld [vmem:[%s7422_s3 + $0x390] sm:$0xff]  ;;  %v4216_v4 = vpack.c.bf16 %v7203_v32, %v7198_v49  ;;  %v2841_v2 = vld [vmem:[%s7422_s3 + $0x3a0] sm:$0xff]  ;;  %v2842_v26 = vld [vmem:[%s7422_s3 + $0x3a8] sm:$0xff] }
 0x229   :  { %4203 = vmatprep.subr.bf16.mxu0 %v4202_v34  ;;  %2929 = vmatmul.mubr.f32.gmra.mrb[38].mxu0 %v2717_v31  ;;  %v2520_v28 = vadd.f32 %v2512_v24, %v7099_v21  ;;  %v2514_v46 = vmul.f32 %v7525_v5, %v2498_v16  ;;  %v3502_v19 = vpop.f32.mrb[32].mxu1  ;;  %v4214_v23 = vpack.c.bf16 %v2840_v30, %v2839_v38  ;;  %v2711_v61 = vld [vmem:[#allocation2 + $0x10] sm:$0xff] }
 0x22a   :  { %2482 = vst [vmem:[#allocation2 + $0x28] sm:$0xc0] %v2474_v41  ;;  %v2419_v27 = vmul.f32 %v2411_v40, %v7503_v22  ;;  %v2443_v34 = vrot.slane %v2411_v40, 6  ;;  %v2473_v37 = vmul.f32 %v2465_v52, %v6441_v7  ;;  %v2497_v63 = vrot.slane %v2465_v52, 6  ;;  %v7527_v7 = vld [vmem:[#allocation36_spill] sm:$0xff]  ;;  %v1986_v29 = vpop.f32.mrb[33].mxu1 }
 0x22b   :  { %v2528_v56 = vmul.f32 %v2520_v28, %v7526_v8  ;;  %v2552_v33 = vrot.slane %v2520_v28, 6  ;;  %v2522_v42 = vadd.f32 %v2514_v46, %v7134_v45  ;;  %v2268_v6 = vmul.f32 %v3502_v19, %v7529_v58  ;;  %v7532_v48 = vld [vmem:[#allocation13_spill] sm:$0xff] }
 0x22c   :  { %4205 = vmatpush3.bf16.msra.mxu0 %v4204_v59  ;;  %2427 = vst [vmem:[#allocation2 + $0x30] sm:$0x30] %v2419_v27  ;;  %v2459_v36 = vmul.f32 %v7510_v17, %v2443_v34  ;;  %2481 = vst [vmem:[#allocation2 + $0x20] sm:$0xc0] %v2473_v37  ;;  %v2513_v51 = vmul.f32 %v7527_v7, %v2497_v63  ;;  %v2292_v17 = vmul.f32 0.0, %v7012_v47  ;;  %v2843_v63 = vld [vmem:[%s7422_s3 + $0x3b0] sm:$0xff] }
 0x22d   :  { %4207 = vmatprep.subr.bf16.mxu0 %v4206_v9  ;;  %2536 = vst [vmem:[#allocation2 + $0x58] sm:$0x3] %v2528_v56  ;;  %v2568_v1 = vmul.f32 %v7524_v10, %v2552_v33  ;;  %v2530_v13 = vmul.f32 %v2522_v42, %v7528_v25  ;;  %v2554_v43 = vrot.slane %v2522_v42, 6  ;;  %v2260_v0 = vmul.f32 %v7530_v11, %v1986_v29  ;;  %v7533_v9 = vld [vmem:[#allocation11_spill] sm:$0xff]  ;;  %v7534_v33 = vld [vmem:[#allocation18_spill] sm:$0xff] }
 0x22e   :  { %v2467_v54 = vadd.f32 %v2459_v36, %v7029_v14  ;;  %v2521_v35 = vadd.f32 %v2513_v51, %v7137_v53  ;;  %v2712_v39 = vld [vmem:[#allocation2 + $0x18] sm:$0xff]  ;;  %v7228_v18 = vmul.f32 %v2268_v6, %v7532_v48  ;;  %v4218_v28 = vpack.c.bf16 %v2842_v26, %v2841_v2 }
 0x22f   :  { %v2576_v59 = vadd.f32 %v2568_v1, %v7099_v21  ;;  %2538 = vst [vmem:[#allocation2 + $0x68] sm:$0x3] %v2530_v13  ;;  %v2570_v15 = vmul.f32 %v7525_v5, %v2554_v43  ;;  %2998 = vmatprep.mubr.f32.mxu1 %v2712_v39  ;;  %v7231_v41 = vmul.f32 %v2260_v0, %v7533_v9  ;;  %v2844_v36 = vld [vmem:[%s7422_s3 + $0x3b8] sm:$0xff]  ;;  %v2845_v39 = vld [vmem:[%s7422_s3 + $0x3c0] sm:$0xff] }
 0x230   :  { %4209 = vmatpush3.bf16.msra.mxu0 %v4208_v50  ;;  %v2475_v14 = vmul.f32 %v2467_v54, %v7503_v22  ;;  %v2499_v60 = vrot.slane %v2467_v54, 6  ;;  %v7224_v62 = vpop.eup %4375  ;;  %v2529_v22 = vmul.f32 %v2521_v35, %v7531_v57  ;;  %v2553_v20 = vrot.slane %v2521_v35, 6  ;;  %2999 = vmatmul.mubr.f32.vlgmr.msra.gmra.mrb[34].mxu1 %v2711_v61  ;;  %v2825_v50 = vld [vmem:[%s7422_s3 + $0x320] sm:$0xff]  ;;  %v2827_v54 = vld [vmem:[%s7422_s3 + $0x330] sm:$0xff]  ;;  %v2828_v1 = vld [vmem:[%s7422_s3 + $0x338] sm:$0xff] }
 0x231   :  { %v2714_v16 = vld [vmem:[#allocation2 + $0x28] sm:$0xff]  ;;  %v2584_v40 = vmul.f32 %v2576_v59, %v7526_v8  ;;  %v2608_v24 = vrot.slane %v2576_v59, 6  ;;  %v2578_v31 = vadd.f32 %v2570_v15, %v7134_v45  ;;  %4213 = vmatpush3.bf16.msra.mxu1 %v4212_v3  ;;  %v2300_v34 = vadd.f32 %v2292_v17, %v7231_v41  ;;  %v7535_v17 = vld [vmem:[#allocation19_spill] sm:$0xff] }
 0x232   :  { %2483 = vst [vmem:[#allocation2 + $0x30] sm:$0xc0] %v2475_v14  ;;  %v2515_v52 = vmul.f32 %v7224_v62, %v2499_v60  ;;  %3073 = vmatprep.mubr.f32.mxu0 %v2714_v16  ;;  %2537 = vst [vmem:[#allocation2 + $0x60] sm:$0x3] %v2529_v22  ;;  %v2569_v27 = vmul.f32 %v7527_v7, %v2553_v20  ;;  %4215 = vmatprep.subr.bf16.mxu1 %v4214_v23  ;;  %v7536_v60 = vld [vmem:[#allocation8_spill] sm:$0xff] }
 0x233   :  { %2592 = vst [vmem:[#allocation2 + $0x58] sm:$0xc] %v2584_v40  ;;  %v2624_v46 = vmul.f32 %v7524_v10, %v2608_v24  ;;  %v2586_v44 = vmul.f32 %v2578_v31, %v7528_v25  ;;  %v2610_v38 = vrot.slane %v2578_v31, 6  ;;  %v2713_v37 = vld [vmem:[#allocation2 + $0x20] sm:$0xff]  ;;  %v2308_v42 = vmul.f32 %v2300_v34, %v7534_v33 }
 0x234   :  { %v2523_v30 = vadd.f32 %v2515_v52, %v7140_v12  ;;  %v2577_v56 = vadd.f32 %v2569_v27, %v7137_v53  ;;  %v2332_v49 = vrot.slane %v2300_v34, 6  ;;  %3074 = vmatmul.mubr.f32.vlgmr.msra.gmra.mrb[40].mxu0 %v2713_v37  ;;  %v4220_v32 = vpack.c.bf16 %v2826_v55, %v2825_v50  ;;  %v2829_v24 = vld [vmem:[%s7422_s3 + $0x340] sm:$0xff]  ;;  %v2847_v27 = vld [vmem:[%s7422_s3 + $0x3d0] sm:$0xff]  ;;  %v2848_v34 = vld [vmem:[%s7422_s3 + $0x3d8] sm:$0xff] }
 0x235   :  { %v2632_v51 = vadd.f32 %v2624_v46, %v7099_v21  ;;  %2594 = vst [vmem:[#allocation2 + $0x68] sm:$0xc] %v2586_v44  ;;  %v2626_v19 = vmul.f32 %v7525_v5, %v2610_v38  ;;  %4217 = vmatpush3.bf16.msra.mxu1 %v4216_v4  ;;  %2316 = vst [vmem:[#allocation2 + $0x38] sm:$0x3] %v2308_v42  ;;  %v4222_v35 = vpack.c.bf16 %v2844_v36, %v2843_v63  ;;  %v2846_v4 = vld [vmem:[%s7422_s3 + $0x3c8] sm:$0xff] }
 0x236   :  { %v2531_v3 = vmul.f32 %v2523_v30, %v7535_v17  ;;  %v2555_v23 = vrot.slane %v2523_v30, 6  ;;  %v2585_v13 = vmul.f32 %v2577_v56, %v7531_v57  ;;  %v2609_v43 = vrot.slane %v2577_v56, 6  ;;  %4219 = vmatprep.subr.bf16.mxu1 %v4218_v28  ;;  %v2831_v56 = vld [vmem:[%s7422_s3 + $0x350] sm:$0xff] }
 0x237   :  { %v2348_v29 = vmul.f32 %v7012_v47, %v2332_v49  ;;  %v2640_v58 = vmul.f32 %v2632_v51, %v7526_v8  ;;  %v2664_v6 = vrot.slane %v2632_v51, 6  ;;  %v2634_v11 = vadd.f32 %v2626_v19, %v7134_v45  ;;  %v2850_v49 = vld [vmem:[%s7422_s3 + $0x3e8] sm:$0xff] }
 0x238   :  { %2539 = vst [vmem:[#allocation2 + $0x70] sm:$0x3] %v2531_v3  ;;  %v2571_v0 = vmul.f32 %v7224_v62, %v2555_v23  ;;  %2593 = vst [vmem:[#allocation2 + $0x60] sm:$0xc] %v2585_v13  ;;  %v2625_v14 = vmul.f32 %v7527_v7, %v2609_v43  ;;  %v2251_v59 = vmul.f32 1.442695, %v7536_v60  ;;  %v4224_v61 = vpack.c.bf16 %v2828_v1, %v2827_v54 }
 0x239   :  { %v2356_v15 = vadd.f32 %v2348_v29, %v7231_v41  ;;  %2648 = vst [vmem:[#allocation2 + $0x58] sm:$0x30] %v2640_v58  ;;  %v2680_v2 = vmul.f32 %v7524_v10, %v2664_v6  ;;  %v2642_v26 = vmul.f32 %v2634_v11, %v7528_v25  ;;  %v2666_v22 = vrot.slane %v2634_v11, 6  ;;  %4221 = vmatpush3.bf16.msra.mxu1 %v4220_v32  ;;  %v2830_v10 = vld [vmem:[%s7422_s3 + $0x348] sm:$0xff]  ;;  %v2836_v60 = vld [vmem:[%s7422_s3 + $0x378] sm:$0xff] }
 0x23a   :  { %v2579_v20 = vadd.f32 %v2571_v0, %v7140_v12  ;;  %v2633_v48 = vadd.f32 %v2625_v14, %v7137_v53  ;;  %4223 = vmatprep.subr.bf16.mxu1 %v4222_v35  ;;  %v4226_v40 = vpack.c.bf16 %v2846_v4, %v2845_v39  ;;  %4377 = vpow2.f32 %v2251_v59  ;;  %v2834_v43 = vld [vmem:[%s7422_s3 + $0x368] sm:$0xff]  ;;  %v2835_v14 = vld [vmem:[%s7422_s3 + $0x370] sm:$0xff] }
 0x23b   :  { %v2364_v9 = vmul.f32 %v2356_v15, %v7534_v33  ;;  %v2388_v16 = vrot.slane %v2356_v15, 6  ;;  %v2688_v31 = vadd.f32 %v2680_v2, %v7099_v21  ;;  %2650 = vst [vmem:[#allocation2 + $0x68] sm:$0x30] %v2642_v26  ;;  %v2682_v52 = vmul.f32 %v7525_v5, %v2666_v22  ;;  %v7537_v26 = vld [vmem:[#allocation20_spill] sm:$0xff] }
 0x23c   :  { %v2587_v50 = vmul.f32 %v2579_v20, %v7535_v17  ;;  %v2611_v55 = vrot.slane %v2579_v20, 6  ;;  %v2641_v28 = vmul.f32 %v2633_v48, %v7531_v57  ;;  %v2665_v46 = vrot.slane %v2633_v48, 6 }
 0x23d   :  { %2372 = vst [vmem:[#allocation2 + $0x38] sm:$0xc] %v2364_v9  ;;  %v2404_v21 = vmul.f32 %v7012_v47, %v2388_v16  ;;  %v2696_v5 = vmul.f32 %v2688_v31, %v7526_v8  ;;  %v2690_v44 = vadd.f32 %v2682_v52, %v7134_v45  ;;  %4225 = vmatpush3.bf16.msra.mxu1 %v4224_v61  ;;  %v2832_v45 = vld [vmem:[%s7422_s3 + $0x358] sm:$0xff]  ;;  %v2715_v16 = vld [vmem:[#allocation2 + $0x30] sm:$0xff] }
 0x23e   :  { %2595 = vst [vmem:[#allocation2 + $0x70] sm:$0xc] %v2587_v50  ;;  %v2627_v38 = vmul.f32 %v7224_v62, %v2611_v55  ;;  %v4228_v30 = vpack.c.bf16 %v2830_v10, %v2829_v24  ;;  %2649 = vst [vmem:[#allocation2 + $0x60] sm:$0x30] %v2641_v28  ;;  %v2681_v37 = vmul.f32 %v7527_v7, %v2665_v46  ;;  %4227 = vmatprep.subr.bf16.mxu1 %v4226_v40  ;;  %v2849_v7 = vld [vmem:[%s7422_s3 + $0x3e0] sm:$0xff] }
 0x23f   :  { %v2412_v63 = vadd.f32 %v2404_v21, %v7231_v41  ;;  %v4230_v36 = vpack.c.bf16 %v2848_v34, %v2847_v27  ;;  %2704 = vst [vmem:[#allocation2 + $0x58] sm:$0xc0] %v2696_v5  ;;  %v2698_v8 = vmul.f32 %v2690_v44, %v7528_v25  ;;  %v4232_v25 = vpack.c.bf16 %v2832_v45, %v2831_v56  ;;  %v3175_v21 = vld [vmem:[%s7423_s4] sm:$0xff]  ;;  %v3176_v5 = vld [vmem:[%s7423_s4 + $0x8] sm:$0xff]  ;;  %v3181_v56 = vld [vmem:[%s7423_s4 + $0x30] sm:$0xff] }
 0x240   :  { %v2635_v42 = vadd.f32 %v2627_v38, %v7140_v12  ;;  %v2689_v32 = vadd.f32 %v2681_v37, %v7137_v53  ;;  %v4234_v13 = vpack.c.bf16 %v2850_v49, %v2849_v7  ;;  %v2833_v53 = vld [vmem:[%s7422_s3 + $0x360] sm:$0xff]  ;;  %v4242_v44 = vpack.c.bf16 %v3176_v5, %v3175_v21  ;;  %v3178_v38 = vld [vmem:[%s7423_s4 + $0x18] sm:$0xff]  ;;  %v3184_v7 = vld [vmem:[%s7423_s4 + $0x48] sm:$0xff] }
 0x241   :  { %v2420_v51 = vmul.f32 %v2412_v63, %v7534_v33  ;;  %v2444_v19 = vrot.slane %v2412_v63, 6  ;;  %2706 = vst [vmem:[#allocation2 + $0x68] sm:$0xc0] %v2698_v8  ;;  %4229 = vmatpush3.bf16.msra.mxu1 %v4228_v30  ;;  %v4236_v6 = vpack.c.bf16 %v2834_v43, %v2833_v53  ;;  %v3179_v30 = vld [vmem:[%s7423_s4 + $0x20] sm:$0xff]  ;;  %v3180_v63 = vld [vmem:[%s7423_s4 + $0x28] sm:$0xff]  ;;  %v3182_v45 = vld [vmem:[%s7423_s4 + $0x38] sm:$0xff] }
 0x242   :  { %v2643_v3 = vmul.f32 %v2635_v42, %v7535_v17  ;;  %v2667_v23 = vrot.slane %v2635_v42, 6  ;;  %v2697_v54 = vmul.f32 %v2689_v32, %v7531_v57  ;;  %4231 = vmatprep.subr.bf16.mxu1 %v4230_v36  ;;  %v2851_v57 = vld [vmem:[%s7422_s3 + $0x3f0] sm:$0xff]  ;;  %4243 = vmatprep.subr.bf16.mxu0 %v4242_v44  ;;  %v4250_v36 = vpack.c.bf16 %v3180_v63, %v3179_v30  ;;  %v3183_v42 = vld [vmem:[%s7423_s4 + $0x40] sm:$0xff] }
 0x243   :  { %2428 = vst [vmem:[#allocation2 + $0x38] sm:$0x30] %v2420_v51  ;;  %v2460_v1 = vmul.f32 %v7012_v47, %v2444_v19  ;;  %v2852_v47 = vld [vmem:[%s7422_s3 + $0x3f8] sm:$0xff]  ;;  %4245 = vmatpush3.bf16.msra.mxu0 %v4242_v44  ;;  %v4254_v8 = vpack.c.bf16 %v3182_v45, %v3181_v56  ;;  %v4258_v49 = vpack.c.bf16 %v3184_v7, %v3183_v42  ;;  %v3185_v32 = vld [vmem:[%s7423_s4 + $0x50] sm:$0xff]  ;;  %v3277_v53 = vld [vmem:[%s7421_s5 + $0x1] ss:$0 sm:$0xff] }
 0x244   :  { %2651 = vst [vmem:[#allocation2 + $0x70] sm:$0x30] %v2643_v3  ;;  %v2683_v29 = vmul.f32 %v7224_v62, %v2667_v23  ;;  %2705 = vst [vmem:[#allocation2 + $0x60] sm:$0xc0] %v2697_v54  ;;  %v4378_v11 = vpop.eup %4377  ;;  %v4238_v4 = vpack.c.bf16 %v2852_v47, %v2851_v57  ;;  %v3186_v51 = vld [vmem:[%s7423_s4 + $0x58] sm:$0xff]  ;;  %v3187_v3 = vld [vmem:[%s7423_s4 + $0x60] sm:$0xff] }
 0x245   :  { %v2468_v35 = vadd.f32 %v2460_v1, %v7231_v41  ;;  %4233 = vmatpush3.bf16.msra.mxu1 %v4232_v25  ;;  %v4262_v19 = vpack.c.bf16 %v3186_v51, %v3185_v32  ;;  %v3188_v23 = vld [vmem:[%s7423_s4 + $0x68] sm:$0xff]  ;;  %v3189_v54 = vld [vmem:[%s7423_s4 + $0x70] sm:$0xff]  ;;  %v3190_v1 = vld [vmem:[%s7423_s4 + $0x78] sm:$0xff] }
 0x246   :  { %v2691_v58 = vadd.f32 %v2683_v29, %v7140_v12  ;;  %v2720_v62 = vld [vmem:[#allocation2 + $0x58] sm:$0xff]  ;;  %4235 = vmatprep.subr.bf16.mxu1 %v4234_v13  ;;  %v2719_v12 = vld [vmem:[#allocation2 + $0x50] sm:$0xff]  ;;  %v4266_v25 = vpack.c.bf16 %v3188_v23, %v3187_v3  ;;  %v4270_v13 = vpack.c.bf16 %v3190_v1, %v3189_v54 }
 0x247   :  { %v2476_v0 = vmul.f32 %v2468_v35, %v7534_v33  ;;  %v2500_v39 = vrot.slane %v2468_v35, 6  ;;  %3003 = vmatprep.mubr.f32.mxu1 %v2720_v62  ;;  %v4240_v33 = vpack.c.bf16 %v2836_v60, %v2835_v14  ;;  %v7538_v57 = vld [vmem:[#allocation21_spill] sm:$0xff] }
 0x248   :  { %v2699_v41 = vmul.f32 %v2691_v58, %v7535_v17  ;;  %v2722_v15 = vld [vmem:[#allocation2 + $0x68] sm:$0xff]  ;;  %3004 = vmatmul.mubr.f32.gmra.mrb[36].mxu1 %v2719_v12  ;;  %v2857_v47 = vmul.f32 %v3277_v53, %v7538_v57  ;;  %v7540_v12 = vld [vmem:[#allocation3_spill] sm:$0xff] }
 0x249   :  { %2484 = vst [vmem:[#allocation2 + $0x38] sm:$0xc0] %v2476_v0  ;;  %v2516_v59 = vmul.f32 %v4378_v11, %v2500_v39  ;;  %3078 = vmatprep.mubr.f32.mxu0 %v2722_v15  ;;  %4237 = vmatpush3.bf16.msra.mxu1 %v4236_v6  ;;  %v7539_v0 = vld [vmem:[#allocation22_spill] sm:$0xff] }
 0x24a   :  { %2707 = vst [vmem:[#allocation2 + $0x70] sm:$0xc0] %v2699_v41  ;;  %4239 = vmatprep.subr.bf16.mxu1 %v4238_v4  ;;  %v2858_v39 = vmul.f32 %v3277_v53, %v7539_v0 }
 0x24b   :  { %v2524_v61 = vadd.f32 %v2516_v59, %v7228_v18  ;;  %v2721_v2 = vld [vmem:[#allocation2 + $0x60] sm:$0xff]  ;;  %v3278_v59 = vmul.f32 -1.442695, %v7540_v12 }
 0x24c   :  { %3079 = vmatmul.mubr.f32.gmra.mrb[42].mxu0 %v2721_v2 }
 0x24d   :  { %v2532_v22 = vmul.f32 %v2524_v61, %v7537_v26  ;;  %v2556_v20 = vrot.slane %v2524_v61, 6  ;;  %4241 = vmatpush3.bf16.msra.mxu1 %v4240_v33  ;;  %4379 = vpow2.f32 %v3278_v59 }
 0x24f   :  { %2540 = vst [vmem:[#allocation2 + $0x78] sm:$0x3] %v2532_v22  ;;  %v2572_v17 = vmul.f32 %v4378_v11, %v2556_v20 }
 0x250   :  { %v2716_v48 = vld [vmem:[#allocation2 + $0x38] sm:$0xff] }
 0x251   :  { %v2580_v9 = vadd.f32 %v2572_v17, %v7228_v18  ;;  %3148 = vmatprep.mubr.f32.mxu1 %v2716_v48  ;;  %v2723_v46 = vld [vmem:[#allocation2 + $0x70] sm:$0xff] }
 0x252   :  { %3149 = vmatmul.mubr.f32.vlgmr.msra.gmra.mrb[38].mxu1 %v2715_v16  ;;  %v7541_v16 = vld [vmem:[#allocation4_spill] sm:$0xff] }
 0x253   :  { %v2588_v40 = vmul.f32 %v2580_v9, %v7537_v26  ;;  %v2612_v24 = vrot.slane %v2580_v9, 6 }
 0x255   :  { %2596 = vst [vmem:[#allocation2 + $0x78] sm:$0xc] %v2588_v40  ;;  %v2628_v10 = vmul.f32 %v4378_v11, %v2612_v24  ;;  %v3279_v40 = vmul.f32 -1.442695, %v7541_v16 }
 0x257   :  { %v2636_v31 = vadd.f32 %v2628_v10, %v7228_v18  ;;  %v4380_v22 = vpop.eup %4379 }
 0x258   :  { %v3165_v20 = vadd.f32 1.0, %v4380_v22 }
 0x259   :  { %v2644_v52 = vmul.f32 %v2636_v31, %v7537_v26  ;;  %v2668_v50 = vrot.slane %v2636_v31, 6 }
 0x25a   :  { %4381 = vrcp.f32 %v3165_v20 }
 0x25b   :  { %2652 = vst [vmem:[#allocation2 + $0x78] sm:$0x30] %v2644_v52  ;;  %v2684_v55 = vmul.f32 %v4378_v11, %v2668_v50  ;;  %4383 = vpow2.f32 %v3279_v40 }
 0x25d   :  { %v2692_v27 = vadd.f32 %v2684_v55, %v7228_v18  ;;  %v3177_v18 = vld [vmem:[%s7423_s4 + $0x10] sm:$0xff] }
 0x25e   :  { %v4246_v37 = vpack.c.bf16 %v3178_v38, %v3177_v18 }
 0x25f   :  { %v2700_v34 = vmul.f32 %v2692_v27, %v7537_v26 }
 0x260   :  { %4247 = vmatprep.subr.bf16.mxu0 %v4246_v37 }
 0x261   :  { %2708 = vst [vmem:[#allocation2 + $0x78] sm:$0xc0] %v2700_v34  ;;  %4249 = vmatpush3.bf16.msra.mxu0 %v4246_v37 }
 0x262   :  { %4251 = vmatprep.subr.bf16.mxu0 %v4250_v36 }
 0x264   :  { %v4382_v27 = vpop.eup %4381 }
 0x265   :  { %4253 = vmatpush3.bf16.msra.mxu0 %v4250_v36  ;;  %v4384_v44 = vpop.eup %4383 }
 0x266   :  { %4255 = vmatprep.subr.bf16.mxu0 %v4254_v8  ;;  %v3166_v18 = vadd.f32 1.0, %v4384_v44 }
 0x268   :  { %v2724_v28 = vld [vmem:[#allocation2 + $0x78] sm:$0xff]  ;;  %4385 = vrcp.f32 %v3166_v18 }
 0x269   :  { %3153 = vmatprep.mubr.f32.mxu1 %v2724_v28  ;;  %4257 = vmatpush3.bf16.msra.mxu0 %v4254_v8 }
 0x26a   :  { %3154 = vmatmul.mubr.f32.gmra.mrb[40].mxu1 %v2723_v46  ;;  %4259 = vmatprep.subr.bf16.mxu0 %v4258_v49  ;;  %v3171_v46 = vmul.f32 %v4382_v27, %v7540_v12 }
 0x26d   :  { %4261 = vmatpush3.bf16.msra.mxu0 %v4258_v49 }
 0x26e   :  { %4263 = vmatprep.subr.bf16.mxu0 %v4262_v19 }
 0x271   :  { %4265 = vmatpush3.bf16.msra.mxu0 %v4262_v19 }
 0x272   :  { %4267 = vmatprep.subr.bf16.mxu0 %v4266_v25  ;;  %v4386_v30 = vpop.eup %4385 }
 0x273   :  { %v3172_v36 = vmul.f32 %v4386_v30, %v7541_v16 }
 0x275   :  { %4269 = vmatpush3.bf16.msra.mxu0 %v4266_v25 }
 0x276   :  { %4271 = vmatprep.subr.bf16.mxu0 %v4270_v13 }
 0x279   :  { %4273 = vmatpush3.bf16.msra.mxu0 %v4270_v13 }
 0x2e0   :  { %v3330_v43 = vpop.f32.mrb[36].mxu0 }
 0x2e1   :  { %v3331_v29 = vpop.f32.mrb[37].mxu0 }
 0x2e2   :  { %v3332_v35 = vadd.f32 %v3331_v29, %v3330_v43 }
 0x2e4   :  { %v2926_v58 = vadd.f32 %v3332_v35, %v2857_v47 }
 0x2fc   :  { %v3333_v6 = vpop.f32.mrb[38].mxu0 }
 0x2fd   :  { %v3334_v11 = vpop.f32.mrb[39].mxu0 }
 0x2fe   :  { %v3335_v62 = vadd.f32 %v3334_v11, %v3333_v6 }
 0x300   :  { %v2931_v4 = vadd.f32 %v3335_v62, %v2858_v39 }
 0x303   :  { %v3368_v14 = vpop.f32.mrb[34].mxu1 }
 0x304   :  { %v3369_v60 = vpop.f32.mrb[35].mxu1 }
 0x305   :  { %v3370_v41 = vadd.f32 %v3369_v60, %v3368_v14 }
 0x307   :  { %v3406_v15 = vpop.f32.mrb[40].mxu0  ;;  %v3001_v33 = vadd.f32 %v3370_v41, %v2926_v58 }
 0x308   :  { %v3407_v61 = vpop.f32.mrb[41].mxu0 }
 0x309   :  { %v3408_v2 = vadd.f32 %v3407_v61, %v3406_v15 }
 0x30b   :  { %v3076_v26 = vadd.f32 %v3408_v2, %v3001_v33 }
 0x31b   :  { %v3371_v17 = vpop.f32.mrb[36].mxu1 }
 0x31c   :  { %v3372_v48 = vpop.f32.mrb[37].mxu1 }
 0x31d   :  { %v3373_v9 = vadd.f32 %v3372_v48, %v3371_v17 }
 0x31f   :  { %v3409_v24 = vpop.f32.mrb[42].mxu0  ;;  %v3006_v10 = vadd.f32 %v3373_v9, %v2931_v4 }
 0x320   :  { %v3410_v31 = vpop.f32.mrb[43].mxu0 }
 0x321   :  { %v3411_v52 = vadd.f32 %v3410_v31, %v3409_v24 }
 0x323   :  { %v3081_v50 = vadd.f32 %v3411_v52, %v3006_v10 }
 0x325   :  { %v3444_v55 = vpop.f32.mrb[38].mxu1 }
 0x326   :  { %v3445_v34 = vpop.f32.mrb[39].mxu1 }
 0x327   :  { %v3446_v28 = vadd.f32 %v3445_v34, %v3444_v55 }
 0x329   :  { %v3151_v21 = vadd.f32 %v3446_v28, %v3076_v26 }
 0x32b   :  { %v3173_v5 = vmul.f32 %v3171_v46, %v3151_v21 }
 0x32d   :  { %3535 = vmatprep.mubr.f32.mxu0 %v3173_v5 }
 0x33d   :  { %v3447_v38 = vpop.f32.mrb[40].mxu1 }
 0x33e   :  { %v3448_v37 = vpop.f32.mrb[41].mxu1 }
 0x33f   :  { %v3449_v63 = vadd.f32 %v3448_v37, %v3447_v38 }
 0x341   :  { %v3156_v56 = vadd.f32 %v3449_v63, %v3081_v50 }
 0x343   :  { %v3174_v45 = vmul.f32 %v3172_v36, %v3156_v56 }
 0x345   :  { %3536 = vmatmul.mubr.f32.vlgmr.msra.gmra.mrb[44].mxu0 %v3174_v45 }
 0x418   :  { %v3537_v8 = vpop.f32.mrb[44].mxu0 }
 0x419   :  { %3267 = vst [vmem:[%s7424_s6 + $0x8] sm:$0xff] %v3537_v8  ;;  %v3257_v42 = vpop.f32.mrb[45].mxu0 }
 0x41a   :  { %3266 = vst [vmem:[%s7424_s6] sm:$0xff] %v3257_v42 }

</bundles_post_ra>
